<compile_context>
chip_gen: v6e
topology: v6e:2x2x1
jax: 0.10.0
libtpu: 0.0.40
codegen_flags: <defaults>
</compile_context>

<pallas_src>
import functools

import jax
import jax.numpy as jnp
from jax.experimental import pallas as pl
from jax.experimental.pallas import tpu as pltpu


_VMEM_LIMIT_BYTES = 32 * 1024 * 1024   # scoped VMEM limit, safe on v5e/v6e/v7x
_FUSED_VMEM_BUDGET = 12 * 1024 * 1024  # working-set ceiling for the 1-call path
_TILE_VMEM_BUDGET = 8 * 1024 * 1024    # per-tile working set for the 2-pass path


def _round_up(x, m):
    return (x + m - 1) // m * m


# ---------------------------------------------------------------------------
# Shared in-kernel conv: KH*KW shifted matmuls accumulated in f32 (no im2col).
# ---------------------------------------------------------------------------
def _conv_accumulate(x_ref, w_ref, *, kh, kw, stride, dilation, h_out, w_out):
    """x_ref: (B_t, H_pad, W_pad, C_in_p) bf16; w_ref: (KH*KW, C_in_p, C_out) bf16.

    Returns the un-normalized conv output as (B_t*H_out*W_out, C_out) f32."""
    xv = x_ref[...]
    b_t, _, _, c_in = xv.shape
    rows = b_t * h_out * w_out
    acc = None
    for di in range(kh):
        for dj in range(kw):
            i0 = di * dilation
            j0 = dj * dilation
            if stride == 1:
                xs = xv[:, i0:i0 + h_out, j0:j0 + w_out, :]
            else:
                # TODO(synk): strided value-slices are untested for stride > 1.
                xs = xv[:, i0:i0 + (h_out - 1) * stride + 1:stride,
                        j0:j0 + (w_out - 1) * stride + 1:stride, :]
            tap = jnp.dot(xs.reshape(rows, c_in), w_ref[di * kw + dj],
                          preferred_element_type=jnp.float32)
            acc = tap if acc is None else acc + tap
    return acc


def _fused_conv_bn_kernel(x_ref, w_ref, g_ref, b_ref, o_ref, *,
                          eps, inv_count, **conv):
    """Small-problem path: conv + batch stats + normalize in one kernel."""
    acc = _conv_accumulate(x_ref, w_ref, **conv)          # (M, C_out) f32
    mean = jnp.sum(acc, axis=0, keepdims=True) * inv_count
    cen = acc - mean
    var = jnp.sum(cen * cen, axis=0, keepdims=True) * inv_count
    scale = g_ref[...] * jax.lax.rsqrt(var + eps)          # (1, C_out)
    o_ref[...] = cen * scale + b_ref[...]


def _conv_stats_kernel(x_ref, w_ref, y_ref, stats_ref, **conv):
    """Pass 1 (general path): conv tile, bf16 y, per-tile (sum, centered-M2)."""
    acc = _conv_accumulate(x_ref, w_ref, **conv)           # (M_t, C_out) f32
    y_ref[...] = acc.astype(y_ref.dtype)                   # bf16 round trip
    rows = acc.shape[0]
    s = jnp.sum(acc, axis=0, keepdims=True)                # (1, C_out)
    cen = acc - s * (1.0 / rows)                           # tile-mean centered
    m2 = jnp.sum(cen * cen, axis=0, keepdims=True)         # (1, C_out)
    stats_ref[...] = jnp.concatenate([s, m2], axis=0).reshape(1, 2, -1)


def _bn_apply_kernel(y_ref, scale_ref, shift_ref, o_ref):
    """Pass 2: single fused multiply-add per element (scale/shift per channel)."""
    o_ref[...] = y_ref[...].astype(jnp.float32) * scale_ref[...] + shift_ref[...]


def basic_conv2d(x_nchw, weight, gamma, beta, *, stride=1, padding=0,
                 dilation=1, eps=1e-5, force_two_pass=False, batch_tile=None):
    """Forward of BasicConv2d: Conv2d(bias=False) + BatchNorm2d (training stats).

    x_nchw: (N, C_in, H, W). weight: (C_out, C_in, KH, KW). gamma/beta: (C_out,).
    """
    n, c_in, h, w = x_nchw.shape
    c_out, _, kh, kw = weight.shape
    h_out = (h + 2 * padding - dilation * (kh - 1) - 1) // stride + 1
    w_out = (w + 2 * padding - dilation * (kw - 1) - 1) // stride + 1
    hw = h_out * w_out
    m = n * hw
    c_in_p = _round_up(c_in, 8)          # sublane-friendly contraction dim
    h_pad = h + 2 * padding
    w_pad = w + 2 * padding

    # Plain-JAX glue (layout only): NCHW -> NHWC, conv zero-pad, pad C_in, bf16.
    x_nhwc = jnp.transpose(x_nchw, (0, 2, 3, 1))
    x_p = jnp.pad(x_nhwc, ((0, 0), (padding, padding), (padding, padding),
                           (0, c_in_p - c_in))).astype(jnp.bfloat16)
    # Per-tap weights: (KH*KW, C_in_p, C_out), bf16.
    w_taps = jnp.transpose(weight, (2, 3, 1, 0))
    w_taps = jnp.pad(w_taps, ((0, 0), (0, 0), (0, c_in_p - c_in), (0, 0)))
    w_taps = w_taps.reshape(kh * kw, c_in_p, c_out).astype(jnp.bfloat16)

    conv = dict(kh=kh, kw=kw, stride=stride, dilation=dilation,
                h_out=h_out, w_out=w_out)
    gamma = gamma.astype(jnp.float32)
    beta = beta.astype(jnp.float32)

    # Rough per-image VMEM working set (input slab + f32 accumulator + temps).
    per_image = 4 * (h_pad * w_pad * c_in_p * 2) + 20 * (hw * c_out)
    w_bytes = kh * kw * c_in_p * c_out * 2

    if not force_two_pass and n * per_image + w_bytes <= _FUSED_VMEM_BUDGET:
        # ---- Fast path: whole problem lives in VMEM; one pallas_call, the
        # ---- only HBM traffic is x, the weights and the final output.
        kern = functools.partial(_fused_conv_bn_kernel, eps=eps,
                                 inv_count=1.0 / m, **conv)
        out_flat = pl.pallas_call(
            kern,
            out_shape=jax.ShapeDtypeStruct((m, c_out), jnp.float32),
            compiler_params=pltpu.CompilerParams(
                vmem_limit_bytes=_VMEM_LIMIT_BYTES),
        )(x_p, w_taps, gamma.reshape(1, c_out), beta.reshape(1, c_out))
    else:
        # ---- General path: megacore-parallel pass 1 (conv + partial stats,
        # ---- bf16 y), tiny JAX merge, pass 2 (fused scale/shift apply).
        if batch_tile is None:
            b_t = 1
            for d in range(1, n + 1):
                if n % d == 0 and d * per_image + w_bytes <= _TILE_VMEM_BUDGET:
                    b_t = d
        else:
            b_t = batch_tile
        assert n % b_t == 0, "batch_tile must divide the batch size"
        if (b_t * hw) % 16 != 0:
            b_t = n   # full-extent block is always layout-legal
            # TODO(synk): ragged row tiles (H_out*W_out not a multiple of 16).
        n_tiles = n // b_t
        m_t = b_t * hw

        kern1 = functools.partial(_conv_stats_kernel, **conv)
        y, stats = pl.pallas_call(
            kern1,
            out_shape=(jax.ShapeDtypeStruct((m, c_out), jnp.bfloat16),
                       jax.ShapeDtypeStruct((n_tiles, 2, c_out), jnp.float32)),
            grid=(n_tiles,),
            in_specs=[
                pl.BlockSpec((b_t, h_pad, w_pad, c_in_p),
                             lambda i: (i, 0, 0, 0)),
                pl.BlockSpec((kh * kw, c_in_p, c_out), lambda i: (0, 0, 0)),
            ],
            out_specs=(
                pl.BlockSpec((m_t, c_out), lambda i: (i, 0)),
                pl.BlockSpec((1, 2, c_out), lambda i: (i, 0, 0)),
            ),
            compiler_params=pltpu.CompilerParams(
                dimension_semantics=("parallel",),
                vmem_limit_bytes=_VMEM_LIMIT_BYTES),
        )(x_p, w_taps)

        # Chan/Welford merge of per-tile (sum, centered M2) partials in f32 —
        # avoids global E[y^2]-E[y]^2 cancellation. Biased var (training BN).
        sums = stats[:, 0, :]                          # (n_tiles, C_out)
        m2s = stats[:, 1, :]
        cnt_t = jnp.float32(m_t)
        total = jnp.float32(m)
        mean = jnp.sum(sums, axis=0) / total
        mean_t = sums / cnt_t
        m2 = jnp.sum(m2s, axis=0) + cnt_t * jnp.sum((mean_t - mean) ** 2, axis=0)
        var = m2 / total
        inv = jax.lax.rsqrt(var + eps)
        scale = (gamma * inv).reshape(1, c_out)
        shift = (beta - mean * gamma * inv).reshape(1, c_out)

        out_flat = pl.pallas_call(
            _bn_apply_kernel,
            out_shape=jax.ShapeDtypeStruct((m, c_out), jnp.float32),
            grid=(n_tiles,),
            in_specs=[
                pl.BlockSpec((m_t, c_out), lambda i: (i, 0)),
                pl.BlockSpec((1, c_out), lambda i: (0, 0)),
                pl.BlockSpec((1, c_out), lambda i: (0, 0)),
            ],
            out_specs=pl.BlockSpec((m_t, c_out), lambda i: (i, 0)),
            compiler_params=pltpu.CompilerParams(
                dimension_semantics=("parallel",),
                vmem_limit_bytes=_VMEM_LIMIT_BYTES),
        )(y, scale, shift)

    # Compact (un-padded) layout -> NCHW; touches only real data.
    out_nhwc = out_flat.reshape(n, h_out, w_out, c_out)
    return jnp.transpose(out_nhwc, (0, 3, 1, 2))


def _reference(x, weight, gamma, beta, *, stride, padding, dilation, eps=1e-5):
    """Plain-JAX f32 reference matching PyTorch Conv2d(bias=False)+BatchNorm2d(train)."""
    y = jax.lax.conv_general_dilated(
        x, weight, window_strides=(stride, stride),
        padding=[(padding, padding), (padding, padding)],
        rhs_dilation=(dilation, dilation),
        dimension_numbers=("NCHW", "OIHW", "NCHW"))
    mean = jnp.mean(y, axis=(0, 2, 3), keepdims=True)
    var = jnp.mean((y - mean) ** 2, axis=(0, 2, 3), keepdims=True)
    return ((y - mean) * jax.lax.rsqrt(var + eps) * gamma.reshape(1, -1, 1, 1)
            + beta.reshape(1, -1, 1, 1))


if __name__ == "__main__":
    # Module config: BasicConv2d(in_planes=4, out_planes=8, kernel_size=3, padding=1)
    in_planes, out_planes, kernel_size, padding = 4, 8, 3, 1
    n, h, w = 2, 16, 16

    key = jax.random.PRNGKey(0)
    kx, kw_ = jax.random.split(key)
    x = jax.random.normal(kx, (n, in_planes, h, w), dtype=jnp.float32)
    weight = 0.1 * jax.random.normal(
        kw_, (out_planes, in_planes, kernel_size, kernel_size), dtype=jnp.float32)
    gamma = jnp.ones((out_planes,), jnp.float32)    # BatchNorm2d default init
    beta = jnp.zeros((out_planes,), jnp.float32)

    ref = _reference(x, weight, gamma, beta, stride=1, padding=padding, dilation=1)

    # Fast path: fully fused single pallas_call (whole problem resident in VMEM).
    fwd_fused = jax.jit(functools.partial(
        basic_conv2d, stride=1, padding=padding, dilation=1))
    out = fwd_fused(x, weight, gamma, beta)
    jax.block_until_ready(out)
    assert out.shape == (n, out_planes, h, w)
    err = float(jnp.max(jnp.abs(out - ref)))
    assert err < 1e-1, f"fused-path max abs error {err} too large"

    # General path: tiled two-pass kernels (forced; batch_tile=1 -> grid=(2,)).
    fwd_tiled = jax.jit(functools.partial(
        basic_conv2d, stride=1, padding=padding, dilation=1,
        force_two_pass=True, batch_tile=1))
    out2 = fwd_tiled(x, weight, gamma, beta)
    jax.block_until_ready(out2)
    err2 = float(jnp.max(jnp.abs(out2 - ref)))
    assert err2 < 1e-1, f"two-pass max abs error {err2} too large"

    print("KERNEL_OK")
</pallas_src>

<mosaic_0001>
module attributes {stable_mosaic.version = 11 : i64} {
  func.func @_fused_conv_bn_kernel(%arg0: memref<2x18x18x8xbf16, #tpu.memory_space<vmem>>, %arg1: memref<9x8x8xbf16, #tpu.memory_space<vmem>>, %arg2: memref<1x8xf32, #tpu.memory_space<vmem>>, %arg3: memref<1x8xf32, #tpu.memory_space<vmem>>, %arg4: memref<512x8xf32, #tpu.memory_space<vmem>>) attributes {dimension_semantics = [], scalar_prefetch = 0 : i64, scratch_operands = 0 : i64, tpu.core_type = #tpu.core_type<tc>} {
    %c0 = arith.constant 0 : index
    %c0_0 = arith.constant 0 : index
    %c0_1 = arith.constant 0 : index
    %c0_2 = arith.constant 0 : index
    %0 = vector.load %arg0[%c0, %c0_0, %c0_1, %c0_2] : memref<2x18x18x8xbf16, #tpu.memory_space<vmem>>, vector<2x18x18x8xbf16>
    %1 = vector.extract_strided_slice %0 {offsets = [0, 0, 0, 0], sizes = [2, 16, 16, 8], strides = [1, 1, 1, 1]} : vector<2x18x18x8xbf16> to vector<2x16x16x8xbf16>
    %2 = vector.shape_cast %1 : vector<2x16x16x8xbf16> to vector<512x8xbf16>
    %c0_3 = arith.constant 0 : index
    %c0_4 = arith.constant 0 : index
    %c0_5 = arith.constant 0 : index
    %3 = vector.load %arg1[%c0_3, %c0_4, %c0_5] : memref<9x8x8xbf16, #tpu.memory_space<vmem>>, vector<1x8x8xbf16>
    %4 = vector.shape_cast %3 : vector<1x8x8xbf16> to vector<8x8xbf16>
    %cst = arith.constant dense<0.000000e+00> : vector<512x8xf32>
    %5 = tpu.matmul %2, %4, %cst {dimension_numbers = #tpu.dot_dimension_numbers<[1], [0], [0], [1], [0, 0, 1, 1], [], []>} : vector<512x8xbf16>, vector<8x8xbf16>, vector<512x8xf32> -> vector<512x8xf32>
    %6 = vector.extract_strided_slice %0 {offsets = [0, 0, 1, 0], sizes = [2, 16, 16, 8], strides = [1, 1, 1, 1]} : vector<2x18x18x8xbf16> to vector<2x16x16x8xbf16>
    %7 = vector.shape_cast %6 : vector<2x16x16x8xbf16> to vector<512x8xbf16>
    %c1 = arith.constant 1 : index
    %c0_6 = arith.constant 0 : index
    %c0_7 = arith.constant 0 : index
    %8 = vector.load %arg1[%c1, %c0_6, %c0_7] : memref<9x8x8xbf16, #tpu.memory_space<vmem>>, vector<1x8x8xbf16>
    %9 = vector.shape_cast %8 : vector<1x8x8xbf16> to vector<8x8xbf16>
    %cst_8 = arith.constant dense<0.000000e+00> : vector<512x8xf32>
    %10 = tpu.matmul %7, %9, %cst_8 {dimension_numbers = #tpu.dot_dimension_numbers<[1], [0], [0], [1], [0, 0, 1, 1], [], []>} : vector<512x8xbf16>, vector<8x8xbf16>, vector<512x8xf32> -> vector<512x8xf32>
    %11 = arith.addf %5, %10 : vector<512x8xf32>
    %12 = vector.extract_strided_slice %0 {offsets = [0, 0, 2, 0], sizes = [2, 16, 16, 8], strides = [1, 1, 1, 1]} : vector<2x18x18x8xbf16> to vector<2x16x16x8xbf16>
    %13 = vector.shape_cast %12 : vector<2x16x16x8xbf16> to vector<512x8xbf16>
    %c2 = arith.constant 2 : index
    %c0_9 = arith.constant 0 : index
    %c0_10 = arith.constant 0 : index
    %14 = vector.load %arg1[%c2, %c0_9, %c0_10] : memref<9x8x8xbf16, #tpu.memory_space<vmem>>, vector<1x8x8xbf16>
    %15 = vector.shape_cast %14 : vector<1x8x8xbf16> to vector<8x8xbf16>
    %cst_11 = arith.constant dense<0.000000e+00> : vector<512x8xf32>
    %16 = tpu.matmul %13, %15, %cst_11 {dimension_numbers = #tpu.dot_dimension_numbers<[1], [0], [0], [1], [0, 0, 1, 1], [], []>} : vector<512x8xbf16>, vector<8x8xbf16>, vector<512x8xf32> -> vector<512x8xf32>
    %17 = arith.addf %11, %16 : vector<512x8xf32>
    %18 = vector.extract_strided_slice %0 {offsets = [0, 1, 0, 0], sizes = [2, 16, 16, 8], strides = [1, 1, 1, 1]} : vector<2x18x18x8xbf16> to vector<2x16x16x8xbf16>
    %19 = vector.shape_cast %18 : vector<2x16x16x8xbf16> to vector<512x8xbf16>
    %c3 = arith.constant 3 : index
    %c0_12 = arith.constant 0 : index
    %c0_13 = arith.constant 0 : index
    %20 = vector.load %arg1[%c3, %c0_12, %c0_13] : memref<9x8x8xbf16, #tpu.memory_space<vmem>>, vector<1x8x8xbf16>
    %21 = vector.shape_cast %20 : vector<1x8x8xbf16> to vector<8x8xbf16>
    %cst_14 = arith.constant dense<0.000000e+00> : vector<512x8xf32>
    %22 = tpu.matmul %19, %21, %cst_14 {dimension_numbers = #tpu.dot_dimension_numbers<[1], [0], [0], [1], [0, 0, 1, 1], [], []>} : vector<512x8xbf16>, vector<8x8xbf16>, vector<512x8xf32> -> vector<512x8xf32>
    %23 = arith.addf %17, %22 : vector<512x8xf32>
    %24 = vector.extract_strided_slice %0 {offsets = [0, 1, 1, 0], sizes = [2, 16, 16, 8], strides = [1, 1, 1, 1]} : vector<2x18x18x8xbf16> to vector<2x16x16x8xbf16>
    %25 = vector.shape_cast %24 : vector<2x16x16x8xbf16> to vector<512x8xbf16>
    %c4 = arith.constant 4 : index
    %c0_15 = arith.constant 0 : index
    %c0_16 = arith.constant 0 : index
    %26 = vector.load %arg1[%c4, %c0_15, %c0_16] : memref<9x8x8xbf16, #tpu.memory_space<vmem>>, vector<1x8x8xbf16>
    %27 = vector.shape_cast %26 : vector<1x8x8xbf16> to vector<8x8xbf16>
    %cst_17 = arith.constant dense<0.000000e+00> : vector<512x8xf32>
    %28 = tpu.matmul %25, %27, %cst_17 {dimension_numbers = #tpu.dot_dimension_numbers<[1], [0], [0], [1], [0, 0, 1, 1], [], []>} : vector<512x8xbf16>, vector<8x8xbf16>, vector<512x8xf32> -> vector<512x8xf32>
    %29 = arith.addf %23, %28 : vector<512x8xf32>
    %30 = vector.extract_strided_slice %0 {offsets = [0, 1, 2, 0], sizes = [2, 16, 16, 8], strides = [1, 1, 1, 1]} : vector<2x18x18x8xbf16> to vector<2x16x16x8xbf16>
    %31 = vector.shape_cast %30 : vector<2x16x16x8xbf16> to vector<512x8xbf16>
    %c5 = arith.constant 5 : index
    %c0_18 = arith.constant 0 : index
    %c0_19 = arith.constant 0 : index
    %32 = vector.load %arg1[%c5, %c0_18, %c0_19] : memref<9x8x8xbf16, #tpu.memory_space<vmem>>, vector<1x8x8xbf16>
    %33 = vector.shape_cast %32 : vector<1x8x8xbf16> to vector<8x8xbf16>
    %cst_20 = arith.constant dense<0.000000e+00> : vector<512x8xf32>
    %34 = tpu.matmul %31, %33, %cst_20 {dimension_numbers = #tpu.dot_dimension_numbers<[1], [0], [0], [1], [0, 0, 1, 1], [], []>} : vector<512x8xbf16>, vector<8x8xbf16>, vector<512x8xf32> -> vector<512x8xf32>
    %35 = arith.addf %29, %34 : vector<512x8xf32>
    %36 = vector.extract_strided_slice %0 {offsets = [0, 2, 0, 0], sizes = [2, 16, 16, 8], strides = [1, 1, 1, 1]} : vector<2x18x18x8xbf16> to vector<2x16x16x8xbf16>
    %37 = vector.shape_cast %36 : vector<2x16x16x8xbf16> to vector<512x8xbf16>
    %c6 = arith.constant 6 : index
    %c0_21 = arith.constant 0 : index
    %c0_22 = arith.constant 0 : index
    %38 = vector.load %arg1[%c6, %c0_21, %c0_22] : memref<9x8x8xbf16, #tpu.memory_space<vmem>>, vector<1x8x8xbf16>
    %39 = vector.shape_cast %38 : vector<1x8x8xbf16> to vector<8x8xbf16>
    %cst_23 = arith.constant dense<0.000000e+00> : vector<512x8xf32>
    %40 = tpu.matmul %37, %39, %cst_23 {dimension_numbers = #tpu.dot_dimension_numbers<[1], [0], [0], [1], [0, 0, 1, 1], [], []>} : vector<512x8xbf16>, vector<8x8xbf16>, vector<512x8xf32> -> vector<512x8xf32>
    %41 = arith.addf %35, %40 : vector<512x8xf32>
    %42 = vector.extract_strided_slice %0 {offsets = [0, 2, 1, 0], sizes = [2, 16, 16, 8], strides = [1, 1, 1, 1]} : vector<2x18x18x8xbf16> to vector<2x16x16x8xbf16>
    %43 = vector.shape_cast %42 : vector<2x16x16x8xbf16> to vector<512x8xbf16>
    %c7 = arith.constant 7 : index
    %c0_24 = arith.constant 0 : index
    %c0_25 = arith.constant 0 : index
    %44 = vector.load %arg1[%c7, %c0_24, %c0_25] : memref<9x8x8xbf16, #tpu.memory_space<vmem>>, vector<1x8x8xbf16>
    %45 = vector.shape_cast %44 : vector<1x8x8xbf16> to vector<8x8xbf16>
    %cst_26 = arith.constant dense<0.000000e+00> : vector<512x8xf32>
    %46 = tpu.matmul %43, %45, %cst_26 {dimension_numbers = #tpu.dot_dimension_numbers<[1], [0], [0], [1], [0, 0, 1, 1], [], []>} : vector<512x8xbf16>, vector<8x8xbf16>, vector<512x8xf32> -> vector<512x8xf32>
    %47 = arith.addf %41, %46 : vector<512x8xf32>
    %48 = vector.extract_strided_slice %0 {offsets = [0, 2, 2, 0], sizes = [2, 16, 16, 8], strides = [1, 1, 1, 1]} : vector<2x18x18x8xbf16> to vector<2x16x16x8xbf16>
    %49 = vector.shape_cast %48 : vector<2x16x16x8xbf16> to vector<512x8xbf16>
    %c8 = arith.constant 8 : index
    %c0_27 = arith.constant 0 : index
    %c0_28 = arith.constant 0 : index
    %50 = vector.load %arg1[%c8, %c0_27, %c0_28] : memref<9x8x8xbf16, #tpu.memory_space<vmem>>, vector<1x8x8xbf16>
    %51 = vector.shape_cast %50 : vector<1x8x8xbf16> to vector<8x8xbf16>
    %cst_29 = arith.constant dense<0.000000e+00> : vector<512x8xf32>
    %52 = tpu.matmul %49, %51, %cst_29 {dimension_numbers = #tpu.dot_dimension_numbers<[1], [0], [0], [1], [0, 0, 1, 1], [], []>} : vector<512x8xbf16>, vector<8x8xbf16>, vector<512x8xf32> -> vector<512x8xf32>
    %53 = arith.addf %47, %52 : vector<512x8xf32>
    %cst_30 = arith.constant dense<0.000000e+00> : vector<8xf32>
    %54 = vector.multi_reduction <add>, %53, %cst_30 [0] : vector<512x8xf32> to vector<8xf32>
    %55 = vector.shape_cast %54 : vector<8xf32> to vector<1x8xf32>
    %cst_31 = arith.constant 0.001953125 : f32
    %56 = vector.broadcast %cst_31 : f32 to vector<1x8xf32>
    %57 = arith.mulf %55, %56 : vector<1x8xf32>
    %58 = vector.broadcast %57 : vector<1x8xf32> to vector<512x8xf32>
    %59 = arith.subf %53, %58 : vector<512x8xf32>
    %60 = arith.mulf %59, %59 : vector<512x8xf32>
    %cst_32 = arith.constant dense<0.000000e+00> : vector<8xf32>
    %61 = vector.multi_reduction <add>, %60, %cst_32 [0] : vector<512x8xf32> to vector<8xf32>
    %62 = vector.shape_cast %61 : vector<8xf32> to vector<1x8xf32>
    %cst_33 = arith.constant 0.001953125 : f32
    %63 = vector.broadcast %cst_33 : f32 to vector<1x8xf32>
    %64 = arith.mulf %62, %63 : vector<1x8xf32>
    %c0_34 = arith.constant 0 : index
    %c0_35 = arith.constant 0 : index
    %65 = vector.load %arg2[%c0_34, %c0_35] : memref<1x8xf32, #tpu.memory_space<vmem>>, vector<1x8xf32>
    %cst_36 = arith.constant 9.99999974E-6 : f32
    %66 = vector.broadcast %cst_36 : f32 to vector<1x8xf32>
    %67 = arith.addf %64, %66 : vector<1x8xf32>
    %68 = math.rsqrt %67 : vector<1x8xf32>
    %69 = arith.mulf %65, %68 : vector<1x8xf32>
    %70 = vector.broadcast %69 : vector<1x8xf32> to vector<512x8xf32>
    %71 = arith.mulf %59, %70 : vector<512x8xf32>
    %c0_37 = arith.constant 0 : index
    %c0_38 = arith.constant 0 : index
    %72 = vector.load %arg3[%c0_37, %c0_38] : memref<1x8xf32, #tpu.memory_space<vmem>>, vector<1x8xf32>
    %73 = vector.broadcast %72 : vector<1x8xf32> to vector<512x8xf32>
    %74 = arith.addf %71, %73 : vector<512x8xf32>
    %c0_39 = arith.constant 0 : index
    %c0_40 = arith.constant 0 : index
    %75 = vector.load %arg4[%c0_39, %c0_40] : memref<512x8xf32, #tpu.memory_space<vmem>>, vector<512x8xf32>
    tpu.vector_store %arg4[%c0_39, %c0_40], %74 {strides = array<i32>} : memref<512x8xf32, #tpu.memory_space<vmem>>, vector<512x8xf32>,
    return
  }
}

</mosaic_0001>

<bundles_post_ra>
// kernel: basic_conv2d.1
= control target key start
LH: loop header
LB: loop body
LE: loop exit
PB: predicated region body
PF: predicated region fallthrough
CT: control target
= control target key end

     0   :  { %vm1093_vm0 = vcmask 1043456   ;;  %vm127_vm1 = vsmask.f32 3328  ;;  %vm128_vm2 = vsmask.f32 7440  ;;  %vm996_vm3 = vcmask 64512   ;;  %s11180_s1 = inlined_call_operand.vmem [shape: bf16[9,8,8], index: 1, kind: input, shape index: {}]   ;;  %s11181_s0 = inlined_call_operand.vmem [shape: bf16[2,18,18,8], index: 0, kind: input, shape index: {}]   ;;  %s11182_s2 = inlined_call_operand.vmem [shape: f32[1,8], index: 2, kind: input, shape index: {}]   ;;  %s11183_s3 = inlined_call_operand.vmem [shape: f32[1,8], index: 3, kind: input, shape index: {}]   ;;  %s11184_s4 = inlined_call_operand.vmem [shape: f32[512,8], index: 4, kind: output, shape index: {}]  }
   0x1   :  { %v5708_v0 = vld [vmem:[%s11180_s1 + $0x4] sm:$0xf]  ;;  %v18_v1 = vld [vmem:[%s11181_s0] sm:$0xf]  ;;  %v7185_v4 = vld [vmem:[%s11181_s0 + $0x8] sm:$0x1] }
   0x2   :  { %v19_v2 = vld [vmem:[%s11181_s0 + $0x4] sm:$0xf]  ;;  %7043 = vmatprep.subr.msk.bf16.mxu1 %vm1093_vm0, %v5708_v0  ;;  %7042 = vmatprep.subr.msk.bf16.mxu0 %vm1093_vm0, %v5708_v0  ;;  %v1095_v3 = vsel %vm1093_vm0, %v5708_v0, 0  ;;  %v131_v5 = vshrl.u32 %v18_v1, 16  ;;  %v134_v6 = vshll.u32 %v18_v1, 16  ;;  %v150_v9 = vshll.u32 %v7185_v4, 16  ;;  %vm7202_vm4 = vmor %vm127_vm1, %vm128_vm2 }
   0x3   :  { %v140_v7 = vshll.u32 %v19_v2, 16  ;;  %7041 = vmatpush3.bf16.msra.mxu1 %v1095_v3  ;;  %6447 = vmatpush3.bf16.msra.mxu0 %v1095_v3  ;;  %v144_v8 = vshrl.u32 %v19_v2, 16  ;;  %v72_v10 = vld [vmem:[%s11181_s0 + $0xd8] sm:$0xf]  ;;  %v73_v14 = vld [vmem:[%s11181_s0 + $0xdc] sm:$0xf] }
   0x4   :  { %v133_v11 = vrot.slane %v131_v5, 4  ;;  %v136_v12 = vrot.slane %v134_v6, 5  ;;  %v515_v15 = vshrl.u32 %v72_v10, 16  ;;  %v74_v17 = vld [vmem:[%s11181_s0 + $0xe0] sm:$0x1]  ;;  %v518_v18 = vshll.u32 %v72_v10, 16 }
   0x5   :  { %v142_v13 = vrot.slane %v140_v7, 5  ;;  %v146_v16 = vrot.slane %v144_v8, 4  ;;  %v524_v19 = vshll.u32 %v73_v14, 16  ;;  %v528_v22 = vshrl.u32 %v73_v14, 16  ;;  %v126_v24 = vld [vmem:[%s11180_s1] sm:$0xf] }
   0x6   :  { %v137_v20 = vor.u32 %v136_v12, %v133_v11  ;;  %v517_v21 = vrot.slane %v515_v15, 4  ;;  %v534_v23 = vshll.u32 %v74_v17, 16  ;;  %v11388_v25 = vmov 0  ;;  %7044 = vmatprep.subr.msk.bf16.mxu1 %vm1093_vm0, %v126_v24  ;;  %v21_v30 = vld [vmem:[%s11181_s0 + $0xc] sm:$0xf] }
   0x7   :  { %v11389_v25 = vsel %vm7202_vm4, 4294967295, %v11388_v25  ;;  %v147_v26 = vor.u32 %v146_v16, %v142_v13  ;;  %v152_v27 = vrot.slane %v150_v9, 5  ;;  %v520_v28 = vrot.slane %v518_v18, 5  ;;  %v22_v34 = vld [vmem:[%s11181_s0 + $0x10] sm:$0xf] }
   0x8   :  { %11390 = vst [vmem:[#allocation2_spill] sm:$0xff] %v11389_v25  ;;  %v526_v29 = vrot.slane %v524_v19, 5  ;;  %v138_v31 = vrot.slane %v137_v20, 4  ;;  %v530_v32 = vrot.slane %v528_v22, 4  ;;  %v536_v33 = vrot.slane %v534_v23, 5 }
   0x9   :  { %v155_v35 = vshrl.u32 %v21_v30, 16  ;;  %v148_v36 = vrot.slane %v147_v26, 4  ;;  %v521_v37 = vor.u32 %v520_v28, %v517_v21  ;;  %v23_v38 = vld [vmem:[%s11181_s0 + $0x14] sm:$0x1]  ;;  %v158_v39 = vshll.u32 %v21_v30, 16 }
   0xa   :  { %v164_v40 = vshll.u32 %v22_v34, 16  ;;  %v143_v41 = vsel %vm7202_vm4, %v138_v31, %v142_v13  ;;  %v531_v42 = vor.u32 %v530_v32, %v526_v29  ;;  %v168_v44 = vshrl.u32 %v22_v34, 16  ;;  %v75_v45 = vld [vmem:[%s11181_s0 + $0xe4] sm:$0xf]  ;;  %v76_v50 = vld [vmem:[%s11181_s0 + $0xe8] sm:$0xf] }
   0xb   :  { %v157_v43 = vrot.slane %v155_v35, 4  ;;  %v153_v46 = vsel %vm7202_vm4, %v148_v36, %v152_v27  ;;  %v522_v47 = vrot.slane %v521_v37, 4  ;;  %v160_v48 = vrot.slane %v158_v39, 5  ;;  %v5869_v55 = vld [vmem:[%s11180_s1 + $0x8] sm:$0xf] }
   0xc   :  { %v166_v49 = vrot.slane %v164_v40, 5  ;;  %v5709_v51 = vcombine.low %v143_v41, %v153_v46  ;;  %v532_v52 = vrot.slane %v531_v42, 4  ;;  %v170_v53 = vrot.slane %v168_v44, 4  ;;  %v77_v59 = vld [vmem:[%s11181_s0 + $0xec] sm:$0x1]  ;;  %7045 = vmatprep.subr.msk.bf16.mxu0 %vm1093_vm0, %v5869_v55 }
   0xd   :  { %v174_v54 = vshll.u32 %v23_v38, 16  ;;  %v527_v57 = vsel %vm7202_vm4, %v522_v47, %v526_v29  ;;  %v161_v58 = vor.u32 %v160_v48, %v157_v43  ;;  %v539_v63 = vshrl.u32 %v75_v45, 16  ;;  %v24_v5 = vld [vmem:[%s11181_s0 + $0x18] sm:$0xf]  ;;  %v25_v10 = vld [vmem:[%s11181_s0 + $0x1c] sm:$0xf] }
   0xe   :  { %6448 = vmatprep.mubr.msk.bf16.mxu0 %vm996_vm3, %v5709_v51  ;;  %v537_v60 = vsel %vm7202_vm4, %v532_v52, %v536_v33  ;;  %v171_v61 = vor.u32 %v170_v53, %v166_v49  ;;  %v542_v2 = vshll.u32 %v75_v45, 16  ;;  %v548_v3 = vshll.u32 %v76_v50, 16  ;;  %v26_v15 = vld [vmem:[%s11181_s0 + $0x20] sm:$0x1]  ;;  %v78_v20 = vld [vmem:[%s11181_s0 + $0xf0] sm:$0xf] }
   0xf   :  { %v176_v62 = vrot.slane %v174_v54, 5  ;;  %v5725_v0 = vcombine.low %v527_v57, %v537_v60  ;;  %v162_v1 = vrot.slane %v161_v58, 4  ;;  %v541_v7 = vrot.slane %v539_v63, 4  ;;  %v79_v33 = vld [vmem:[%s11181_s0 + $0xf4] sm:$0xf] }
  0x10   :  { %v172_v6 = vrot.slane %v171_v61, 4  ;;  %v552_v8 = vshrl.u32 %v76_v50, 16  ;;  %v558_v9 = vshll.u32 %v77_v59, 16  ;;  %v544_v12 = vrot.slane %v542_v2, 5  ;;  %v80_v39 = vld [vmem:[%s11181_s0 + $0xf8] sm:$0x1] }
  0x11   :  { %6480 = vmatprep.mubr.msk.bf16.mxu1 %vm996_vm3, %v5725_v0  ;;  %v167_v11 = vsel %vm7202_vm4, %v162_v1, %v166_v49  ;;  %v550_v13 = vrot.slane %v548_v3, 5  ;;  %v1643_v14 = vsel %vm1093_vm0, %v126_v24, 0  ;;  %v2388_v19 = vsel %vm1093_vm0, %v5869_v55, 0  ;;  %v27_v44 = vld [vmem:[%s11181_s0 + $0x24] sm:$0xf] }
  0x12   :  { %v177_v16 = vsel %vm7202_vm4, %v172_v6, %v176_v62  ;;  %v554_v17 = vrot.slane %v552_v8, 4  ;;  %v560_v18 = vrot.slane %v558_v9, 5  ;;  %v545_v22 = vor.u32 %v544_v12, %v541_v7  ;;  %v28_v53 = vld [vmem:[%s11181_s0 + $0x28] sm:$0xf]  ;;  %v29_v62 = vld [vmem:[%s11181_s0 + $0x2c] sm:$0x1] }
  0x13   :  { %v7258_v21 = vcombine.low %v167_v11, %v177_v16  ;;  %v179_v23 = vshrl.u32 %v24_v5, 16  ;;  %v182_v24 = vshll.u32 %v24_v5, 16  ;;  %v188_v27 = vshll.u32 %v25_v10, 16  ;;  %v81_v0 = vld [vmem:[%s11181_s0 + $0xfc] sm:$0xf] }
  0x14   :  { %v555_v26 = vor.u32 %v554_v17, %v550_v13  ;;  %v192_v28 = vshrl.u32 %v25_v10, 16  ;;  %v198_v29 = vshll.u32 %v26_v15, 16  ;;  %v546_v30 = vrot.slane %v545_v22, 4  ;;  %v82_v10 = vld [vmem:[%s11181_s0 + $0x100] sm:$0xf] }
  0x15   :  { %11391 = vst [vmem:[#allocation3_spill] sm:$0xff] %v7258_v21  ;;  %6449 = vmatmul.mubr.msk.bf16.vlgmr.msra.gmra.mxu0 %vm996_vm3, %v7258_v21  ;;  %v181_v31 = vrot.slane %v179_v23, 4  ;;  %v184_v32 = vrot.slane %v182_v24, 5  ;;  %v563_v34 = vshrl.u32 %v78_v20, 16  ;;  %v190_v36 = vrot.slane %v188_v27, 5 }
  0x16   :  { %v556_v35 = vrot.slane %v555_v26, 4  ;;  %6579 = vmatpush3.bf16.msra.mxu0 %v2388_v19  ;;  %v194_v37 = vrot.slane %v192_v28, 4  ;;  %v200_v38 = vrot.slane %v198_v29, 5  ;;  %v551_v40 = vsel %vm7202_vm4, %v546_v30, %v550_v13 }
  0x17   :  { %v185_v41 = vor.u32 %v184_v32, %v181_v31  ;;  %v565_v42 = vrot.slane %v563_v34, 4  ;;  %v566_v43 = vshll.u32 %v78_v20, 16  ;;  %v572_v47 = vshll.u32 %v79_v33, 16  ;;  %v30_v20 = vld [vmem:[%s11181_s0 + $0x30] sm:$0xf] }
  0x18   :  { %v561_v45 = vsel %vm7202_vm4, %v556_v35, %v560_v18  ;;  %v195_v46 = vor.u32 %v194_v37, %v190_v36  ;;  %v576_v48 = vshrl.u32 %v79_v33, 16  ;;  %v582_v52 = vshll.u32 %v80_v39, 16  ;;  %v83_v18 = vld [vmem:[%s11181_s0 + $0x104] sm:$0x1]  ;;  %v31_v31 = vld [vmem:[%s11181_s0 + $0x34] sm:$0xf] }
  0x19   :  { %v7275_v49 = vcombine.low %v551_v40, %v561_v45  ;;  %v186_v50 = vrot.slane %v185_v41, 4  ;;  %v568_v51 = vrot.slane %v566_v43, 5  ;;  %v574_v55 = vrot.slane %v572_v47, 5  ;;  %v32_v39 = vld [vmem:[%s11181_s0 + $0x38] sm:$0x1] }
  0x1a   :  { %v196_v54 = vrot.slane %v195_v46, 4  ;;  %v578_v57 = vrot.slane %v576_v48, 4  ;;  %v203_v58 = vshrl.u32 %v27_v44, 16  ;;  %v584_v61 = vrot.slane %v582_v52, 5  ;;  %v84_v45 = vld [vmem:[%s11181_s0 + $0x108] sm:$0xf] }
  0x1b   :  { %11392 = vst [vmem:[#allocation4_spill] sm:$0xff] %v7275_v49  ;;  %6481 = vmatmul.mubr.msk.bf16.vlgmr.msra.gmra.mxu1 %vm996_vm3, %v7275_v49  ;;  %v191_v59 = vsel %vm7202_vm4, %v186_v50, %v190_v36  ;;  %v569_v60 = vor.u32 %v568_v51, %v565_v42  ;;  %v206_v63 = vshll.u32 %v27_v44, 16  ;;  %v212_v5 = vshll.u32 %v28_v53, 16  ;;  %v85_v51 = vld [vmem:[%s11181_s0 + $0x10c] sm:$0xf] }
  0x1c   :  { %6513 = vmatpush3.bf16.msra.mxu1 %v1643_v14  ;;  %v201_v1 = vsel %vm7202_vm4, %v196_v54, %v200_v38  ;;  %v579_v2 = vor.u32 %v578_v57, %v574_v55  ;;  %v205_v3 = vrot.slane %v203_v58, 4  ;;  %v216_v9 = vshrl.u32 %v28_v53, 16 }
  0x1d   :  { %v7292_v6 = vcombine.low %v191_v59, %v201_v1  ;;  %v570_v7 = vrot.slane %v569_v60, 4  ;;  %v208_v8 = vrot.slane %v206_v63, 5  ;;  %v214_v12 = vrot.slane %v212_v5, 5  ;;  %v86_v60 = vld [vmem:[%s11181_s0 + $0x110] sm:$0x1] }
  0x1e   :  { %v580_v11 = vrot.slane %v579_v2, 4  ;;  %v222_v13 = vshll.u32 %v29_v62, 16  ;;  %v587_v15 = vshrl.u32 %v81_v0, 16  ;;  %v218_v17 = vrot.slane %v216_v9, 4 }
  0x1f   :  { %11393 = vst [vmem:[#allocation5_spill] sm:$0xff] %v7292_v6  ;;  %6452 = vmatprep.mubr.msk.bf16.mxu0 %vm996_vm3, %v7292_v6  ;;  %v575_v14 = vsel %vm7202_vm4, %v570_v7, %v574_v55  ;;  %v209_v16 = vor.u32 %v208_v8, %v205_v3  ;;  %v590_v19 = vshll.u32 %v81_v0, 16  ;;  %v596_v26 = vshll.u32 %v82_v10, 16  ;;  %v33_v8 = vld [vmem:[%s11181_s0 + $0x3c] sm:$0xf] }
  0x20   :  { %v585_v22 = vsel %vm7202_vm4, %v580_v11, %v584_v61  ;;  %v224_v23 = vrot.slane %v222_v13, 5  ;;  %v589_v24 = vrot.slane %v587_v15, 4  ;;  %v219_v29 = vor.u32 %v218_v17, %v214_v12  ;;  %v34_v13 = vld [vmem:[%s11181_s0 + $0x40] sm:$0xf] }
  0x21   :  { %v7309_v27 = vcombine.low %v575_v14, %v585_v22  ;;  %v210_v28 = vrot.slane %v209_v16, 4  ;;  %v592_v30 = vrot.slane %v590_v19, 5  ;;  %v598_v32 = vrot.slane %v596_v26, 5 }
  0x22   :  { %v600_v33 = vshrl.u32 %v82_v10, 16  ;;  %v606_v34 = vshll.u32 %v83_v18, 16  ;;  %v227_v35 = vshrl.u32 %v30_v20, 16  ;;  %v220_v37 = vrot.slane %v219_v29, 4 }
  0x23   :  { %11394 = vst [vmem:[#allocation6_spill] sm:$0xff] %v7309_v27  ;;  %6484 = vmatprep.mubr.msk.bf16.mxu1 %vm996_vm3, %v7309_v27  ;;  %v215_v36 = vsel %vm7202_vm4, %v210_v28, %v214_v12  ;;  %v593_v38 = vor.u32 %v592_v30, %v589_v24  ;;  %v230_v40 = vshll.u32 %v30_v20, 16  ;;  %v236_v44 = vshll.u32 %v31_v31, 16  ;;  %v35_v20 = vld [vmem:[%s11181_s0 + $0x44] sm:$0x1] }
  0x24   :  { %v602_v41 = vrot.slane %v600_v33, 4  ;;  %v608_v42 = vrot.slane %v606_v34, 5  ;;  %v229_v43 = vrot.slane %v227_v35, 4  ;;  %v225_v46 = vsel %vm7202_vm4, %v220_v37, %v224_v23  ;;  %v87_v30 = vld [vmem:[%s11181_s0 + $0x114] sm:$0xf] }
  0x25   :  { %v594_v47 = vrot.slane %v593_v38, 4  ;;  %v232_v48 = vrot.slane %v230_v40, 5  ;;  %v240_v50 = vshrl.u32 %v31_v31, 16  ;;  %v7329_v52 = vcombine.low %v215_v36, %v225_v46  ;;  %v88_v35 = vld [vmem:[%s11181_s0 + $0x118] sm:$0xf] }
  0x26   :  { %v603_v53 = vor.u32 %v602_v41, %v598_v32  ;;  %v238_v54 = vrot.slane %v236_v44, 5  ;;  %v246_v55 = vshll.u32 %v32_v39, 16  ;;  %v611_v61 = vshrl.u32 %v84_v45, 16 }
  0x27   :  { %11395 = vst [vmem:[#allocation7_spill] sm:$0xff] %v7329_v52  ;;  %v599_v57 = vsel %vm7202_vm4, %v594_v47, %v598_v32  ;;  %v233_v58 = vor.u32 %v232_v48, %v229_v43  ;;  %v242_v59 = vrot.slane %v240_v50, 4  ;;  %6453 = vmatmul.mubr.msk.bf16.gmra.mxu0 %vm996_vm3, %v7329_v52  ;;  %v614_v0 = vshll.u32 %v84_v45, 16  ;;  %v7377_v50 = vld [vmem:[%s11181_s0 + $0x48] sm:$0xf] }
  0x28   :  { %v604_v62 = vrot.slane %v603_v53, 4  ;;  %v248_v63 = vrot.slane %v246_v55, 5  ;;  %v620_v1 = vshll.u32 %v85_v51, 16  ;;  %v613_v5 = vrot.slane %v611_v61, 4 }
  0x29   :  { %v234_v2 = vrot.slane %v233_v58, 4  ;;  %v243_v3 = vor.u32 %v242_v59, %v238_v54  ;;  %v624_v7 = vshrl.u32 %v85_v51, 16  ;;  %v616_v10 = vrot.slane %v614_v0, 5  ;;  %v7393_v0 = vld [vmem:[%s11181_s0 + $0x50] sm:$0x1] }
  0x2a   :  { %v609_v9 = vsel %vm7202_vm4, %v604_v62, %v608_v42  ;;  %v622_v11 = vrot.slane %v620_v1, 5  ;;  %v630_v12 = vshll.u32 %v86_v60, 16  ;;  %v251_v22 = vshrl.u32 %v33_v8, 16  ;;  %v89_v42 = vld [vmem:[%s11181_s0 + $0x11c] sm:$0x1] }
  0x2b   :  { %v7346_v15 = vcombine.low %v599_v57, %v609_v9  ;;  %v239_v14 = vsel %vm7202_vm4, %v234_v2, %v238_v54  ;;  %v244_v16 = vrot.slane %v243_v3, 4  ;;  %v626_v17 = vrot.slane %v624_v7, 4  ;;  %v7384_v57 = vld [vmem:[%s11181_s0 + $0x4c] sm:$0xf]  ;;  %v90_v9 = vld [vmem:[%s11181_s0 + $0x120] sm:$0xf] }
  0x2c   :  { %v617_v18 = vor.u32 %v616_v10, %v613_v5  ;;  %v632_v19 = vrot.slane %v630_v12, 5  ;;  %v254_v23 = vshll.u32 %v33_v8, 16  ;;  %v260_v28 = vshll.u32 %v34_v13, 16 }
  0x2d   :  { %11396 = vst [vmem:[#allocation8_spill] sm:$0xff] %v7346_v15  ;;  %6485 = vmatmul.mubr.msk.bf16.gmra.mxu1 %vm996_vm3, %v7346_v15  ;;  %v249_v24 = vsel %vm7202_vm4, %v244_v16, %v248_v63  ;;  %v627_v26 = vor.u32 %v626_v17, %v622_v11  ;;  %v264_v29 = vshrl.u32 %v34_v13, 16  ;;  %v253_v33 = vrot.slane %v251_v22, 4 }
  0x2e   :  { %v7360_v31 = vcombine.low %v239_v14, %v249_v24  ;;  %v618_v32 = vrot.slane %v617_v18, 4  ;;  %v256_v34 = vrot.slane %v254_v23, 5  ;;  %v262_v37 = vrot.slane %v260_v28, 5  ;;  %v91_v14 = vld [vmem:[%s11181_s0 + $0x124] sm:$0xf] }
  0x2f   :  { %v628_v36 = vrot.slane %v627_v26, 4  ;;  %v266_v38 = vrot.slane %v264_v29, 4  ;;  %v270_v39 = vshll.u32 %v35_v20, 16  ;;  %v635_v43 = vshrl.u32 %v87_v30, 16  ;;  %v92_v23 = vld [vmem:[%s11181_s0 + $0x128] sm:$0x1] }
  0x30   :  { %11397 = vst [vmem:[#allocation9_spill] sm:$0xff] %v7360_v31  ;;  %6456 = vmatprep.mubr.msk.bf16.mxu0 %vm996_vm3, %v7360_v31  ;;  %v623_v40 = vsel %vm7202_vm4, %v618_v32, %v622_v11  ;;  %v257_v41 = vor.u32 %v256_v34, %v253_v33  ;;  %v638_v44 = vshll.u32 %v87_v30, 16  ;;  %v644_v48 = vshll.u32 %v88_v35, 16 }
  0x31   :  { %v633_v45 = vsel %vm7202_vm4, %v628_v36, %v632_v19  ;;  %v267_v46 = vor.u32 %v266_v38, %v262_v37  ;;  %v272_v47 = vrot.slane %v270_v39, 5  ;;  %v637_v54 = vrot.slane %v635_v43, 4 }
  0x32   :  { %v7379_v51 = vcombine.low %v623_v40, %v633_v45  ;;  %v258_v53 = vrot.slane %v257_v41, 4  ;;  %v640_v55 = vrot.slane %v638_v44, 5  ;;  %v646_v59 = vrot.slane %v644_v48, 5 }
  0x33   :  { %v268_v58 = vrot.slane %v267_v46, 4  ;;  %v648_v60 = vshrl.u32 %v88_v35, 16  ;;  %v654_v61 = vshll.u32 %v89_v42, 16  ;;  %v275_v1 = vshrl.u32 %v7377_v50, 16  ;;  %v7427_v42 = vld [vmem:[%s11181_s0 + $0x58] sm:$0xf] }
  0x34   :  { %11398 = vst [vmem:[#allocation10_spill] sm:$0xff] %v7379_v51  ;;  %6488 = vmatprep.mubr.msk.bf16.mxu1 %vm996_vm3, %v7379_v51  ;;  %v263_v62 = vsel %vm7202_vm4, %v258_v53, %v262_v37  ;;  %v641_v63 = vor.u32 %v640_v55, %v637_v54  ;;  %v278_v2 = vshll.u32 %v7377_v50, 16  ;;  %v284_v8 = vshll.u32 %v7384_v57, 16  ;;  %v7420_v37 = vld [vmem:[%s11181_s0 + $0x54] sm:$0xf] }
  0x35   :  { %v273_v3 = vsel %vm7202_vm4, %v268_v58, %v272_v47  ;;  %v650_v5 = vrot.slane %v648_v60, 4  ;;  %v656_v7 = vrot.slane %v654_v61, 5  ;;  %v277_v12 = vrot.slane %v275_v1, 4  ;;  %v7436_v47 = vld [vmem:[%s11181_s0 + $0x5c] sm:$0x1] }
  0x36   :  { %v7403_v10 = vcombine.low %v263_v62, %v273_v3  ;;  %v642_v11 = vrot.slane %v641_v63, 4  ;;  %v280_v13 = vrot.slane %v278_v2, 5  ;;  %v286_v17 = vrot.slane %v284_v8, 5  ;;  %v93_v62 = vld [vmem:[%s11181_s0 + $0x12c] sm:$0xf] }
  0x37   :  { %v651_v16 = vor.u32 %v650_v5, %v646_v59  ;;  %v288_v18 = vshrl.u32 %v7384_v57, 16  ;;  %v294_v19 = vshll.u32 %v7393_v0, 16  ;;  %v659_v24 = vshrl.u32 %v90_v9, 16  ;;  %v94_v5 = vld [vmem:[%s11181_s0 + $0x130] sm:$0xf] }
  0x38   :  { %11399 = vst [vmem:[#allocation11_spill] sm:$0xff] %v7403_v10  ;;  %6457 = vmatmul.mubr.msk.bf16.gmra.mxu0 %vm996_vm3, %v7403_v10  ;;  %v647_v20 = vsel %vm7202_vm4, %v642_v11, %v646_v59  ;;  %v281_v22 = vor.u32 %v280_v13, %v277_v12  ;;  %v662_v26 = vshll.u32 %v90_v9, 16  ;;  %v668_v32 = vshll.u32 %v91_v14, 16 }
  0x39   :  { %v652_v28 = vrot.slane %v651_v16, 4  ;;  %v290_v29 = vrot.slane %v288_v18, 4  ;;  %v296_v30 = vrot.slane %v294_v19, 5  ;;  %v661_v34 = vrot.slane %v659_v24, 4  ;;  %v95_v16 = vld [vmem:[%s11181_s0 + $0x134] sm:$0x1] }
  0x3a   :  { %v282_v33 = vrot.slane %v281_v22, 4  ;;  %v664_v35 = vrot.slane %v662_v26, 5  ;;  %v672_v36 = vshrl.u32 %v91_v14, 16  ;;  %v670_v40 = vrot.slane %v668_v32, 5 }
  0x3b   :  { %v657_v38 = vsel %vm7202_vm4, %v652_v28, %v656_v7  ;;  %v291_v39 = vor.u32 %v290_v29, %v286_v17  ;;  %v678_v41 = vshll.u32 %v92_v23, 16  ;;  %v299_v54 = vshrl.u32 %v7420_v37, 16  ;;  %v7467_v23 = vld [vmem:[%s11181_s0 + $0x60] sm:$0xf] }
  0x3c   :  { %v7429_v43 = vcombine.low %v647_v20, %v657_v38  ;;  %v287_v44 = vsel %vm7202_vm4, %v282_v33, %v286_v17  ;;  %v665_v45 = vor.u32 %v664_v35, %v661_v34  ;;  %v674_v46 = vrot.slane %v672_v36, 4 }
  0x3d   :  { %v292_v48 = vrot.slane %v291_v39, 4  ;;  %v680_v53 = vrot.slane %v678_v41, 5  ;;  %v302_v55 = vshll.u32 %v7420_v37, 16  ;;  %v308_v60 = vshll.u32 %v7427_v42, 16 }
  0x3e   :  { %11400 = vst [vmem:[#allocation12_spill] sm:$0xff] %v7429_v43  ;;  %6489 = vmatmul.mubr.msk.bf16.gmra.mxu1 %vm996_vm3, %v7429_v43  ;;  %v666_v58 = vrot.slane %v665_v45, 4  ;;  %v675_v59 = vor.u32 %v674_v46, %v670_v40  ;;  %v312_v61 = vshrl.u32 %v7427_v42, 16  ;;  %v301_v1 = vrot.slane %v299_v54, 4  ;;  %v7485_v46 = vld [vmem:[%s11181_s0 + $0x68] sm:$0x1] }
  0x3f   :  { %v297_v63 = vsel %vm7202_vm4, %v292_v48, %v296_v30  ;;  %v304_v2 = vrot.slane %v302_v55, 5  ;;  %v318_v3 = vshll.u32 %v7436_v47, 16  ;;  %v310_v11 = vrot.slane %v308_v60, 5  ;;  %v7474_v30 = vld [vmem:[%s11181_s0 + $0x64] sm:$0xf] }
  0x40   :  { %v7453_v7 = vcombine.low %v287_v44, %v297_v63  ;;  %v671_v8 = vsel %vm7202_vm4, %v666_v58, %v670_v40  ;;  %v676_v9 = vrot.slane %v675_v59, 4  ;;  %v314_v13 = vrot.slane %v312_v61, 4  ;;  %v97_v60 = vld [vmem:[%s11181_s0 + $0x13c] sm:$0xf] }
  0x41   :  { %v305_v12 = vor.u32 %v304_v2, %v301_v1  ;;  %v320_v14 = vrot.slane %v318_v3, 5  ;;  %v683_v17 = vshrl.u32 %v93_v62, 16  ;;  %v686_v19 = vshll.u32 %v93_v62, 16  ;;  %v98_v2 = vld [vmem:[%s11181_s0 + $0x140] sm:$0x1] }
  0x42   :  { %11401 = vst [vmem:[#allocation13_spill] sm:$0xff] %v7453_v7  ;;  %6460 = vmatprep.mubr.msk.bf16.mxu0 %vm996_vm3, %v7453_v7  ;;  %v681_v18 = vsel %vm7202_vm4, %v676_v9, %v680_v53  ;;  %v692_v20 = vshll.u32 %v94_v5, 16  ;;  %v696_v22 = vshrl.u32 %v94_v5, 16  ;;  %v315_v28 = vor.u32 %v314_v13, %v310_v11  ;;  %v96_v53 = vld [vmem:[%s11181_s0 + $0x138] sm:$0xf] }
  0x43   :  { %v7469_v24 = vcombine.low %v671_v8, %v681_v18  ;;  %v306_v26 = vrot.slane %v305_v12, 4  ;;  %v685_v29 = vrot.slane %v683_v17, 4  ;;  %v688_v32 = vrot.slane %v686_v19, 5  ;;  %v7517_v17 = vld [vmem:[%s11180_s1 + $0xc] sm:$0xf] }
  0x44   :  { %v694_v33 = vrot.slane %v692_v20, 5  ;;  %v698_v34 = vrot.slane %v696_v22, 4  ;;  %v702_v35 = vshll.u32 %v95_v16, 16  ;;  %v316_v38 = vrot.slane %v315_v28, 4  ;;  %v7522_v18 = vld [vmem:[%s11180_s1 + $0x10] sm:$0xf]  ;;  %7046 = vmatprep.subr.msk.bf16.mxu1 %vm1093_vm0, %v7517_v17 }
  0x45   :  { %11402 = vst [vmem:[#allocation14_spill] sm:$0xff] %v7469_v24  ;;  %6492 = vmatprep.mubr.msk.bf16.mxu1 %vm996_vm3, %v7469_v24  ;;  %v311_v36 = vsel %vm7202_vm4, %v306_v26, %v310_v11  ;;  %v323_v39 = vshrl.u32 %v7467_v23, 16  ;;  %v326_v40 = vshll.u32 %v7467_v23, 16  ;;  %v689_v41 = vor.u32 %v688_v32, %v685_v29  ;;  %v7506_v11 = vld [vmem:[%s11181_s0 + $0x6c] sm:$0xf]  ;;  %7047 = vmatprep.subr.msk.bf16.mxu0 %vm1093_vm0, %v7522_v18 }
  0x46   :  { %v699_v44 = vor.u32 %v698_v34, %v694_v33  ;;  %v704_v45 = vrot.slane %v702_v35, 5  ;;  %v332_v48 = vshll.u32 %v7474_v30, 16  ;;  %v321_v54 = vsel %vm7202_vm4, %v316_v38, %v320_v14  ;;  %v7529_v28 = vld [vmem:[%s11181_s0 + $0x70] sm:$0xf] }
  0x47   :  { %v325_v55 = vrot.slane %v323_v39, 4  ;;  %v328_v58 = vrot.slane %v326_v40, 5  ;;  %v336_v59 = vshrl.u32 %v7474_v30, 16  ;;  %v7497_v61 = vcombine.low %v311_v36, %v321_v54  ;;  %v7542_v39 = vld [vmem:[%s11181_s0 + $0x74] sm:$0x1] }
  0x48   :  { %v690_v62 = vrot.slane %v689_v41, 4  ;;  %v700_v63 = vrot.slane %v699_v44, 4  ;;  %v334_v1 = vrot.slane %v332_v48, 5  ;;  %v342_v8 = vshll.u32 %v7485_v46, 16 }
  0x49   :  { %11403 = vst [vmem:[#allocation15_spill] sm:$0xff] %v7497_v61  ;;  %v329_v3 = vor.u32 %v328_v58, %v325_v55  ;;  %v338_v5 = vrot.slane %v336_v59, 4  ;;  %v707_v9 = vshrl.u32 %v96_v53, 16  ;;  %6461 = vmatmul.mubr.msk.bf16.gmra.mxu0 %vm996_vm3, %v7497_v61  ;;  %v710_v14 = vshll.u32 %v96_v53, 16  ;;  %v99_v53 = vld [vmem:[%s11181_s0 + $0x144] sm:$0xf] }
  0x4a   :  { %v695_v12 = vsel %vm7202_vm4, %v690_v62, %v694_v33  ;;  %v705_v13 = vsel %vm7202_vm4, %v700_v63, %v704_v45  ;;  %v716_v16 = vshll.u32 %v97_v60, 16  ;;  %v344_v26 = vrot.slane %v342_v8, 5 }
  0x4b   :  { %v7524_v19 = vcombine.low %v695_v12, %v705_v13  ;;  %v330_v20 = vrot.slane %v329_v3, 4  ;;  %v339_v22 = vor.u32 %v338_v5, %v334_v1  ;;  %v709_v29 = vrot.slane %v707_v9, 4 }
  0x4c   :  { %v712_v32 = vrot.slane %v710_v14, 5  ;;  %v718_v33 = vrot.slane %v716_v16, 5  ;;  %v720_v34 = vshrl.u32 %v97_v60, 16  ;;  %v726_v38 = vshll.u32 %v98_v2, 16  ;;  %v100_v2 = vld [vmem:[%s11181_s0 + $0x148] sm:$0xf] }
  0x4d   :  { %11404 = vst [vmem:[#allocation16_spill] sm:$0xff] %v7524_v19  ;;  %6493 = vmatmul.mubr.msk.bf16.gmra.mxu1 %vm996_vm3, %v7524_v19  ;;  %v335_v35 = vsel %vm7202_vm4, %v330_v20, %v334_v1  ;;  %v340_v36 = vrot.slane %v339_v22, 4  ;;  %v347_v40 = vshrl.u32 %v7506_v11, 16  ;;  %v350_v45 = vshll.u32 %v7506_v11, 16  ;;  %v101_v16 = vld [vmem:[%s11181_s0 + $0x14c] sm:$0x1] }
  0x4e   :  { %v713_v41 = vor.u32 %v712_v32, %v709_v29  ;;  %v722_v44 = vrot.slane %v720_v34, 4  ;;  %v356_v48 = vshll.u32 %v7529_v28, 16  ;;  %v728_v55 = vrot.slane %v726_v38, 5  ;;  %v7569_v34 = vld [vmem:[%s11181_s0 + $0x78] sm:$0xf] }
  0x4f   :  { %v345_v54 = vsel %vm7202_vm4, %v340_v36, %v344_v26  ;;  %v349_v58 = vrot.slane %v347_v40, 4  ;;  %v360_v59 = vshrl.u32 %v7529_v28, 16  ;;  %v352_v1 = vrot.slane %v350_v45, 5  ;;  %v7576_v40 = vld [vmem:[%s11181_s0 + $0x7c] sm:$0xf] }
  0x50   :  { %v7553_v60 = vcombine.low %v335_v35, %v345_v54  ;;  %v714_v62 = vrot.slane %v713_v41, 4  ;;  %v723_v63 = vor.u32 %v722_v44, %v718_v33  ;;  %v358_v3 = vrot.slane %v356_v48, 5 }
  0x51   :  { %v362_v5 = vrot.slane %v360_v59, 4  ;;  %v366_v8 = vshll.u32 %v7542_v39, 16  ;;  %v731_v9 = vshrl.u32 %v99_v53, 16  ;;  %v353_v14 = vor.u32 %v352_v1, %v349_v58 }
  0x52   :  { %11405 = vst [vmem:[#allocation17_spill] sm:$0xff] %v7553_v60  ;;  %6464 = vmatprep.mubr.msk.bf16.mxu0 %vm996_vm3, %v7553_v60  ;;  %v719_v12 = vsel %vm7202_vm4, %v714_v62, %v718_v33  ;;  %v724_v13 = vrot.slane %v723_v63, 4  ;;  %v734_v20 = vshll.u32 %v99_v53, 16  ;;  %v740_v32 = vshll.u32 %v100_v2, 16 }
  0x53   :  { %v363_v22 = vor.u32 %v362_v5, %v358_v3  ;;  %v368_v26 = vrot.slane %v366_v8, 5  ;;  %v733_v29 = vrot.slane %v731_v9, 4  ;;  %v354_v33 = vrot.slane %v353_v14, 4 }
  0x54   :  { %v729_v35 = vsel %vm7202_vm4, %v724_v13, %v728_v55  ;;  %v736_v36 = vrot.slane %v734_v20, 5  ;;  %v744_v38 = vshrl.u32 %v100_v2, 16  ;;  %v742_v45 = vrot.slane %v740_v32, 5  ;;  %v7585_v55 = vld [vmem:[%s11181_s0 + $0x80] sm:$0x1] }
  0x55   :  { %v7578_v41 = vcombine.low %v719_v12, %v729_v35  ;;  %v364_v44 = vrot.slane %v363_v22, 4  ;;  %v750_v48 = vshll.u32 %v101_v16, 16  ;;  %v359_v53 = vsel %vm7202_vm4, %v354_v33, %v358_v3  ;;  %v102_v3 = vld [vmem:[%s11181_s0 + $0x150] sm:$0xf]  ;;  %v7602_v13 = vld [vmem:[%s11181_s0 + $0x154] sm:$0xf] }
  0x56   :  { %v737_v54 = vor.u32 %v736_v36, %v733_v29  ;;  %v746_v58 = vrot.slane %v744_v38, 4  ;;  %v371_v59 = vshrl.u32 %v7569_v34, 16  ;;  %v374_v1 = vshll.u32 %v7569_v34, 16  ;;  %v7613_v32 = vld [vmem:[%s11181_s0 + $0x158] sm:$0x1] }
  0x57   :  { %11406 = vst [vmem:[#allocation18_spill] sm:$0xff] %v7578_v41  ;;  %6496 = vmatprep.mubr.msk.bf16.mxu1 %vm996_vm3, %v7578_v41  ;;  %v369_v62 = vsel %vm7202_vm4, %v364_v44, %v368_v26  ;;  %v752_v63 = vrot.slane %v750_v48, 5  ;;  %v380_v2 = vshll.u32 %v7576_v40, 16  ;;  %v384_v20 = vshrl.u32 %v7576_v40, 16 }
  0x58   :  { %v7597_v5 = vcombine.low %v359_v53, %v369_v62  ;;  %v738_v8 = vrot.slane %v737_v54, 4  ;;  %v747_v9 = vor.u32 %v746_v58, %v742_v45  ;;  %v373_v12 = vrot.slane %v371_v59, 4  ;;  %v7619_v53 = vld [vmem:[%s11181_s0 + $0x84] sm:$0xf]  ;;  %v7627_v62 = vld [vmem:[%s11181_s0 + $0x88] sm:$0xf] }
  0x59   :  { %v376_v14 = vrot.slane %v374_v1, 5  ;;  %v382_v16 = vrot.slane %v380_v2, 5  ;;  %v390_v22 = vshll.u32 %v7585_v55, 16  ;;  %v755_v35 = vshrl.u32 %v102_v3, 16 }
  0x5a   :  { %11407 = vst [vmem:[#allocation19_spill] sm:$0xff] %v7597_v5  ;;  %6465 = vmatmul.mubr.msk.bf16.gmra.mxu0 %vm996_vm3, %v7597_v5  ;;  %v743_v26 = vsel %vm7202_vm4, %v738_v8, %v742_v45  ;;  %v748_v29 = vrot.slane %v747_v9, 4  ;;  %v758_v33 = vshll.u32 %v102_v3, 16  ;;  %v386_v38 = vrot.slane %v384_v20, 4  ;;  %v7769_v5 = vld [vmem:[%s11181_s0 + $0x178] sm:$0xf] }
  0x5b   :  { %v377_v36 = vor.u32 %v376_v14, %v373_v12  ;;  %v392_v44 = vrot.slane %v390_v22, 5  ;;  %v764_v48 = vshll.u32 %v7602_v13, 16  ;;  %v757_v54 = vrot.slane %v755_v35, 4  ;;  %11417 = vst [vmem:[#allocation29_spill] sm:$0xff] %v7769_v5 }
  0x5c   :  { %v753_v45 = vsel %vm7202_vm4, %v748_v29, %v752_v63  ;;  %v760_v58 = vrot.slane %v758_v33, 5  ;;  %v768_v59 = vshrl.u32 %v7602_v13, 16  ;;  %v387_v3 = vor.u32 %v386_v38, %v382_v16 }
  0x5d   :  { %v7629_v1 = vcombine.low %v743_v26, %v753_v45  ;;  %v378_v2 = vrot.slane %v377_v36, 4  ;;  %v766_v8 = vrot.slane %v764_v48, 5  ;;  %v774_v14 = vshll.u32 %v7613_v32, 16  ;;  %v7640_v26 = vld [vmem:[%s11181_s0 + $0x8c] sm:$0x1] }
  0x5e   :  { %v761_v9 = vor.u32 %v760_v58, %v757_v54  ;;  %v770_v12 = vrot.slane %v768_v59, 4  ;;  %v395_v63 = vshrl.u32 %v7619_v53, 16  ;;  %v388_v22 = vrot.slane %v387_v3, 4  ;;  %v7647_v45 = vld [vmem:[%s11181_s0 + $0x15c] sm:$0xf] }
  0x5f   :  { %11408 = vst [vmem:[#allocation20_spill] sm:$0xff] %v7629_v1  ;;  %6497 = vmatmul.mubr.msk.bf16.gmra.mxu1 %vm996_vm3, %v7629_v1  ;;  %v383_v20 = vsel %vm7202_vm4, %v378_v2, %v382_v16  ;;  %v398_v29 = vshll.u32 %v7619_v53, 16  ;;  %v404_v35 = vshll.u32 %v7627_v62, 16  ;;  %v776_v38 = vrot.slane %v774_v14, 5  ;;  %v7655_v2 = vld [vmem:[%s11181_s0 + $0x160] sm:$0xf] }
  0x60   :  { %v762_v33 = vrot.slane %v761_v9, 4  ;;  %v771_v36 = vor.u32 %v770_v12, %v766_v8  ;;  %v397_v48 = vrot.slane %v395_v63, 4  ;;  %v393_v16 = vsel %vm7202_vm4, %v388_v22, %v392_v44  ;;  %v7665_v44 = vld [vmem:[%s11181_s0 + $0x164] sm:$0x1]  ;;  %v7685_v1 = vld [vmem:[%s11181_s0 + $0x94] sm:$0xf] }
  0x61   :  { %v400_v54 = vrot.slane %v398_v29, 5  ;;  %v406_v58 = vrot.slane %v404_v35, 5  ;;  %v408_v59 = vshrl.u32 %v7627_v62, 16  ;;  %v7657_v3 = vcombine.low %v383_v20, %v393_v16 }
  0x62   :  { %v767_v9 = vsel %vm7202_vm4, %v762_v33, %v766_v8  ;;  %v772_v12 = vrot.slane %v771_v36, 4  ;;  %v414_v14 = vshll.u32 %v7640_v26, 16  ;;  %v779_v22 = vshrl.u32 %v7647_v45, 16  ;;  %v7678_v36 = vld [vmem:[%s11181_s0 + $0x90] sm:$0xf] }
  0x63   :  { %11409 = vst [vmem:[#allocation21_spill] sm:$0xff] %v7657_v3  ;;  %v401_v63 = vor.u32 %v400_v54, %v397_v48  ;;  %v410_v56 = vrot.slane %v408_v59, 4  ;;  %v782_v29 = vshll.u32 %v7647_v45, 16  ;;  %6468 = vmatprep.mubr.msk.bf16.mxu0 %vm996_vm3, %v7657_v3  ;;  %v788_v35 = vshll.u32 %v7655_v2, 16 }
  0x64   :  { %v777_v8 = vsel %vm7202_vm4, %v772_v12, %v776_v38  ;;  %v416_v20 = vrot.slane %v414_v14, 5  ;;  %v792_v33 = vshrl.u32 %v7655_v2, 16  ;;  %v781_v59 = vrot.slane %v779_v22, 4 }
  0x65   :  { %v7680_v48 = vcombine.low %v767_v9, %v777_v8  ;;  %v402_v16 = vrot.slane %v401_v63, 4  ;;  %v411_v54 = vor.u32 %v410_v56, %v406_v58  ;;  %v784_v38 = vrot.slane %v782_v29, 5  ;;  %v7697_v29 = vld [vmem:[%s11181_s0 + $0x98] sm:$0x1] }
  0x66   :  { %v790_v12 = vrot.slane %v788_v35, 5  ;;  %v794_v14 = vrot.slane %v792_v33, 4  ;;  %v798_v41 = vshll.u32 %v7665_v44, 16  ;;  %v419_v56 = vshrl.u32 %v7678_v36, 16  ;;  %v7703_v33 = vld [vmem:[%s11181_s0 + $0x168] sm:$0xf] }
  0x67   :  { %11410 = vst [vmem:[#allocation22_spill] sm:$0xff] %v7680_v48  ;;  %6500 = vmatprep.mubr.msk.bf16.mxu1 %vm996_vm3, %v7680_v48  ;;  %v407_v9 = vsel %vm7202_vm4, %v402_v16, %v406_v58  ;;  %v412_v8 = vrot.slane %v411_v54, 4  ;;  %v422_v63 = vshll.u32 %v7678_v36, 16  ;;  %v785_v22 = vor.u32 %v784_v38, %v781_v59  ;;  %11411 = vst [vmem:[#allocation23_spill] sm:$0xff] %v7703_v33 }
  0x68   :  { %v795_v19 = vor.u32 %v794_v14, %v790_v12  ;;  %v800_v24 = vrot.slane %v798_v41, 5  ;;  %v428_v35 = vshll.u32 %v7685_v1, 16  ;;  %v421_v16 = vrot.slane %v419_v56, 4  ;;  %v7711_v41 = vld [vmem:[%s11181_s0 + $0x16c] sm:$0xf] }
  0x69   :  { %v417_v58 = vsel %vm7202_vm4, %v412_v8, %v416_v20  ;;  %v424_v54 = vrot.slane %v422_v63, 5  ;;  %v432_v59 = vshrl.u32 %v7685_v1, 16  ;;  %v786_v14 = vrot.slane %v785_v22, 4  ;;  %v7733_v22 = vld [vmem:[%s11181_s0 + $0x9c] sm:$0xf] }
  0x6a   :  { %v7713_v38 = vcombine.low %v407_v9, %v417_v58  ;;  %v796_v48 = vrot.slane %v795_v19, 4  ;;  %v430_v43 = vrot.slane %v428_v35, 5  ;;  %v438_v27 = vshll.u32 %v7697_v29, 16  ;;  %v7726_v19 = vld [vmem:[%s11181_s0 + $0x170] sm:$0x1] }
  0x6b   :  { %v425_v51 = vor.u32 %v424_v54, %v421_v16  ;;  %v434_v15 = vrot.slane %v432_v59, 4  ;;  %v803_v20 = vshrl.u32 %v7703_v33, 16  ;;  %v791_v8 = vsel %vm7202_vm4, %v786_v14, %v790_v12  ;;  %11413 = vst [vmem:[#allocation25_spill] sm:$0xff] %v7726_v19 }
  0x6c   :  { %11412 = vst [vmem:[#allocation24_spill] sm:$0xff] %v7713_v38  ;;  %6469 = vmatmul.mubr.msk.bf16.gmra.mxu0 %vm996_vm3, %v7713_v38  ;;  %v801_v56 = vsel %vm7202_vm4, %v796_v48, %v800_v24  ;;  %v806_v9 = vshll.u32 %v7703_v33, 16  ;;  %v812_v63 = vshll.u32 %v7711_v41, 16  ;;  %v440_v16 = vrot.slane %v438_v27, 5  ;;  %v7740_v24 = vld [vmem:[%s11181_s0 + $0xa0] sm:$0xf] }
  0x6d   :  { %v7735_v35 = vcombine.low %v791_v8, %v801_v56  ;;  %v426_v12 = vrot.slane %v425_v51, 4  ;;  %v435_v58 = vor.u32 %v434_v15, %v430_v43  ;;  %v805_v48 = vrot.slane %v803_v20, 4  ;;  %v7751_v27 = vld [vmem:[%s11181_s0 + $0xa4] sm:$0x1] }
  0x6e   :  { %v808_v54 = vrot.slane %v806_v9, 5  ;;  %v814_v59 = vrot.slane %v812_v63, 5  ;;  %v816_v14 = vshrl.u32 %v7711_v41, 16  ;;  %v822_v15 = vshll.u32 %v7726_v19, 16 }
  0x6f   :  { %11414 = vst [vmem:[#allocation26_spill] sm:$0xff] %v7735_v35  ;;  %6501 = vmatmul.mubr.msk.bf16.gmra.mxu1 %vm996_vm3, %v7735_v35  ;;  %v431_v8 = vsel %vm7202_vm4, %v426_v12, %v430_v43  ;;  %v436_v56 = vrot.slane %v435_v58, 4  ;;  %v443_v51 = vshrl.u32 %v7733_v22, 16  ;;  %v446_v63 = vshll.u32 %v7733_v22, 16  ;;  %v7759_v43 = vld [vmem:[%s11181_s0 + $0x174] sm:$0xf] }
  0x70   :  { %v809_v20 = vor.u32 %v808_v54, %v805_v48  ;;  %v818_v9 = vrot.slane %v816_v14, 4  ;;  %v452_v49 = vshll.u32 %v7740_v24, 16  ;;  %11415 = vst [vmem:[#allocation27_spill] sm:$0xff] %v7759_v43  ;;  %v824_v58 = vrot.slane %v822_v15, 5 }
  0x71   :  { %v441_v12 = vsel %vm7202_vm4, %v436_v56, %v440_v16  ;;  %v445_v35 = vrot.slane %v443_v51, 4  ;;  %v456_v38 = vshrl.u32 %v7740_v24, 16  ;;  %v448_v14 = vrot.slane %v446_v63, 5  ;;  %v7780_v51 = vld [vmem:[%s11181_s0 + $0x17c] sm:$0x1] }
  0x72   :  { %v7764_v3 = vcombine.low %v431_v8, %v441_v12  ;;  %v810_v48 = vrot.slane %v809_v20, 4  ;;  %v819_v54 = vor.u32 %v818_v9, %v814_v59  ;;  %v454_v60 = vrot.slane %v452_v49, 5  ;;  %11418 = vst [vmem:[#allocation30_spill] sm:$0xff] %v7780_v51  ;;  %v7787_v12 = vld [vmem:[%s11181_s0 + $0xa8] sm:$0xf] }
  0x73   :  { %v458_v61 = vrot.slane %v456_v38, 4  ;;  %v462_v7 = vshll.u32 %v7751_v27, 16  ;;  %v827_v16 = vshrl.u32 %v7759_v43, 16  ;;  %v449_v15 = vor.u32 %v448_v14, %v445_v35 }
  0x74   :  { %11416 = vst [vmem:[#allocation28_spill] sm:$0xff] %v7764_v3  ;;  %6472 = vmatprep.mubr.msk.bf16.mxu0 %vm996_vm3, %v7764_v3  ;;  %v815_v8 = vsel %vm7202_vm4, %v810_v48, %v814_v59  ;;  %v820_v56 = vrot.slane %v819_v54, 4  ;;  %v830_v49 = vshll.u32 %v7759_v43, 16  ;;  %v836_v63 = vshll.u32 %v7769_v5, 16 }
  0x75   :  { %v459_v38 = vor.u32 %v458_v61, %v454_v60  ;;  %v464_v20 = vrot.slane %v462_v7, 5  ;;  %v829_v9 = vrot.slane %v827_v16, 4  ;;  %v450_v59 = vrot.slane %v449_v15, 4  ;;  %v7795_v61 = vld [vmem:[%s11181_s0 + $0xac] sm:$0xf] }
  0x76   :  { %v825_v35 = vsel %vm7202_vm4, %v820_v56, %v824_v58  ;;  %v832_v48 = vrot.slane %v830_v49, 5  ;;  %v840_v54 = vshrl.u32 %v7769_v5, 16  ;;  %v838_v16 = vrot.slane %v836_v63, 5  ;;  %v7805_v56 = vld [vmem:[%s11181_s0 + $0xb0] sm:$0x1] }
  0x77   :  { %v7797_v7 = vcombine.low %v815_v8, %v825_v35  ;;  %v460_v14 = vrot.slane %v459_v38, 4  ;;  %v846_v3 = vshll.u32 %v7780_v51, 16  ;;  %v455_v10 = vsel %vm7202_vm4, %v450_v59, %v454_v60 }
  0x78   :  { %v833_v31 = vor.u32 %v832_v48, %v829_v9  ;;  %v842_v58 = vrot.slane %v840_v54, 4  ;;  %v467_v15 = vshrl.u32 %v7787_v12, 16  ;;  %v470_v38 = vshll.u32 %v7787_v12, 16  ;;  %v7817_v9 = vld [vmem:[%s11181_s0 + $0x180] sm:$0xf] }
  0x79   :  { %11419 = vst [vmem:[#allocation31_spill] sm:$0xff] %v7797_v7  ;;  %6504 = vmatprep.mubr.msk.bf16.mxu1 %vm996_vm3, %v7797_v7  ;;  %v465_v8 = vsel %vm7202_vm4, %v460_v14, %v464_v20  ;;  %v848_v49 = vrot.slane %v846_v3, 5  ;;  %v476_v60 = vshll.u32 %v7795_v61, 16  ;;  %11420 = vst [vmem:[#allocation32_spill] sm:$0xff] %v7817_v9  ;;  %v7824_v54 = vld [vmem:[%s11181_s0 + $0x184] sm:$0xf] }
  0x7a   :  { %v7819_v63 = vcombine.low %v455_v10, %v465_v8  ;;  %v834_v35 = vrot.slane %v833_v31, 4  ;;  %v843_v59 = vor.u32 %v842_v58, %v838_v16  ;;  %v469_v48 = vrot.slane %v467_v15, 4  ;;  %11422 = vst [vmem:[#allocation34_spill] sm:$0xff] %v7824_v54  ;;  %v7835_v58 = vld [vmem:[%s11181_s0 + $0x188] sm:$0x1] }
  0x7b   :  { %v472_v3 = vrot.slane %v470_v38, 5  ;;  %v478_v20 = vrot.slane %v476_v60, 5  ;;  %v480_v14 = vshrl.u32 %v7795_v61, 16  ;;  %v486_v7 = vshll.u32 %v7805_v56, 16  ;;  %11423 = vst [vmem:[#allocation35_spill] sm:$0xff] %v7835_v58 }
  0x7c   :  { %11421 = vst [vmem:[#allocation33_spill] sm:$0xff] %v7819_v63  ;;  %6473 = vmatmul.mubr.msk.bf16.gmra.mxu0 %vm996_vm3, %v7819_v63  ;;  %v839_v10 = vsel %vm7202_vm4, %v834_v35, %v838_v16  ;;  %v844_v31 = vrot.slane %v843_v59, 4  ;;  %v851_v15 = vshrl.u32 %v7817_v9, 16  ;;  %v854_v8 = vshll.u32 %v7817_v9, 16  ;;  %v7843_v63 = vld [vmem:[%s11181_s0 + $0xb4] sm:$0xf] }
  0x7d   :  { %v473_v38 = vor.u32 %v472_v3, %v469_v48  ;;  %v482_v60 = vrot.slane %v480_v14, 4  ;;  %v488_v52 = vrot.slane %v486_v7, 5  ;;  %v860_v6 = vshll.u32 %v7824_v54, 16  ;;  %v7851_v48 = vld [vmem:[%s11181_s0 + $0xb8] sm:$0xf] }
  0x7e   :  { %v849_v16 = vsel %vm7202_vm4, %v844_v31, %v848_v49  ;;  %v853_v35 = vrot.slane %v851_v15, 4  ;;  %v856_v59 = vrot.slane %v854_v8, 5  ;;  %v864_v21 = vshrl.u32 %v7824_v54, 16 }
  0x7f   :  { %v7853_v7 = vcombine.low %v839_v10, %v849_v16  ;;  %v474_v3 = vrot.slane %v473_v38, 4  ;;  %v483_v14 = vor.u32 %v482_v60, %v478_v20  ;;  %v862_v9 = vrot.slane %v860_v6, 5  ;;  %v7864_v10 = vld [vmem:[%s11181_s0 + $0xbc] sm:$0x1] }
  0x80   :  { %v857_v51 = vor.u32 %v856_v59, %v853_v35  ;;  %v866_v43 = vrot.slane %v864_v21, 4  ;;  %v870_v5 = vshll.u32 %v7835_v58, 16  ;;  %v491_v49 = vshrl.u32 %v7843_v63, 16  ;;  %v7871_v35 = vld [vmem:[%s11181_s0 + $0x18c] sm:$0xf] }
  0x81   :  { %11424 = vst [vmem:[#allocation36_spill] sm:$0xff] %v7853_v7  ;;  %6505 = vmatmul.mubr.msk.bf16.gmra.mxu1 %vm996_vm3, %v7853_v7  ;;  %v479_v31 = vsel %vm7202_vm4, %v474_v3, %v478_v20  ;;  %v484_v15 = vrot.slane %v483_v14, 4  ;;  %v494_v6 = vshll.u32 %v7843_v63, 16  ;;  %v500_v21 = vshll.u32 %v7851_v48, 16  ;;  %11425 = vst [vmem:[#allocation37_spill] sm:$0xff] %v7871_v35 }
  0x82   :  { %v858_v8 = vrot.slane %v857_v51, 4  ;;  %v867_v38 = vor.u32 %v866_v43, %v862_v9  ;;  %v872_v60 = vrot.slane %v870_v5, 5  ;;  %v493_v16 = vrot.slane %v491_v49, 4  ;;  %v7879_v7 = vld [vmem:[%s11181_s0 + $0x190] sm:$0xf] }
  0x83   :  { %v489_v20 = vsel %vm7202_vm4, %v484_v15, %v488_v52  ;;  %v496_v59 = vrot.slane %v494_v6, 5  ;;  %v502_v3 = vrot.slane %v500_v21, 5  ;;  %v504_v14 = vshrl.u32 %v7851_v48, 16  ;;  %11426 = vst [vmem:[#allocation38_spill] sm:$0xff] %v7879_v7  ;;  %v7889_v52 = vld [vmem:[%s11181_s0 + $0x194] sm:$0x1] }
  0x84   :  { %v7881_v43 = vcombine.low %v479_v31, %v489_v20  ;;  %v863_v5 = vsel %vm7202_vm4, %v858_v8, %v862_v9  ;;  %v868_v51 = vrot.slane %v867_v38, 4  ;;  %v510_v49 = vshll.u32 %v7864_v10, 16  ;;  %11428 = vst [vmem:[#allocation40_spill] sm:$0xff] %v7889_v52 }
  0x85   :  { %v497_v58 = vor.u32 %v496_v59, %v493_v16  ;;  %v506_v54 = vrot.slane %v504_v14, 4  ;;  %v875_v15 = vshrl.u32 %v7871_v35, 16  ;;  %v878_v6 = vshll.u32 %v7871_v35, 16 }
  0x86   :  { %11427 = vst [vmem:[#allocation39_spill] sm:$0xff] %v7881_v43  ;;  %6476 = vmatprep.mubr.msk.bf16.mxu0 %vm996_vm3, %v7881_v43  ;;  %v873_v9 = vsel %vm7202_vm4, %v868_v51, %v872_v60  ;;  %v512_v31 = vrot.slane %v510_v49, 5  ;;  %v884_v21 = vshll.u32 %v7879_v7, 16  ;;  %v888_v8 = vshrl.u32 %v7879_v7, 16  ;;  %v7090_v43 = vld [vmem:[%s11181_s0 + $0x10] sm:$0xf] }
  0x87   :  { %v7899_v38 = vcombine.low %v863_v5, %v873_v9  ;;  %v498_v16 = vrot.slane %v497_v58, 4  ;;  %v507_v20 = vor.u32 %v506_v54, %v502_v3  ;;  %v877_v59 = vrot.slane %v875_v15, 4  ;;  %v7091_v15 = vld [vmem:[%s11181_s0 + $0x14] sm:$0x1] }
  0x88   :  { %v880_v14 = vrot.slane %v878_v6, 5  ;;  %v886_v19 = vrot.slane %v884_v21, 5  ;;  %v890_v33 = vrot.slane %v888_v8, 4  ;;  %v894_v35 = vshll.u32 %v7889_v52, 16 }
  0x89   :  { %11429 = vst [vmem:[#allocation41_spill] sm:$0xff] %v7899_v38  ;;  %v1978_v60 = vrot.slane %v7090_v43, 5  ;;  %6508 = vmatprep.mubr.msk.bf16.mxu1 %vm996_vm3, %v7899_v38  ;;  %v503_v5 = vsel %vm7202_vm4, %v498_v16, %v502_v3  ;;  %v508_v51 = vrot.slane %v507_v20, 4  ;;  %vm1966_vm5 = vcmask 1042432   ;;  %v7092_v3 = vld [vmem:[%s11181_s0] sm:$0xf] }
  0x8a   :  { %v881_v54 = vor.u32 %v880_v14, %v877_v59  ;;  %v891_v58 = vor.u32 %v890_v33, %v886_v19  ;;  %v896_v49 = vrot.slane %v894_v35, 5  ;;  %vm1967_vm6 = vcmask 1046532   ;;  %v7093_v33 = vld [vmem:[%s11181_s0 + $0x4] sm:$0xf] }
  0x8b   :  { %v1981_v6 = vrot.slane %v7091_v15, 5  ;;  %v513_v9 = vsel %vm7202_vm4, %v508_v51, %v512_v31  ;;  %vm7914_vm7 = vmor %vm1966_vm5, %vm1967_vm6  ;;  %v11430_v21 = vmov 0  ;;  %v5837_v8 = vrot.slane %v7092_v3, 9  ;;  %v7094_v31 = vld [vmem:[%s11181_s0 + $0xc] sm:$0xf] }
  0x8c   :  { %v11431_v21 = vsel %vm7914_vm7, 4294967295, %v11430_v21  ;;  %v1971_v35 = vrot.slane %v7093_v33, 5  ;;  %v7924_v16 = vcombine.low %v503_v5, %v513_v9  ;;  %v882_v20 = vrot.slane %v881_v54, 4 }
  0x8d   :  { %11432 = vst [vmem:[#allocation42_spill] sm:$0xff] %v11431_v21  ;;  %v892_v59 = vrot.slane %v891_v58, 4  ;;  %v5838_v14 = vrot.slane %v7094_v31, 9  ;;  %v1980_v38 = vrot.slane %v1978_v60, 4  ;;  %v5773_v54 = vcombine.low %v7092_v3, %v7093_v33 }
  0x8e   :  { %11433 = vst [vmem:[#allocation43_spill] sm:$0xff] %v7924_v16  ;;  %v1972_v51 = vsel %vm7914_vm7, %v5837_v8, %v1971_v35  ;;  %v1973_v15 = vrot.slane %v1971_v35, 4  ;;  %6477 = vmatmul.mubr.msk.bf16.gmra.mxu0 %vm996_vm3, %v7924_v16  ;;  %v887_v52 = vsel %vm7202_vm4, %v882_v20, %v886_v19  ;;  %v11435_v7 = vrot.slane %v7185_v4, 5  ;;  %v7095_v19 = vld [vmem:[%s11181_s0 + $0x18] sm:$0xf] }
  0x8f   :  { %v897_v5 = vsel %vm7202_vm4, %v892_v59, %v896_v49  ;;  %v1979_v58 = vsel %vm7914_vm7, %v5838_v14, %v1978_v60  ;;  %v1982_v35 = vsel %vm7914_vm7, %v1980_v38, %v1981_v6  ;;  %v5839_v49 = vrot.slane %v7095_v19, 9  ;;  %v7096_v60 = vld [vmem:[%s11181_s0 + $0x1c] sm:$0xf]  ;;  %v7098_v6 = vld [vmem:[%s11181_s0 + $0x28] sm:$0xf] }
  0x90   :  { %v7939_v9 = vcombine.low %v887_v52, %v897_v5  ;;  %v1975_v8 = vsel %vm7914_vm7, %v1973_v15, %v11435_v7  ;;  %v1985_v52 = vrot.slane %v7096_v60, 5  ;;  %v7955_v4 = vcombine.low %v1979_v58, %v1982_v35  ;;  %v7097_v7 = vld [vmem:[%s11181_s0 + $0x20] sm:$0x1]  ;;  %v7099_v59 = vld [vmem:[%s11181_s0 + $0x24] sm:$0xf] }
  0x91   :  { %v5870_v16 = vcombine.low %v1972_v51, %v1975_v8  ;;  %v1988_v38 = vrot.slane %v7097_v7, 5  ;;  %v1992_v3 = vrot.slane %v7098_v6, 5  ;;  %v5840_v14 = vrot.slane %v7099_v59, 9  ;;  %v7100_v51 = vld [vmem:[%s11181_s0 + $0x2c] sm:$0x1] }
  0x92   :  { %11434 = vst [vmem:[#allocation44_spill] sm:$0xff] %v7939_v9  ;;  %6509 = vmatmul.mubr.msk.bf16.gmra.mxu1 %vm996_vm3, %v7939_v9  ;;  %v1986_v33 = vsel %vm7914_vm7, %v5839_v49, %v1985_v52  ;;  %v1987_v20 = vrot.slane %v1985_v52, 4  ;;  %v1995_v15 = vrot.slane %v7100_v51, 5  ;;  %v3180_v58 = vsel %vm1093_vm0, %v7522_v18, 0  ;;  %v7102_v35 = vld [vmem:[%s11181_s0 + $0x30] sm:$0xf] }
  0x93   :  { %6514 = vmatprep.mubr.msk.bf16.mxu1 %vm996_vm3, %v5773_v54  ;;  %6580 = vmatprep.mubr.msk.bf16.mxu0 %vm996_vm3, %v5870_v16  ;;  %v1994_v5 = vrot.slane %v1992_v3, 4  ;;  %v7101_v54 = vld [vmem:[%s11181_s0 + $0x34] sm:$0xf]  ;;  %v5841_v49 = vrot.slane %v7102_v35, 9  ;;  %v7103_v52 = vld [vmem:[%s11181_s0 + $0x38] sm:$0x1]  ;;  %v7986_v51 = vcombine.low %v7094_v31, %v7090_v43  ;;  %v7992_v18 = vcombine.low %v7095_v19, %v7096_v60 }
  0x94   :  { %v1999_v16 = vrot.slane %v7101_v54, 5  ;;  %v1989_v8 = vsel %vm7914_vm7, %v1987_v20, %v1988_v38  ;;  %v2002_v7 = vrot.slane %v7103_v52, 5  ;;  %v1993_v38 = vsel %vm7914_vm7, %v5840_v14, %v1992_v3  ;;  %v7104_v52 = vld [vmem:[%s11181_s0 + $0x40] sm:$0xf] }
  0x95   :  { %v7988_v9 = vcombine.low %v1986_v33, %v1989_v8  ;;  %v1996_v20 = vsel %vm7914_vm7, %v1994_v5, %v1995_v15  ;;  %v2006_v43 = vrot.slane %v7104_v52, 5  ;;  %v2762_v31 = vsel %vm1093_vm0, %v7517_v17, 0  ;;  %v8013_v33 = vld [vmem:[%s11180_s1 + $0x14] sm:$0xf]  ;;  %v7106_v15 = vld [vmem:[%s11181_s0 + $0x44] sm:$0x1] }
  0x96   :  { %v2001_v25 = vrot.slane %v1999_v16, 4  ;;  %6581 = vmatmul.mubr.msk.bf16.vlgmr.msra.gmra.mxu0 %vm996_vm3, %v7955_v4  ;;  %v2013_v19 = vrot.slane %v7384_v57, 5  ;;  %v2000_v60 = vsel %vm7914_vm7, %v5841_v49, %v1999_v16  ;;  %v8017_v17 = vcombine.low %v1993_v38, %v1996_v20  ;;  %v7105_v57 = vld [vmem:[%s11181_s0 + $0x3c] sm:$0xf] }
  0x97   :  { %11436 = vst [vmem:[#allocation45_spill] sm:$0xff] %v7988_v9  ;;  %6711 = vmatpush3.bf16.msra.mxu0 %v3180_v58  ;;  %6584 = vmatprep.mubr.msk.bf16.mxu0 %vm996_vm3, %v7988_v9  ;;  %v5842_v14 = vrot.slane %v7105_v57, 9  ;;  %v5843_v5 = vrot.slane %v7377_v50, 9  ;;  %v2008_v16 = vrot.slane %v2006_v43, 4  ;;  %v2016_v8 = vrot.slane %v7393_v0, 5 }
  0x98   :  { %v2003_v3 = vsel %vm7914_vm7, %v2001_v25, %v2002_v7  ;;  %11437 = vst [vmem:[#allocation46_spill] sm:$0xff] %v8017_v17  ;;  %v2009_v25 = vrot.slane %v7106_v15, 5  ;;  %v2015_v58 = vrot.slane %v2013_v19, 4  ;;  %v2020_v49 = vrot.slane %v7427_v42, 5  ;;  %v8033_v7 = vld [vmem:[%s11180_s1 + $0x18] sm:$0xf] }
  0x99   :  { %v8035_v38 = vcombine.low %v2000_v60, %v2003_v3  ;;  %7049 = vmatprep.subr.msk.bf16.mxu0 %vm1093_vm0, %v8033_v7  ;;  %v8041_v50 = vcombine.low %v7099_v59, %v7098_v6  ;;  %v8043_v20 = vcombine.low %v7102_v35, %v7101_v54  ;;  %v2007_v0 = vsel %vm7914_vm7, %v5842_v14, %v2006_v43  ;;  %v7107_v3 = vld [vmem:[%s11181_s0 + $0x48] sm:$0xf] }
  0x9a   :  { %6515 = vmatmul.mubr.msk.bf16.vlgmr.msra.gmra.mxu1 %vm996_vm3, %v7986_v51  ;;  %v2014_v42 = vsel %vm7914_vm7, %v5843_v5, %v2013_v19  ;;  %v2010_v60 = vsel %vm7914_vm7, %v2008_v16, %v2009_v25  ;;  %v2017_v6 = vsel %vm7914_vm7, %v2015_v58, %v2016_v8  ;;  %v2022_v59 = vrot.slane %v2020_v49, 4 }
  0x9b   :  { %6645 = vmatpush3.bf16.msra.mxu1 %v2762_v31  ;;  %6518 = vmatprep.mubr.msk.bf16.mxu1 %vm996_vm3, %v7992_v18  ;;  %11438 = vst [vmem:[#allocation47_spill] sm:$0xff] %v8035_v38  ;;  %11439 = vst [vmem:[#allocation48_spill] sm:$0xff] %v8041_v50  ;;  %v5844_v31 = vrot.slane %v7420_v37, 9  ;;  %v2023_v54 = vrot.slane %v7436_v47, 5  ;;  %v2027_v35 = vrot.slane %v7474_v30, 5  ;;  %v8060_v43 = vcombine.low %v7105_v57, %v7104_v52 }
  0x9c   :  { %7048 = vmatprep.subr.msk.bf16.mxu1 %vm1093_vm0, %v8013_v33  ;;  %11440 = vst [vmem:[#allocation49_spill] sm:$0xff] %v8043_v20  ;;  %v5845_v37 = vrot.slane %v7467_v23, 9  ;;  %v8065_v19 = vcombine.low %v2007_v0, %v2010_v60  ;;  %v7108_v47 = vld [vmem:[%s11181_s0 + $0x4c] sm:$0xf]  ;;  %v8075_v15 = vcombine.low %v2014_v42, %v2017_v6  ;;  %v2030_v25 = vrot.slane %v7485_v46, 5 }
  0x9d   :  { %11441 = vst [vmem:[#allocation50_spill] sm:$0xff] %v8060_v43  ;;  %v8073_v14 = vcombine.low %v7107_v3, %v7108_v47  ;;  %v2021_v52 = vsel %vm7914_vm7, %v5844_v31, %v2020_v49  ;;  %v2024_v57 = vsel %vm7914_vm7, %v2022_v59, %v2023_v54  ;;  %v5846_v5 = vrot.slane %v7506_v11, 9 }
  0x9e   :  { %6585 = vmatmul.mubr.msk.bf16.gmra.mxu0 %vm996_vm3, %v8017_v17  ;;  %11442 = vst [vmem:[#allocation51_spill] sm:$0xff] %v8065_v19  ;;  %11444 = vst [vmem:[#allocation53_spill] sm:$0xff] %v8075_v15  ;;  %v8087_v16 = vcombine.low %v7678_v36, %v7685_v1  ;;  %v2029_v58 = vrot.slane %v2027_v35, 4  ;;  %v5849_v8 = vrot.slane %v7678_v36, 9  ;;  %v2055_v0 = vrot.slane %v7685_v1, 5 }
  0x9f   :  { %6588 = vmatprep.mubr.msk.bf16.mxu0 %vm996_vm3, %v8035_v38  ;;  %11443 = vst [vmem:[#allocation52_spill] sm:$0xff] %v8073_v14  ;;  %v2058_v49 = vrot.slane %v7697_v29, 5  ;;  %v2028_v42 = vsel %vm7914_vm7, %v5845_v37, %v2027_v35  ;;  %v2034_v31 = vrot.slane %v7529_v28, 5  ;;  %v2037_v46 = vrot.slane %v7542_v39, 5 }
  0xa0   :  { %11445 = vst [vmem:[#allocation54_spill] sm:$0xff] %v8087_v16  ;;  %v8098_v60 = vcombine.low %v7733_v22, %v7740_v24  ;;  %v2056_v6 = vsel %vm7914_vm7, %v5849_v8, %v2055_v0  ;;  %v2057_v59 = vrot.slane %v2055_v0, 4  ;;  %v5850_v36 = vrot.slane %v7733_v22, 9 }
  0xa1   :  { %v2062_v1 = vrot.slane %v7740_v24, 5  ;;  %v2041_v29 = vrot.slane %v7576_v40, 5  ;;  %v2065_v54 = vrot.slane %v7751_v27, 5  ;;  %v8110_v39 = vcombine.low %v7787_v12, %v7795_v61 }
  0xa2   :  { %6519 = vmatmul.mubr.msk.bf16.gmra.mxu1 %vm996_vm3, %v8041_v50  ;;  %11446 = vst [vmem:[#allocation55_spill] sm:$0xff] %v8098_v60  ;;  %v5851_v35 = vrot.slane %v7787_v12, 9  ;;  %v2031_v22 = vsel %vm7914_vm7, %v2029_v58, %v2030_v25  ;;  %v2059_v24 = vsel %vm7914_vm7, %v2057_v59, %v2058_v49  ;;  %v2069_v47 = vrot.slane %v7795_v61, 5 }
  0xa3   :  { %6522 = vmatprep.mubr.msk.bf16.mxu1 %vm996_vm3, %v8043_v20  ;;  %11447 = vst [vmem:[#allocation56_spill] sm:$0xff] %v8110_v39  ;;  %v2063_v37 = vsel %vm7914_vm7, %v5850_v36, %v2062_v1  ;;  %v2064_v3 = vrot.slane %v2062_v1, 4  ;;  %v8121_v27 = vcombine.low %v2056_v6, %v2059_v24  ;;  %v2072_v8 = vrot.slane %v7805_v56, 5 }
  0xa4   :  { %v8127_v12 = vcombine.low %v7843_v63, %v7851_v48  ;;  %v5852_v58 = vrot.slane %v7843_v63, 9  ;;  %v2076_v0 = vrot.slane %v7851_v48, 5  ;;  %v2079_v49 = vrot.slane %v7864_v10, 5 }
  0xa5   :  { %11448 = vst [vmem:[#allocation57_spill] sm:$0xff] %v8121_v27  ;;  %v2066_v25 = vsel %vm7914_vm7, %v2064_v3, %v2065_v54  ;;  %v8138_v61 = vcombine.low %v2021_v52, %v2024_v57  ;;  %v2070_v6 = vsel %vm7914_vm7, %v5851_v35, %v2069_v47  ;;  %v2071_v59 = vrot.slane %v2069_v47, 4  ;;  %v7109_v57 = vld [vmem:[%s11181_s0 + $0x54] sm:$0xf] }
  0xa6   :  { %6589 = vmatmul.mubr.msk.bf16.gmra.mxu0 %vm996_vm3, %v8065_v19  ;;  %11449 = vst [vmem:[#allocation58_spill] sm:$0xff] %v8127_v12  ;;  %v8140_v56 = vcombine.low %v2063_v37, %v2066_v25  ;;  %v8144_v36 = vcombine.low %v2028_v42, %v2031_v22  ;;  %v2036_v1 = vrot.slane %v2034_v31, 4  ;;  %v2077_v63 = vsel %vm7914_vm7, %v5852_v58, %v2076_v0  ;;  %v7110_v42 = vld [vmem:[%s11181_s0 + $0x58] sm:$0xf] }
  0xa7   :  { %6592 = vmatprep.mubr.msk.bf16.mxu0 %vm996_vm3, %v8075_v15  ;;  %11450 = vst [vmem:[#allocation59_spill] sm:$0xff] %v8138_v61  ;;  %v2078_v48 = vrot.slane %v2076_v0, 4  ;;  %v5847_v10 = vrot.slane %v7569_v34, 9  ;;  %v2043_v54 = vrot.slane %v2041_v29, 4  ;;  %v2044_v24 = vrot.slane %v7585_v55, 5 }
  0xa8   :  { %11451 = vst [vmem:[#allocation60_spill] sm:$0xff] %v8140_v56  ;;  %11452 = vst [vmem:[#allocation61_spill] sm:$0xff] %v8144_v36  ;;  %v2073_v52 = vsel %vm7914_vm7, %v2071_v59, %v2072_v8  ;;  %v8158_v35 = vcombine.low %v7109_v57, %v7110_v42  ;;  %v8168_v55 = vcombine.low %v7467_v23, %v7474_v30  ;;  %v2048_v25 = vrot.slane %v7627_v62, 5  ;;  %v7113_v59 = vld [vmem:[%s11181_s0 + $0xd8] sm:$0xf] }
  0xa9   :  { %v8160_v22 = vcombine.low %v2070_v6, %v2073_v52  ;;  %v2080_v37 = vsel %vm7914_vm7, %v2078_v48, %v2079_v49  ;;  %v2035_v47 = vsel %vm7914_vm7, %v5846_v5, %v2034_v31  ;;  %v2038_v8 = vsel %vm7914_vm7, %v2036_v1, %v2037_v46  ;;  %v7114_v48 = vld [vmem:[%s11181_s0 + $0xe8] sm:$0xf]  ;;  %v7115_v52 = vld [vmem:[%s11181_s0 + $0xf4] sm:$0xf] }
  0xaa   :  { %6523 = vmatmul.mubr.msk.bf16.gmra.mxu1 %vm996_vm3, %v8060_v43  ;;  %11453 = vst [vmem:[#allocation62_spill] sm:$0xff] %v8158_v35  ;;  %11455 = vst [vmem:[#allocation64_spill] sm:$0xff] %v8168_v55  ;;  %v8170_v3 = vcombine.low %v2077_v63, %v2080_v37  ;;  %v2042_v58 = vsel %vm7914_vm7, %v5847_v10, %v2041_v29  ;;  %v2045_v23 = vsel %vm7914_vm7, %v2043_v54, %v2044_v24  ;;  %v7116_v37 = vld [vmem:[%s11181_s0 + $0xe4] sm:$0xf] }
  0xab   :  { %6526 = vmatprep.mubr.msk.bf16.mxu1 %vm996_vm3, %v8073_v14  ;;  %11454 = vst [vmem:[#allocation63_spill] sm:$0xff] %v8160_v22  ;;  %v8187_v30 = vcombine.low %v2035_v47, %v2038_v8  ;;  %v8189_v5 = vcombine.low %v2042_v58, %v2045_v23  ;;  %v5848_v31 = vrot.slane %v7619_v53, 9  ;;  %v2050_v46 = vrot.slane %v2048_v25, 4  ;;  %v7118_v23 = vld [vmem:[%s11181_s0 + $0xf0] sm:$0xf] }
  0xac   :  { %11456 = vst [vmem:[#allocation65_spill] sm:$0xff] %v8170_v3  ;;  %v2051_v0 = vrot.slane %v7640_v26, 5  ;;  %v8195_v29 = vcombine.low %v7506_v11, %v7529_v28  ;;  %v8201_v49 = vcombine.low %v7569_v34, %v7576_v40  ;;  %v8217_v28 = vcombine.low %v7619_v53, %v7627_v62  ;;  %v7111_v34 = vld [vmem:[%s11181_s0 + $0xdc] sm:$0xf]  ;;  %v7112_v53 = vld [vmem:[%s11181_s0 + $0xe0] sm:$0x1] }
  0xad   :  { %11457 = vst [vmem:[#allocation66_spill] sm:$0xff] %v8187_v30  ;;  %11458 = vst [vmem:[#allocation67_spill] sm:$0xff] %v8189_v5  ;;  %v2049_v6 = vsel %vm7914_vm7, %v5848_v31, %v2048_v25  ;;  %v2083_v40 = vrot.slane %v7111_v34, 5  ;;  %v2086_v62 = vrot.slane %v7112_v53, 5  ;;  %v5853_v1 = vrot.slane %v7113_v59, 9 }
  0xae   :  { %6593 = vmatmul.mubr.msk.bf16.gmra.mxu0 %vm996_vm3, %v8138_v61  ;;  %11459 = vst [vmem:[#allocation68_spill] sm:$0xff] %v8195_v29  ;;  %11460 = vst [vmem:[#allocation69_spill] sm:$0xff] %v8201_v49  ;;  %v2052_v26 = vsel %vm7914_vm7, %v2050_v46, %v2051_v0  ;;  %v2090_v10 = vrot.slane %v7114_v48, 5  ;;  %v2097_v57 = vrot.slane %v7115_v52, 5  ;;  %v5854_v47 = vrot.slane %v7116_v37, 9 }
  0xaf   :  { %6596 = vmatprep.mubr.msk.bf16.mxu0 %vm996_vm3, %v8144_v36  ;;  %v8213_v11 = vcombine.low %v2049_v6, %v2052_v26  ;;  %11462 = vst [vmem:[#allocation71_spill] sm:$0xff] %v8217_v28  ;;  %v2085_v63 = vrot.slane %v2083_v40, 4  ;;  %v2084_v54 = vsel %vm7914_vm7, %v5853_v1, %v2083_v40  ;;  %v7117_v25 = vld [vmem:[%s11181_s0 + $0xec] sm:$0x1]  ;;  %v5855_v31 = vrot.slane %v7118_v23, 9 }
  0xb0   :  { %v2092_v8 = vrot.slane %v2090_v10, 4  ;;  %v2093_v58 = vrot.slane %v7117_v25, 5  ;;  %v2099_v46 = vrot.slane %v2097_v57, 4  ;;  %v7119_v0 = vld [vmem:[%s11181_s0 + $0xf8] sm:$0x1]  ;;  %v5789_v26 = vcombine.low %v7113_v59, %v7111_v34 }
  0xb1   :  { %11461 = vst [vmem:[#allocation70_spill] sm:$0xff] %v8213_v11  ;;  %v2087_v24 = vsel %vm7914_vm7, %v2085_v63, %v2086_v62  ;;  %v2100_v6 = vrot.slane %v7119_v0, 5  ;;  %v2091_v40 = vsel %vm7914_vm7, %v5854_v47, %v2090_v10  ;;  %v7120_v62 = vld [vmem:[%s11181_s0 + $0x100] sm:$0xf]  ;;  %v2098_v63 = vsel %vm7914_vm7, %v5855_v31, %v2097_v57  ;;  %v7121_v34 = vld [vmem:[%s11181_s0 + $0x10c] sm:$0xf] }
  0xb2   :  { %6527 = vmatmul.mubr.msk.bf16.gmra.mxu1 %vm996_vm3, %v8158_v35  ;;  %v5886_v42 = vcombine.low %v2084_v54, %v2087_v24  ;;  %v2094_v53 = vsel %vm7914_vm7, %v2092_v8, %v2093_v58  ;;  %v2104_v1 = vrot.slane %v7120_v62, 5  ;;  %v2111_v59 = vrot.slane %v7121_v34, 5  ;;  %v7122_v57 = vld [vmem:[%s11181_s0 + $0xfc] sm:$0xf]  ;;  %v7123_v8 = vld [vmem:[%s11181_s0 + $0x104] sm:$0x1] }
  0xb3   :  { %6530 = vmatprep.mubr.msk.bf16.mxu1 %vm996_vm3, %v8168_v55  ;;  %v2101_v54 = vsel %vm7914_vm7, %v2099_v46, %v2100_v6  ;;  %v8286_v10 = vcombine.low %v2091_v40, %v2094_v53  ;;  %v2107_v25 = vrot.slane %v7123_v8, 5  ;;  %v7124_v58 = vld [vmem:[%s11181_s0 + $0x108] sm:$0xf]  ;;  %v7125_v0 = vld [vmem:[%s11181_s0 + $0x110] sm:$0x1]  ;;  %v8306_v40 = vcombine.low %v7118_v23, %v7115_v52 }
  0xb4   :  { %v8288_v24 = vcombine.low %v2098_v63, %v2101_v54  ;;  %v2106_v47 = vrot.slane %v2104_v1, 4  ;;  %v5857_v31 = vrot.slane %v7124_v58, 9  ;;  %v2113_v46 = vrot.slane %v2111_v59, 4  ;;  %v7126_v54 = vld [vmem:[%s11181_s0 + $0x118] sm:$0xf] }
  0xb5   :  { %11463 = vst [vmem:[#allocation72_spill] sm:$0xff] %v8286_v10  ;;  %v2114_v6 = vrot.slane %v7125_v0, 5  ;;  %v7127_v23 = vld [vmem:[%s11181_s0 + $0x124] sm:$0xf]  ;;  %v7130_v0 = vld [vmem:[%s11181_s0 + $0x120] sm:$0xf] }
  0xb6   :  { %6597 = vmatmul.mubr.msk.bf16.gmra.mxu0 %vm996_vm3, %v8187_v30  ;;  %11464 = vst [vmem:[#allocation73_spill] sm:$0xff] %v8288_v24  ;;  %v2108_v63 = vsel %vm7914_vm7, %v2106_v47, %v2107_v25  ;;  %v2125_v8 = vrot.slane %v7127_v23, 5 }
  0xb7   :  { %6600 = vmatprep.mubr.msk.bf16.mxu0 %vm996_vm3, %v8189_v5  ;;  %v2115_v52 = vsel %vm7914_vm7, %v2113_v46, %v2114_v6  ;;  %v5859_v6 = vrot.slane %v7130_v0, 9 }
  0xba   :  { %6531 = vmatmul.mubr.msk.bf16.gmra.mxu1 %vm996_vm3, %v8195_v29 }
  0xbb   :  { %6534 = vmatprep.mubr.msk.bf16.mxu1 %vm996_vm3, %v8201_v49 }
  0xbe   :  { %6601 = vmatmul.mubr.msk.bf16.gmra.mxu0 %vm996_vm3, %v8213_v11  ;;  %v8398_v11 = vcombine.low %v7130_v0, %v7127_v23 }
  0xbf   :  { %6604 = vmatprep.mubr.msk.bf16.mxu0 %vm996_vm3, %v8121_v27 }
  0xc2   :  { %6535 = vmatmul.mubr.msk.bf16.gmra.mxu1 %vm996_vm3, %v8217_v28 }
  0xc3   :  { %6538 = vmatprep.mubr.msk.bf16.mxu1 %vm996_vm3, %v8087_v16 }
  0xc6   :  { %6605 = vmatmul.mubr.msk.bf16.gmra.mxu0 %vm996_vm3, %v8140_v56 }
  0xc7   :  { %6608 = vmatprep.mubr.msk.bf16.mxu0 %vm996_vm3, %v8160_v22 }
  0xca   :  { %6539 = vmatmul.mubr.msk.bf16.gmra.mxu1 %vm996_vm3, %v8098_v60 }
  0xcb   :  { %6542 = vmatprep.mubr.msk.bf16.mxu1 %vm996_vm3, %v8110_v39 }
  0xce   :  { %6609 = vmatmul.mubr.msk.bf16.gmra.mxu0 %vm996_vm3, %v8170_v3 }
  0xcf   :  { %6612 = vmatprep.mubr.msk.bf16.mxu0 %vm996_vm3, %v5886_v42  ;;  %v5856_v42 = vrot.slane %v7122_v57, 9 }
  0xd1   :  { %v2105_v53 = vsel %vm7914_vm7, %v5856_v42, %v2104_v1 }
  0xd2   :  { %6543 = vmatmul.mubr.msk.bf16.gmra.mxu1 %vm996_vm3, %v8127_v12  ;;  %v8328_v1 = vcombine.low %v2105_v53, %v2108_v63  ;;  %v2127_v53 = vrot.slane %v2125_v8, 4  ;;  %v7131_v63 = vld [vmem:[%s11181_s0 + $0x128] sm:$0x1] }
  0xd3   :  { %6546 = vmatprep.mubr.msk.bf16.mxu1 %vm996_vm3, %v5789_v26  ;;  %v8302_v26 = vcombine.low %v7116_v37, %v7114_v48  ;;  %v2118_v48 = vrot.slane %v7126_v54, 5  ;;  %v2112_v37 = vsel %vm7914_vm7, %v5857_v31, %v2111_v59  ;;  %v7128_v59 = vld [vmem:[%s11181_s0 + $0x114] sm:$0xf]  ;;  %v7129_v31 = vld [vmem:[%s11181_s0 + $0x11c] sm:$0x1] }
  0xd4   :  { %11465 = vst [vmem:[#allocation74_spill] sm:$0xff] %v8328_v1  ;;  %v8330_v42 = vcombine.low %v2112_v37, %v2115_v52  ;;  %v5858_v47 = vrot.slane %v7128_v59, 9  ;;  %v2121_v46 = vrot.slane %v7129_v31, 5  ;;  %v2128_v37 = vrot.slane %v7131_v63, 5  ;;  %v7133_v63 = vld [vmem:[%s11181_s0 + $0x13c] sm:$0xf] }
  0xd5   :  { %v2120_v25 = vrot.slane %v2118_v48, 4  ;;  %v8344_v52 = vcombine.low %v7122_v57, %v7120_v62  ;;  %v7132_v62 = vld [vmem:[%s11181_s0 + $0x130] sm:$0xf]  ;;  %v8392_v56 = vcombine.low %v7128_v59, %v7126_v54  ;;  %v7138_v54 = vld [vmem:[%s11181_s0 + $0x148] sm:$0xf] }
  0xd6   :  { %6613 = vmatmul.mubr.msk.bf16.gmra.mxu0 %vm996_vm3, %v8286_v10  ;;  %11466 = vst [vmem:[#allocation75_spill] sm:$0xff] %v8330_v42  ;;  %v8350_v10 = vpop.f32.mrf.mxu0  ;;  %v2119_v31 = vsel %vm7914_vm7, %v5858_v47, %v2118_v48  ;;  %v2132_v57 = vrot.slane %v7132_v62, 5  ;;  %v2146_v59 = vrot.slane %v7138_v54, 5 }
  0xd7   :  { %6616 = vmatprep.mubr.msk.bf16.mxu0 %vm996_vm3, %v8288_v24  ;;  %11467 = vst [vmem:[#allocation76_spill] sm:$0xff] %v8344_v52  ;;  %v8348_v24 = vcombine.low %v7124_v58, %v7121_v34  ;;  %v2122_v3 = vsel %vm7914_vm7, %v2120_v25, %v2121_v46  ;;  %v2126_v34 = vsel %vm7914_vm7, %v5859_v6, %v2125_v8  ;;  %v7134_v46 = vld [vmem:[%s11181_s0 + $0x12c] sm:$0xf] }
  0xd8   :  { %v2129_v58 = vsel %vm7914_vm7, %v2127_v53, %v2128_v37  ;;  %v8374_v47 = vcombine.low %v2119_v31, %v2122_v3  ;;  %v8376_v25 = vpop.f32.mrf.mxu0  ;;  %v5860_v6 = vrot.slane %v7134_v46, 9  ;;  %v2134_v53 = vrot.slane %v2132_v57, 4  ;;  %v7135_v37 = vld [vmem:[%s11181_s0 + $0x134] sm:$0x1]  ;;  %v7136_v3 = vld [vmem:[%s11181_s0 + $0x138] sm:$0xf] }
  0xd9   :  { %v8378_v8 = vcombine.low %v2126_v34, %v2129_v58  ;;  %v5861_v31 = vrot.slane %v7136_v3, 9  ;;  %v7137_v34 = vld [vmem:[%s11181_s0 + $0x140] sm:$0x1]  ;;  %v8444_v36 = vcombine.low %v7136_v3, %v7133_v63  ;;  %v2167_v3 = vrot.slane %v7711_v41, 5 }
  0xda   :  { %6547 = vmatmul.mubr.msk.bf16.gmra.mxu1 %vm996_vm3, %v8302_v26  ;;  %11469 = vst [vmem:[#allocation78_spill] sm:$0xff] %v8374_v47  ;;  %v2142_v58 = vrot.slane %v7137_v34, 5  ;;  %v2133_v5 = vsel %vm7914_vm7, %v5860_v6, %v2132_v57 }
  0xdb   :  { %6550 = vmatprep.mubr.msk.bf16.mxu1 %vm996_vm3, %v8306_v40  ;;  %v8370_v48 = vpop.f32.mrf.mxu1  ;;  %11470 = vst [vmem:[#allocation79_spill] sm:$0xff] %v8378_v8 }
  0xdc   :  { %11468 = vst [vmem:[#allocation77_spill] sm:$0xff] %v8370_v48  ;;  %v8725_v48 = vld [vmem:[%s11181_s0 + $0xc8] sm:$0x1] }
  0xdd   :  { %v8394_v27 = vpop.f32.mrf.mxu1  ;;  %11528 = vst [vmem:[#allocation103_spill] sm:$0xff] %v8725_v48 }
  0xde   :  { %6617 = vmatmul.mubr.msk.bf16.gmra.mxu0 %vm996_vm3, %v8328_v1  ;;  %v2135_v1 = vrot.slane %v7135_v37, 5  ;;  %11471 = vst [vmem:[#allocation80_spill] sm:$0xff] %v8394_v27  ;;  %v8400_v37 = vpop.f32.mrf.mxu0 }
  0xdf   :  { %6620 = vmatprep.mubr.msk.bf16.mxu0 %vm996_vm3, %v8330_v42  ;;  %v2139_v42 = vrot.slane %v7133_v63, 5  ;;  %v8418_v57 = vpop.f32.mrf.mxu1 }
  0xe0   :  { %v2136_v34 = vsel %vm7914_vm7, %v2134_v53, %v2135_v1  ;;  %11472 = vst [vmem:[#allocation81_spill] sm:$0xff] %v8418_v57  ;;  %v8424_v6 = vpop.f32.mrf.mxu0 }
  0xe1   :  { %v2141_v22 = vrot.slane %v2139_v42, 4  ;;  %v2140_v23 = vsel %vm7914_vm7, %v5861_v31, %v2139_v42  ;;  %v8422_v1 = vcombine.low %v2133_v5, %v2136_v34  ;;  %v7140_v31 = vld [vmem:[%s11181_s0 + $0x14c] sm:$0x1]  ;;  %v7141_v5 = vld [vmem:[%s11181_s0 + $0x150] sm:$0xf]  ;;  %v8440_v30 = vpop.f32.mrf.mxu1 }
  0xe2   :  { %6551 = vmatmul.mubr.msk.bf16.gmra.mxu1 %vm996_vm3, %v8344_v52  ;;  %v5863_v34 = vrot.slane %v7141_v5, 9  ;;  %11475 = vst [vmem:[#allocation84_spill] sm:$0xff] %v8440_v30  ;;  %v11491_v30 = vld [vmem:[#allocation35_spill] sm:$0xff] }
  0xe3   :  { %6554 = vmatprep.mubr.msk.bf16.mxu1 %vm996_vm3, %v8348_v24  ;;  %v2143_v0 = vsel %vm7914_vm7, %v2141_v22, %v2142_v58  ;;  %11473 = vst [vmem:[#allocation82_spill] sm:$0xff] %v8422_v1  ;;  %v7139_v22 = vld [vmem:[%s11181_s0 + $0x144] sm:$0xf]  ;;  %v2149_v58 = vrot.slane %v7140_v31, 5  ;;  %v2184_v57 = vrot.slane %v11491_v30, 5 }
  0xe4   :  { %v8426_v53 = vcombine.low %v2140_v23, %v2143_v0  ;;  %v5862_v42 = vrot.slane %v7139_v22, 9  ;;  %v2156_v23 = vrot.slane %v7613_v32, 5  ;;  %v8438_v0 = vcombine.low %v7134_v46, %v7132_v62 }
  0xe5   :  { %v2160_v62 = vrot.slane %v7655_v2, 5  ;;  %v8476_v19 = vcombine.low %v7139_v22, %v7138_v54 }
  0xe6   :  { %6621 = vmatmul.mubr.msk.bf16.gmra.mxu0 %vm996_vm3, %v8374_v47  ;;  %v2153_v47 = vrot.slane %v7602_v13, 5  ;;  %11474 = vst [vmem:[#allocation83_spill] sm:$0xff] %v8426_v53  ;;  %v2148_v13 = vrot.slane %v2146_v59, 4  ;;  %v2147_v31 = vsel %vm7914_vm7, %v5862_v42, %v2146_v59 }
  0xe7   :  { %6624 = vmatprep.mubr.msk.bf16.mxu0 %vm996_vm3, %v8378_v8  ;;  %v8446_v61 = vpop.f32.mrf.mxu0 }
  0xe8   :  { %v2155_v8 = vrot.slane %v2153_v47, 4  ;;  %v2150_v32 = vsel %vm7914_vm7, %v2148_v13, %v2149_v58  ;;  %v2154_v46 = vsel %vm7914_vm7, %v5863_v34, %v2153_v47  ;;  %v5864_v47 = vrot.slane %v7647_v45, 9  ;;  %v11479_v58 = vld [vmem:[#allocation23_spill] sm:$0xff] }
  0xe9   :  { %v8466_v59 = vcombine.low %v2147_v31, %v2150_v32  ;;  %v8468_v42 = vpop.f32.mrf.mxu0  ;;  %v2162_v13 = vrot.slane %v2160_v62, 4  ;;  %v5865_v34 = vrot.slane %v11479_v58, 9  ;;  %11481 = vst [vmem:[#allocation23_spill] sm:$0xff] %v8476_v19  ;;  %v7142_v31 = vld [vmem:[%s11181_s0 + $0x154] sm:$0xf] }
  0xea   :  { %6555 = vmatmul.mubr.msk.bf16.gmra.mxu1 %vm996_vm3, %v8392_v56  ;;  %v2157_v63 = vsel %vm7914_vm7, %v2155_v8, %v2156_v23  ;;  %v2163_v8 = vrot.slane %v7665_v44, 5  ;;  %v2169_v23 = vrot.slane %v2167_v3, 4  ;;  %v8485_v45 = vcombine.low %v7141_v5, %v7142_v31 }
  0xeb   :  { %6558 = vmatprep.mubr.msk.bf16.mxu1 %vm996_vm3, %v8398_v11  ;;  %11477 = vst [vmem:[#allocation86_spill] sm:$0xff] %v8466_v59  ;;  %v8470_v2 = vcombine.low %v2154_v46, %v2157_v63  ;;  %v8487_v32 = vpop.f32.mrf.mxu0  ;;  %v2161_v44 = vsel %vm7914_vm7, %v5864_v47, %v2160_v62  ;;  %v2168_v46 = vsel %vm7914_vm7, %v5865_v34, %v2167_v3  ;;  %v11484_v63 = vld [vmem:[#allocation34_spill] sm:$0xff]  ;;  %v11488_v3 = vld [vmem:[#allocation27_spill] sm:$0xff] }
  0xec   :  { %v2164_v54 = vsel %vm7914_vm7, %v2162_v13, %v2163_v8  ;;  %v2181_v31 = vrot.slane %v11484_v63, 5  ;;  %v5866_v8 = vrot.slane %v11488_v3, 9 }
  0xed   :  { %11478 = vst [vmem:[#allocation87_spill] sm:$0xff] %v8470_v2  ;;  %v8507_v62 = vcombine.low %v2161_v44, %v2164_v54  ;;  %v8509_v47 = vpop.f32.mrf.mxu0  ;;  %v7144_v44 = vld [vmem:[%s11181_s0 + $0x160] sm:$0xf] }
  0xee   :  { %6625 = vmatmul.mubr.msk.bf16.gmra.mxu0 %vm996_vm3, %v8422_v1  ;;  %v11480_v1 = vld [vmem:[#allocation25_spill] sm:$0xff]  ;;  %v2183_v38 = vrot.slane %v2181_v31, 4 }
  0xef   :  { %6628 = vmatprep.mubr.msk.bf16.mxu0 %vm996_vm3, %v8426_v53  ;;  %v8462_v53 = vpop.f32.mrf.mxu1  ;;  %v2170_v15 = vrot.slane %v11480_v1, 5  ;;  %v11483_v1 = vld [vmem:[#allocation29_spill] sm:$0xff]  ;;  %11486 = vst [vmem:[#allocation34_spill] sm:$0xff] %v8507_v62 }
  0xf0   :  { %11476 = vst [vmem:[#allocation85_spill] sm:$0xff] %v8462_v53  ;;  %v2174_v22 = vrot.slane %v11483_v1, 5 }
  0xf1   :  { %v8478_v53 = vpop.f32.mrf.mxu1  ;;  %v2171_v5 = vsel %vm7914_vm7, %v2169_v23, %v2170_v15  ;;  %v11489_v15 = vld [vmem:[#allocation30_spill] sm:$0xff] }
  0xf2   :  { %6559 = vmatmul.mubr.msk.bf16.gmra.mxu1 %vm996_vm3, %v8438_v0  ;;  %11482 = vst [vmem:[#allocation25_spill] sm:$0xff] %v8478_v53  ;;  %v8511_v13 = vcombine.low %v2168_v46, %v2171_v5  ;;  %v2176_v34 = vrot.slane %v2174_v22, 4  ;;  %v2177_v23 = vrot.slane %v11489_v15, 5  ;;  %v8531_v5 = vcombine.low %v11479_v58, %v7711_v41 }
  0xf3   :  { %6562 = vmatprep.mubr.msk.bf16.mxu1 %vm996_vm3, %v8444_v36  ;;  %v2175_v15 = vsel %vm7914_vm7, %v5866_v8, %v2174_v22  ;;  %v2185_v41 = vsel %vm7914_vm7, %v2183_v38, %v2184_v57  ;;  %v8562_v38 = vcombine.low %v11488_v3, %v11483_v1 }
  0xf4   :  { %11487 = vst [vmem:[#allocation88_spill] sm:$0xff] %v8511_v13 }
  0xf6   :  { %6629 = vmatmul.mubr.msk.bf16.gmra.mxu0 %vm996_vm3, %v8466_v59  ;;  %v11490_v59 = vld [vmem:[#allocation32_spill] sm:$0xff] }
  0xf7   :  { %6632 = vmatprep.mubr.msk.bf16.mxu0 %vm996_vm3, %v8470_v2  ;;  %v8503_v2 = vpop.f32.mrf.mxu1  ;;  %v5867_v53 = vrot.slane %v11490_v59, 9 }
  0xf8   :  { %11485 = vst [vmem:[#allocation29_spill] sm:$0xff] %v8503_v2  ;;  %v7143_v2 = vld [vmem:[%s11181_s0 + $0x15c] sm:$0xf]  ;;  %v8533_v30 = vpop.f32.mrf.mxu0 }
  0xf9   :  { %v8523_v54 = vcombine.low %v7143_v2, %v7144_v44  ;;  %v8525_v46 = vpop.f32.mrf.mxu1  ;;  %v2178_v2 = vsel %vm7914_vm7, %v2176_v34, %v2177_v23  ;;  %v11493_v44 = vld [vmem:[#allocation38_spill] sm:$0xff]  ;;  %v11497_v23 = vld [vmem:[#allocation37_spill] sm:$0xff] }
  0xfa   :  { %6563 = vmatmul.mubr.msk.bf16.gmra.mxu1 %vm996_vm3, %v8476_v19  ;;  %11492 = vst [vmem:[#allocation27_spill] sm:$0xff] %v8525_v46  ;;  %v2188_v46 = vrot.slane %v11493_v44, 5  ;;  %v8552_v22 = vcombine.low %v2175_v15, %v2178_v2  ;;  %v8554_v8 = vpop.f32.mrf.mxu0  ;;  %v8570_v15 = vcombine.low %v11490_v59, %v11484_v63 }
  0xfb   :  { %6566 = vmatprep.mubr.msk.bf16.mxu1 %vm996_vm3, %v8485_v45 }
  0xfc   :  { %11495 = vst [vmem:[#allocation32_spill] sm:$0xff] %v8552_v22 }
  0xfe   :  { %6633 = vmatmul.mubr.msk.bf16.gmra.mxu0 %vm996_vm3, %v8507_v62  ;;  %v2182_v62 = vsel %vm7914_vm7, %v5867_v53, %v2181_v31  ;;  %v8548_v58 = vpop.f32.mrf.mxu1  ;;  %v2190_v53 = vrot.slane %v2188_v46, 4  ;;  %v11498_v31 = vld [vmem:[#allocation40_spill] sm:$0xff] }
  0xff   :  { %6636 = vmatprep.mubr.msk.bf16.mxu0 %vm996_vm3, %v8511_v13  ;;  %11494 = vst [vmem:[#allocation30_spill] sm:$0xff] %v8548_v58  ;;  %v8556_v34 = vcombine.low %v2182_v62, %v2185_v41  ;;  %v5868_v13 = vrot.slane %v11497_v23, 9  ;;  %v2191_v27 = vrot.slane %v11498_v31, 5  ;;  %v8572_v62 = vpop.f32.mrf.mxu0  ;;  %v8592_v41 = vcombine.low %v11497_v23, %v11493_v44 }
 0x100   :  { %v8564_v57 = vpop.f32.mrf.mxu1  ;;  %v3940_v23 = vsel %vm1093_vm0, %v8033_v7, 0 }
 0x101   :  { %11496 = vst [vmem:[#allocation35_spill] sm:$0xff] %v8556_v34  ;;  %11499 = vst [vmem:[#allocation38_spill] sm:$0xff] %v8564_v57  ;;  %v2189_v2 = vsel %vm7914_vm7, %v5868_v13, %v2188_v46  ;;  %v2192_v1 = vsel %vm7914_vm7, %v2190_v53, %v2191_v27  ;;  %v8588_v63 = vpop.f32.mrf.mxu0  ;;  %v11503_v46 = vld [vmem:[#allocation3_spill] sm:$0xff] }
 0x102   :  { %6567 = vmatmul.mubr.msk.bf16.gmra.mxu1 %vm996_vm3, %v8523_v54  ;;  %v8582_v3 = vpop.f32.mrf.mxu1  ;;  %v8586_v59 = vcombine.low %v2189_v2, %v2192_v1  ;;  %v11506_v2 = vld [vmem:[#allocation5_spill] sm:$0xff] }
 0x103   :  { %6570 = vmatprep.mubr.msk.bf16.mxu1 %vm996_vm3, %v8531_v5  ;;  %11500 = vst [vmem:[#allocation37_spill] sm:$0xff] %v8582_v3  ;;  %v11525_v3 = vld [vmem:[#allocation21_spill] sm:$0xff] }
 0x104   :  { %11501 = vst [vmem:[#allocation40_spill] sm:$0xff] %v8586_v59  ;;  %v8594_v13 = vpop.f32.mrf.mxu1 }
 0x105   :  { %11502 = vst [vmem:[#allocation89_spill] sm:$0xff] %v8594_v13  ;;  %v11520_v13 = vld [vmem:[#allocation19_spill] sm:$0xff] }
 0x106   :  { %6637 = vmatmul.mubr.msk.bf16.gmra.mxu0 %vm996_vm3, %v8552_v22 }
 0x107   :  { %6640 = vmatprep.mubr.msk.bf16.mxu0 %vm996_vm3, %v8556_v34  ;;  %v11512_v34 = vld [vmem:[#allocation11_spill] sm:$0xff] }
 0x109   :  { %v8598_v27 = vpop.f32.mrf.mxu0 }
 0x10a   :  { %6571 = vmatmul.mubr.msk.bf16.gmra.mxu1 %vm996_vm3, %v8562_v38 }
 0x10b   :  { %6574 = vmatprep.mubr.msk.bf16.mxu1 %vm996_vm3, %v8570_v15  ;;  %v8608_v44 = vpop.f32.mrf.mxu0 }
 0x10d   :  { %v8604_v53 = vpop.f32.mrf.mxu1  ;;  %v8616_v1 = vpop.f32.mrf.mxu0 }
 0x10e   :  { %6641 = vmatmul.mubr.msk.bf16.gmra.mxu0 %vm996_vm3, %v8586_v59  ;;  %11504 = vst [vmem:[#allocation3_spill] sm:$0xff] %v8604_v53  ;;  %v11507_v59 = vld [vmem:[#allocation7_spill] sm:$0xff] }
 0x10f   :  { %6712 = vmatprep.mubr.msk.bf16.mxu0 %vm996_vm3, %v11503_v46  ;;  %v8612_v31 = vpop.f32.mrf.mxu1  ;;  %v3566_v46 = vsel %vm1093_vm0, %v8013_v33, 0  ;;  %v8628_v7 = vpop.f32.mrf.mxu0  ;;  %v8640_v33 = vld [vmem:[%s11180_s1 + $0x20] sm:$0xf] }
 0x110   :  { %11505 = vst [vmem:[#allocation90_spill] sm:$0xff] %v8612_v31  ;;  %v11516_v31 = vld [vmem:[#allocation15_spill] sm:$0xff] }
 0x112   :  { %6575 = vmatmul.mubr.msk.bf16.gmra.mxu1 %vm996_vm3, %v8592_v41 }
 0x113   :  { %6646 = vmatprep.mubr.msk.bf16.mxu1 %vm996_vm3, %v7986_v51  ;;  %v8624_v51 = vpop.f32.mrf.mxu1 }
 0x114   :  { %11508 = vst [vmem:[#allocation91_spill] sm:$0xff] %v8624_v51  ;;  %v11515_v51 = vld [vmem:[#allocation13_spill] sm:$0xff] }
 0x116   :  { %6713 = vmatmul.mubr.msk.bf16.vlgmr.msra.gmra.mxu0 %vm996_vm3, %v11506_v2  ;;  %v8633_v2 = vld [vmem:[%s11180_s1 + $0x1c] sm:$0xf] }
 0x117   :  { %6843 = vmatpush3.bf16.msra.mxu0 %v3940_v23  ;;  %6716 = vmatprep.mubr.msk.bf16.mxu0 %vm996_vm3, %v11507_v59  ;;  %11509 = vst [vmem:[#allocation92_spill] sm:$0xff] %v8633_v2  ;;  %v8642_v23 = vpop.f32.mrf.mxu1 }
 0x118   :  { %11510 = vst [vmem:[#allocation93_spill] sm:$0xff] %v8642_v23  ;;  %7051 = vmatprep.subr.msk.bf16.mxu0 %vm1093_vm0, %v8640_v33 }
 0x11a   :  { %6647 = vmatmul.mubr.msk.bf16.vlgmr.msra.gmra.mxu1 %vm996_vm3, %v7992_v18  ;;  %v8648_v59 = vpop.f32.mrf.mxu0 }
 0x11b   :  { %6777 = vmatpush3.bf16.msra.mxu1 %v3566_v46  ;;  %6650 = vmatprep.mubr.msk.bf16.mxu1 %vm996_vm3, %v8041_v50  ;;  %v11511_v46 = vld [vmem:[#allocation9_spill] sm:$0xff] }
 0x11c   :  { %7050 = vmatprep.subr.msk.bf16.mxu1 %vm1093_vm0, %v8633_v2  ;;  %v8658_v21 = vpop.f32.mrf.mxu0 }
 0x11e   :  { %6717 = vmatmul.mubr.msk.bf16.gmra.mxu0 %vm996_vm3, %v11511_v46  ;;  %v8664_v46 = vpop.f32.mrf.mxu0 }
 0x11f   :  { %6720 = vmatprep.mubr.msk.bf16.mxu0 %vm996_vm3, %v11512_v34  ;;  %v8654_v22 = vpop.f32.mrf.mxu1 }
 0x120   :  { %11513 = vst [vmem:[#allocation94_spill] sm:$0xff] %v8654_v22  ;;  %v8674_v22 = vpop.f32.mrf.mxu0 }
 0x121   :  { %v8660_v23 = vpop.f32.mrf.mxu1 }
 0x122   :  { %6651 = vmatmul.mubr.msk.bf16.gmra.mxu1 %vm996_vm3, %v8043_v20  ;;  %11514 = vst [vmem:[#allocation95_spill] sm:$0xff] %v8660_v23  ;;  %v11519_v23 = vld [vmem:[#allocation17_spill] sm:$0xff]  ;;  %v11530_v20 = vld [vmem:[#allocation28_spill] sm:$0xff] }
 0x123   :  { %6654 = vmatprep.mubr.msk.bf16.mxu1 %vm996_vm3, %v8060_v43  ;;  %v8670_v34 = vpop.f32.mrf.mxu1 }
 0x124   :  { %11517 = vst [vmem:[#allocation96_spill] sm:$0xff] %v8670_v34 }
 0x125   :  { %v8676_v53 = vpop.f32.mrf.mxu1 }
 0x126   :  { %6721 = vmatmul.mubr.msk.bf16.gmra.mxu0 %vm996_vm3, %v11515_v51  ;;  %11518 = vst [vmem:[#allocation97_spill] sm:$0xff] %v8676_v53  ;;  %v8695_v53 = vld [vmem:[%s11181_s0 + $0xc0] sm:$0xf] }
 0x127   :  { %6724 = vmatprep.mubr.msk.bf16.mxu0 %vm996_vm3, %v11516_v31  ;;  %11522 = vst [vmem:[#allocation99_spill] sm:$0xff] %v8695_v53  ;;  %v3118_v57 = vshrl.u32 %v8695_v53, 16  ;;  %v3121_v58 = vshll.u32 %v8695_v53, 16 }
 0x12a   :  { %6655 = vmatmul.mubr.msk.bf16.gmra.mxu1 %vm996_vm3, %v8073_v14  ;;  %v3120_v14 = vrot.slane %v3118_v57, 4 }
 0x12b   :  { %6658 = vmatprep.mubr.msk.bf16.mxu1 %vm996_vm3, %v8158_v35 }
 0x12c   :  { %v8680_v51 = vpop.f32.mrf.mxu0 }
 0x12e   :  { %6725 = vmatmul.mubr.msk.bf16.gmra.mxu0 %vm996_vm3, %v11519_v23  ;;  %v8690_v34 = vpop.f32.mrf.mxu0  ;;  %v8700_v23 = vld [vmem:[%s11181_s0 + $0xc4] sm:$0xf] }
 0x12f   :  { %6728 = vmatprep.mubr.msk.bf16.mxu0 %vm996_vm3, %v11520_v13  ;;  %v8686_v31 = vpop.f32.mrf.mxu1  ;;  %11523 = vst [vmem:[#allocation100_spill] sm:$0xff] %v8700_v23  ;;  %v3127_v35 = vshll.u32 %v8700_v23, 16 }
 0x130   :  { %11521 = vst [vmem:[#allocation98_spill] sm:$0xff] %v8686_v31  ;;  %v8706_v31 = vpop.f32.mrf.mxu0 }
 0x131   :  { %v8702_v13 = vpop.f32.mrf.mxu1  ;;  %v3129_v43 = vrot.slane %v3127_v35, 5  ;;  %v3137_v35 = vshll.u32 %v8725_v48, 16 }
 0x132   :  { %6659 = vmatmul.mubr.msk.bf16.gmra.mxu1 %vm996_vm3, %v8168_v55  ;;  %11524 = vst [vmem:[#allocation101_spill] sm:$0xff] %v8702_v13  ;;  %v3131_v55 = vshrl.u32 %v8700_v23, 16 }
 0x133   :  { %6662 = vmatprep.mubr.msk.bf16.mxu1 %vm996_vm3, %v8195_v29  ;;  %v11526_v29 = vld [vmem:[#allocation24_spill] sm:$0xff]  ;;  %v8716_v13 = vpop.f32.mrf.mxu1  ;;  %v3139_v2 = vrot.slane %v3137_v35, 5 }
 0x134   :  { %11527 = vst [vmem:[#allocation102_spill] sm:$0xff] %v8716_v13  ;;  %v3133_v17 = vrot.slane %v3131_v55, 4 }
 0x135   :  { %v8727_v9 = vpop.f32.mrf.mxu1 }
 0x136   :  { %6729 = vmatmul.mubr.msk.bf16.gmra.mxu0 %vm996_vm3, %v11525_v3  ;;  %v8720_v3 = vpop.f32.mrf.mxu0  ;;  %11529 = vst [vmem:[#allocation104_spill] sm:$0xff] %v8727_v9  ;;  %v3134_v57 = vor.u32 %v3133_v17, %v3129_v43 }
 0x137   :  { %6732 = vmatprep.mubr.msk.bf16.mxu0 %vm996_vm3, %v11526_v29  ;;  %v3123_v29 = vrot.slane %v3121_v58, 5 }
 0x138   :  { %v3135_v9 = vrot.slane %v3134_v57, 4 }
 0x13a   :  { %6663 = vmatmul.mubr.msk.bf16.gmra.mxu1 %vm996_vm3, %v8201_v49  ;;  %v11531_v49 = vld [vmem:[#allocation33_spill] sm:$0xff]  ;;  %v3140_v48 = vsel %vm7202_vm4, %v3135_v9, %v3139_v2  ;;  %v11541_v9 = vld [vmem:[#allocation4_spill] sm:$0xff] }
 0x13b   :  { %6666 = vmatprep.mubr.msk.bf16.mxu1 %vm996_vm3, %v8217_v28  ;;  %v3124_v28 = vor.u32 %v3123_v29, %v3120_v14  ;;  %v11535_v14 = vld [vmem:[#allocation43_spill] sm:$0xff]  ;;  %v11591_v29 = vld [vmem:[#allocation29_spill] sm:$0xff] }
 0x13c   :  { %v8731_v13 = vpop.f32.mrf.mxu0 }
 0x13e   :  { %6733 = vmatmul.mubr.msk.bf16.gmra.mxu0 %vm996_vm3, %v11530_v20  ;;  %v8742_v58 = vpop.f32.mrf.mxu0  ;;  %v3125_v20 = vrot.slane %v3124_v28, 4 }
 0x13f   :  { %6736 = vmatprep.mubr.msk.bf16.mxu0 %vm996_vm3, %v11531_v49  ;;  %v11534_v49 = vld [vmem:[#allocation39_spill] sm:$0xff] }
 0x140   :  { %v8748_v17 = vpop.f32.mrf.mxu0 }
 0x141   :  { %v8738_v55 = vpop.f32.mrf.mxu1 }
 0x142   :  { %6667 = vmatmul.mubr.msk.bf16.gmra.mxu1 %vm996_vm3, %v8087_v16  ;;  %11532 = vst [vmem:[#allocation105_spill] sm:$0xff] %v8738_v55  ;;  %v3130_v55 = vsel %vm7202_vm4, %v3125_v20, %v3129_v43  ;;  %v8760_v57 = vpop.f32.mrf.mxu0  ;;  %v8770_v20 = vcombine.low %v8695_v53, %v8700_v23  ;;  %v11548_v16 = vld [vmem:[#allocation10_spill] sm:$0xff] }
 0x143   :  { %6670 = vmatprep.mubr.msk.bf16.mxu1 %vm996_vm3, %v8098_v60  ;;  %v8744_v50 = vpop.f32.mrf.mxu1  ;;  %v8764_v35 = vcombine.low %v3130_v55, %v3140_v48 }
 0x144   :  { %11533 = vst [vmem:[#allocation106_spill] sm:$0xff] %v8744_v50  ;;  %11540 = vst [vmem:[#allocation110_spill] sm:$0xff] %v8770_v20 }
 0x145   :  { %v8758_v28 = vpop.f32.mrf.mxu1  ;;  %11538 = vst [vmem:[#allocation108_spill] sm:$0xff] %v8764_v35 }
 0x146   :  { %6737 = vmatmul.mubr.msk.bf16.gmra.mxu0 %vm996_vm3, %v11534_v49  ;;  %11537 = vst [vmem:[#allocation107_spill] sm:$0xff] %v8758_v28 }
 0x147   :  { %6740 = vmatprep.mubr.msk.bf16.mxu0 %vm996_vm3, %v11535_v14  ;;  %v8766_v49 = vpop.f32.mrf.mxu1 }
 0x148   :  { %11539 = vst [vmem:[#allocation109_spill] sm:$0xff] %v8766_v49 }
 0x14a   :  { %6671 = vmatmul.mubr.msk.bf16.gmra.mxu1 %vm996_vm3, %v8110_v39 }
 0x14b   :  { %6674 = vmatprep.mubr.msk.bf16.mxu1 %vm996_vm3, %v8127_v12 }
 0x14e   :  { %v8772_v43 = vpop.f32.mrf.mxu0  ;;  %6741 = vmatmul.mubr.msk.bf16.gmra.mxu0 %vm996_vm3, %v8764_v35 }
 0x14f   :  { %6744 = vmatprep.mubr.msk.bf16.mxu0 %vm996_vm3, %v11541_v9  ;;  %v11545_v9 = vld [vmem:[#allocation6_spill] sm:$0xff] }
 0x150   :  { %v8778_v2 = vpop.f32.mrf.mxu0 }
 0x152   :  { %v8780_v14 = vpop.f32.mrf.mxu1  ;;  %6675 = vmatmul.mubr.msk.bf16.gmra.mxu1 %vm996_vm3, %v8770_v20  ;;  %v8784_v48 = vpop.f32.mrf.mxu0 }
 0x153   :  { %11542 = vst [vmem:[#allocation4_spill] sm:$0xff] %v8780_v14  ;;  %6678 = vmatprep.mubr.msk.bf16.mxu1 %vm996_vm3, %v8302_v26  ;;  %v11547_v14 = vld [vmem:[#allocation8_spill] sm:$0xff] }
 0x154   :  { %v8788_v55 = vpop.f32.mrf.mxu1  ;;  %v8790_v49 = vpop.f32.mrf.mxu0 }
 0x155   :  { %11543 = vst [vmem:[#allocation111_spill] sm:$0xff] %v8788_v55 }
 0x156   :  { %v8792_v35 = vpop.f32.mrf.mxu1  ;;  %v6582_v28 = vpop.f32.mrf.mxu0  ;;  %6745 = vmatmul.mubr.msk.bf16.gmra.mxu0 %vm996_vm3, %v11545_v9 }
 0x157   :  { %11544 = vst [vmem:[#allocation112_spill] sm:$0xff] %v8792_v35  ;;  %6748 = vmatprep.mubr.msk.bf16.mxu0 %vm996_vm3, %v11547_v14 }
 0x158   :  { %v8796_v50 = vpop.f32.mrf.mxu1  ;;  %v2424_v20 = vpop.f32.mrf.mxu0 }
 0x159   :  { %11546 = vst [vmem:[#allocation113_spill] sm:$0xff] %v8796_v50 }
 0x15a   :  { %v6516_v12 = vpop.f32.mrf.mxu1  ;;  %6679 = vmatmul.mubr.msk.bf16.gmra.mxu1 %vm996_vm3, %v8306_v40  ;;  %v6583_v55 = vpop.f32.mrf.mxu0 }
 0x15b   :  { %v1688_v26 = vadd.f32 %v6516_v12, %v8350_v10  ;;  %6682 = vmatprep.mubr.msk.bf16.mxu1 %vm996_vm3, %v8344_v52  ;;  %v11549_v10 = vld [vmem:[#allocation12_spill] sm:$0xff] }
 0x15c   :  { %v1679_v35 = vpop.f32.mrf.mxu1  ;;  %v2427_v50 = vpop.f32.mrf.mxu0 }
 0x15d   :  { %v8805_v53 = vadd.f32 %v6582_v28, %v1688_v26  ;;  %v1680_v9 = vadd.f32 %v1679_v35, %v8376_v25 }
 0x15e   :  { %v6517_v23 = vpop.f32.mrf.mxu1  ;;  %v6586_v60 = vpop.f32.mrf.mxu0  ;;  %6749 = vmatmul.mubr.msk.bf16.gmra.mxu0 %vm996_vm3, %v11548_v16 }
 0x15f   :  { %v8808_v39 = vadd.f32 %v2424_v20, %v1680_v9  ;;  %v1691_v14 = vadd.f32 %v6517_v23, %v8400_v37  ;;  %6752 = vmatprep.mubr.msk.bf16.mxu0 %vm996_vm3, %v11549_v10 }
 0x160   :  { %v1682_v12 = vpop.f32.mrf.mxu1  ;;  %v2440_v26 = vpop.f32.mrf.mxu0 }
 0x161   :  { %v8815_v52 = vadd.f32 %v6583_v55, %v1691_v14  ;;  %v1683_v28 = vadd.f32 %v1682_v12, %v8424_v6 }
 0x162   :  { %v6520_v25 = vpop.f32.mrf.mxu1  ;;  %6683 = vmatmul.mubr.msk.bf16.gmra.mxu1 %vm996_vm3, %v8348_v24  ;;  %v6587_v23 = vpop.f32.mrf.mxu0 }
 0x163   :  { %v8820_v35 = vadd.f32 %v2427_v50, %v1683_v28  ;;  %v1704_v37 = vadd.f32 %v6520_v25, %v8446_v61  ;;  %6686 = vmatprep.mubr.msk.bf16.mxu1 %vm996_vm3, %v8392_v56  ;;  %v11550_v50 = vld [vmem:[#allocation14_spill] sm:$0xff]  ;;  %v11551_v28 = vld [vmem:[#allocation16_spill] sm:$0xff] }
 0x164   :  { %v1695_v20 = vpop.f32.mrf.mxu1  ;;  %v2443_v55 = vpop.f32.mrf.mxu0 }
 0x165   :  { %v8825_v9 = vadd.f32 %v6586_v60, %v1704_v37  ;;  %v1696_v14 = vadd.f32 %v1695_v20, %v8468_v42 }
 0x166   :  { %v6521_v6 = vpop.f32.mrf.mxu1  ;;  %v6590_v16 = vpop.f32.mrf.mxu0  ;;  %6753 = vmatmul.mubr.msk.bf16.gmra.mxu0 %vm996_vm3, %v11550_v50 }
 0x167   :  { %v8828_v12 = vadd.f32 %v2440_v26, %v1696_v14  ;;  %v1707_v10 = vadd.f32 %v6521_v6, %v8487_v32  ;;  %6756 = vmatprep.mubr.msk.bf16.mxu0 %vm996_vm3, %v11551_v28 }
 0x168   :  { %v1698_v61 = vpop.f32.mrf.mxu1  ;;  %v2456_v37 = vpop.f32.mrf.mxu0 }
 0x169   :  { %v8835_v25 = vadd.f32 %v6587_v23, %v1707_v10  ;;  %v1699_v60 = vadd.f32 %v1698_v61, %v8509_v47 }
 0x16a   :  { %v6524_v42 = vpop.f32.mrf.mxu1  ;;  %6687 = vmatmul.mubr.msk.bf16.gmra.mxu1 %vm996_vm3, %v8398_v11  ;;  %v6591_v20 = vpop.f32.mrf.mxu0 }
 0x16b   :  { %v8840_v26 = vadd.f32 %v2443_v55, %v1699_v60  ;;  %v1720_v32 = vadd.f32 %v6524_v42, %v8533_v30  ;;  %6690 = vmatprep.mubr.msk.bf16.mxu1 %vm996_vm3, %v8438_v0  ;;  %v11552_v55 = vld [vmem:[#allocation18_spill] sm:$0xff]  ;;  %v11553_v60 = vld [vmem:[#allocation20_spill] sm:$0xff] }
 0x16c   :  { %v1711_v14 = vpop.f32.mrf.mxu1  ;;  %v2459_v23 = vpop.f32.mrf.mxu0 }
 0x16d   :  { %v8845_v6 = vadd.f32 %v6590_v16, %v1720_v32  ;;  %v1712_v10 = vadd.f32 %v1711_v14, %v8554_v8 }
 0x16e   :  { %v6525_v47 = vpop.f32.mrf.mxu1  ;;  %v6594_v50 = vpop.f32.mrf.mxu0  ;;  %6757 = vmatmul.mubr.msk.bf16.gmra.mxu0 %vm996_vm3, %v11552_v55 }
 0x16f   :  { %v8848_v61 = vadd.f32 %v2456_v37, %v1712_v10  ;;  %v1723_v28 = vadd.f32 %v6525_v47, %v8572_v62  ;;  %6760 = vmatprep.mubr.msk.bf16.mxu0 %vm996_vm3, %v11553_v60 }
 0x170   :  { %v1714_v30 = vpop.f32.mrf.mxu1  ;;  %v2472_v32 = vpop.f32.mrf.mxu0 }
 0x171   :  { %v8855_v42 = vadd.f32 %v6591_v20, %v1723_v28  ;;  %v1715_v16 = vadd.f32 %v1714_v30, %v8588_v63  ;;  %v8871_v63 = vld [vmem:[%s11181_s0 + $0x198] sm:$0xf] }
 0x172   :  { %v6528_v8 = vpop.f32.mrf.mxu1  ;;  %6691 = vmatmul.mubr.msk.bf16.gmra.mxu1 %vm996_vm3, %v8444_v36  ;;  %v6595_v14 = vpop.f32.mrf.mxu0  ;;  %v3145_v60 = vshll.u32 %v8871_v63, 16 }
 0x173   :  { %11554 = vst [vmem:[#allocation114_spill] sm:$0xff] %v8855_v42  ;;  %v8860_v37 = vadd.f32 %v2459_v23, %v1715_v16  ;;  %v1736_v62 = vadd.f32 %v6528_v8, %v8598_v27  ;;  %6694 = vmatprep.mubr.msk.bf16.mxu1 %vm996_vm3, %v8476_v19  ;;  %v8876_v23 = vld [vmem:[%s11181_s0 + $0x19c] sm:$0xf]  ;;  %v11558_v8 = vld [vmem:[#allocation22_spill] sm:$0xff] }
 0x174   :  { %v1727_v10 = vpop.f32.mrf.mxu1  ;;  %v2475_v20 = vpop.f32.mrf.mxu0  ;;  %v3155_v55 = vshrl.u32 %v8876_v23, 16  ;;  %v3147_v42 = vrot.slane %v3145_v60, 5  ;;  %v11564_v60 = vld [vmem:[#allocation36_spill] sm:$0xff] }
 0x175   :  { %11555 = vst [vmem:[#allocation115_spill] sm:$0xff] %v8860_v37  ;;  %v8865_v47 = vadd.f32 %v6594_v50, %v1736_v62  ;;  %v1728_v28 = vadd.f32 %v1727_v10, %v8608_v44  ;;  %v11559_v62 = vld [vmem:[#allocation26_spill] sm:$0xff]  ;;  %v3142_v10 = vshrl.u32 %v8871_v63, 16 }
 0x176   :  { %v6529_v27 = vpop.f32.mrf.mxu1  ;;  %v6598_v50 = vpop.f32.mrf.mxu0  ;;  %6761 = vmatmul.mubr.msk.bf16.gmra.mxu0 %vm996_vm3, %v11558_v8 }
 0x177   :  { %11556 = vst [vmem:[#allocation116_spill] sm:$0xff] %v8865_v47  ;;  %v8878_v30 = vadd.f32 %v2472_v32, %v1728_v28  ;;  %v1739_v16 = vadd.f32 %v6529_v27, %v8616_v1  ;;  %6764 = vmatprep.mubr.msk.bf16.mxu0 %vm996_vm3, %v11559_v62  ;;  %v3151_v47 = vshll.u32 %v8876_v23, 16  ;;  %v3144_v19 = vrot.slane %v3142_v10, 4  ;;  %v11563_v10 = vld [vmem:[#allocation31_spill] sm:$0xff] }
 0x178   :  { %v1730_v44 = vpop.f32.mrf.mxu1  ;;  %v2488_v28 = vpop.f32.mrf.mxu0 }
 0x179   :  { %11557 = vst [vmem:[#allocation117_spill] sm:$0xff] %v8878_v30  ;;  %v8889_v32 = vadd.f32 %v6595_v14, %v1739_v16  ;;  %v1731_v1 = vadd.f32 %v1730_v44, %v8628_v7  ;;  %v3153_v14 = vrot.slane %v3151_v47, 5  ;;  %v3157_v16 = vrot.slane %v3155_v55, 4 }
 0x17a   :  { %v6532_v27 = vpop.f32.mrf.mxu1  ;;  %6695 = vmatmul.mubr.msk.bf16.gmra.mxu1 %vm996_vm3, %v8485_v45  ;;  %v6599_v30 = vpop.f32.mrf.mxu0 }
 0x17b   :  { %11560 = vst [vmem:[#allocation118_spill] sm:$0xff] %v8889_v32  ;;  %v8894_v8 = vadd.f32 %v2475_v20, %v1731_v1  ;;  %v1752_v62 = vadd.f32 %v6532_v27, %v8648_v59  ;;  %6698 = vmatprep.mubr.msk.bf16.mxu1 %vm996_vm3, %v8523_v54  ;;  %v8905_v20 = vld [vmem:[%s11181_s0 + $0x1a0] sm:$0x1] }
 0x17c   :  { %v1743_v37 = vpop.f32.mrf.mxu1  ;;  %v2491_v44 = vpop.f32.mrf.mxu0  ;;  %11562 = vst [vmem:[#allocation120_spill] sm:$0xff] %v8905_v20  ;;  %v3161_v47 = vshll.u32 %v8905_v20, 16 }
 0x17d   :  { %11561 = vst [vmem:[#allocation119_spill] sm:$0xff] %v8894_v8  ;;  %v8899_v32 = vadd.f32 %v6598_v50, %v1752_v62  ;;  %v1744_v7 = vadd.f32 %v1743_v37, %v8658_v21  ;;  %v3148_v21 = vor.u32 %v3147_v42, %v3144_v19  ;;  %v3158_v37 = vor.u32 %v3157_v16, %v3153_v14 }
 0x17e   :  { %v6533_v59 = vpop.f32.mrf.mxu1  ;;  %v6602_v8 = vpop.f32.mrf.mxu0  ;;  %6765 = vmatmul.mubr.msk.bf16.gmra.mxu0 %vm996_vm3, %v11563_v10 }
 0x17f   :  { %v8907_v1 = vadd.f32 %v2488_v28, %v1744_v7  ;;  %v1755_v27 = vadd.f32 %v6533_v59, %v8664_v46  ;;  %6768 = vmatprep.mubr.msk.bf16.mxu0 %vm996_vm3, %v11564_v60  ;;  %v3149_v42 = vrot.slane %v3148_v21, 4  ;;  %v3159_v16 = vrot.slane %v3158_v37, 4 }
 0x180   :  { %v1746_v55 = vpop.f32.mrf.mxu1  ;;  %v2504_v28 = vpop.f32.mrf.mxu0 }
 0x181   :  { %v8915_v50 = vadd.f32 %v6599_v30, %v1755_v27  ;;  %v1747_v62 = vadd.f32 %v1746_v55, %v8674_v22  ;;  %v3163_v30 = vrot.slane %v3161_v47, 5 }
 0x182   :  { %v6536_v7 = vpop.f32.mrf.mxu1  ;;  %6699 = vmatmul.mubr.msk.bf16.gmra.mxu1 %vm996_vm3, %v8531_v5  ;;  %v6603_v10 = vpop.f32.mrf.mxu0 }
 0x183   :  { %v8920_v46 = vadd.f32 %v2491_v44, %v1747_v62  ;;  %v1768_v59 = vadd.f32 %v6536_v7, %v8680_v51  ;;  %6702 = vmatprep.mubr.msk.bf16.mxu1 %vm996_vm3, %v8562_v38  ;;  %v11566_v51 = vld [vmem:[#allocation41_spill] sm:$0xff] }
 0x184   :  { %v1759_v19 = vpop.f32.mrf.mxu1  ;;  %v2507_v55 = vpop.f32.mrf.mxu0 }
 0x185   :  { %11565 = vst [vmem:[#allocation121_spill] sm:$0xff] %v8920_v46  ;;  %v8925_v27 = vadd.f32 %v6602_v8, %v1768_v59  ;;  %v1760_v22 = vadd.f32 %v1759_v19, %v8690_v34  ;;  %v11567_v46 = vld [vmem:[#allocation44_spill] sm:$0xff]  ;;  %v3154_v8 = vsel %vm7202_vm4, %v3149_v42, %v3153_v14  ;;  %v3164_v34 = vsel %vm7202_vm4, %v3159_v16, %v3163_v30 }
 0x186   :  { %v6537_v60 = vpop.f32.mrf.mxu1  ;;  %v6606_v62 = vpop.f32.mrf.mxu0  ;;  %6769 = vmatmul.mubr.msk.bf16.gmra.mxu0 %vm996_vm3, %v11566_v51  ;;  %v8949_v14 = vcombine.low %v3154_v8, %v3164_v34  ;;  %v8956_v30 = vcombine.low %v8871_v63, %v8876_v23 }
 0x187   :  { %v8928_v20 = vadd.f32 %v2504_v28, %v1760_v22  ;;  %v1771_v44 = vadd.f32 %v6537_v60, %v8706_v31  ;;  %6772 = vmatprep.mubr.msk.bf16.mxu0 %vm996_vm3, %v11567_v46  ;;  %v11587_v46 = vld [vmem:[#allocation51_spill] sm:$0xff] }
 0x188   :  { %v1762_v7 = vpop.f32.mrf.mxu1  ;;  %v2520_v47 = vpop.f32.mrf.mxu0  ;;  %11568 = vst [vmem:[#allocation122_spill] sm:$0xff] %v8949_v14 }
 0x189   :  { %v8939_v21 = vadd.f32 %v6603_v10, %v1771_v44  ;;  %v1763_v37 = vadd.f32 %v1762_v7, %v8720_v3 }
 0x18a   :  { %v6540_v31 = vpop.f32.mrf.mxu1  ;;  %6703 = vmatmul.mubr.msk.bf16.gmra.mxu1 %vm996_vm3, %v8570_v15  ;;  %v6607_v59 = vpop.f32.mrf.mxu0 }
 0x18b   :  { %v8944_v60 = vadd.f32 %v2507_v55, %v1763_v37  ;;  %v1784_v28 = vadd.f32 %v6540_v31, %v8731_v13  ;;  %6706 = vmatprep.mubr.msk.bf16.mxu1 %vm996_vm3, %v8592_v41 }
 0x18c   :  { %v1775_v19 = vpop.f32.mrf.mxu1  ;;  %v2523_v42 = vpop.f32.mrf.mxu0 }
 0x18d   :  { %v8951_v10 = vadd.f32 %v6606_v62, %v1784_v28  ;;  %v1776_v3 = vadd.f32 %v1775_v19, %v8742_v58 }
 0x18e   :  { %v6541_v16 = vpop.f32.mrf.mxu1  ;;  %v6610_v55 = vpop.f32.mrf.mxu0  ;;  %6773 = vmatmul.mubr.msk.bf16.gmra.mxu0 %vm996_vm3, %v8949_v14 }
 0x18f   :  { %v8958_v22 = vadd.f32 %v2520_v47, %v1776_v3  ;;  %v1787_v13 = vadd.f32 %v6541_v16, %v8748_v17  ;;  %6844 = vmatprep.mubr.msk.bf16.mxu0 %vm996_vm3, %v7992_v18 }
 0x190   :  { %v1778_v44 = vpop.f32.mrf.mxu1  ;;  %v2536_v7 = vpop.f32.mrf.mxu0 }
 0x191   :  { %v8965_v62 = vadd.f32 %v6607_v59, %v1787_v13  ;;  %v1779_v58 = vadd.f32 %v1778_v44, %v8760_v57  ;;  %v4744_v57 = vsel %vm1093_vm0, %v8640_v33, 0 }
 0x192   :  { %v6544_v8 = vpop.f32.mrf.mxu1  ;;  %6707 = vmatmul.mubr.msk.bf16.gmra.mxu1 %vm996_vm3, %v8956_v30  ;;  %v6611_v37 = vpop.f32.mrf.mxu0 }
 0x193   :  { %v8970_v34 = vadd.f32 %v2523_v42, %v1779_v58  ;;  %v1800_v17 = vadd.f32 %v6544_v8, %v8772_v43  ;;  %6778 = vmatprep.mubr.msk.bf16.mxu1 %vm996_vm3, %v7955_v4  ;;  %v11569_v43 = vld [vmem:[#allocation48_spill] sm:$0xff]  ;;  %v11574_v8 = vld [vmem:[#allocation77_spill] sm:$0xff] }
 0x194   :  { %v1791_v47 = vpop.f32.mrf.mxu1  ;;  %v2539_v28 = vpop.f32.mrf.mxu0  ;;  %v11570_v4 = vld [vmem:[#allocation92_spill] sm:$0xff] }
 0x195   :  { %v8975_v31 = vadd.f32 %v6610_v55, %v1800_v17  ;;  %v1792_v18 = vadd.f32 %v1791_v47, %v8778_v2  ;;  %v4358_v13 = vsel %vm1093_vm0, %v11570_v4, 0  ;;  %v11571_v55 = vld [vmem:[#allocation49_spill] sm:$0xff] }
 0x196   :  { %v6545_v59 = vpop.f32.mrf.mxu1  ;;  %v6614_v42 = vpop.f32.mrf.mxu0  ;;  %6845 = vmatmul.mubr.msk.bf16.vlgmr.msra.gmra.mxu0 %vm996_vm3, %v11569_v43  ;;  %v11579_v4 = vld [vmem:[#allocation81_spill] sm:$0xff] }
 0x197   :  { %v8980_v19 = vadd.f32 %v2536_v7, %v1792_v18  ;;  %v1803_v3 = vadd.f32 %v6545_v59, %v8784_v48  ;;  %6975 = vmatpush3.bf16.msra.mxu0 %v4744_v57  ;;  %6848 = vmatprep.mubr.msk.bf16.mxu0 %vm996_vm3, %v11571_v55  ;;  %v11572_v7 = vld [vmem:[#allocation45_spill] sm:$0xff]  ;;  %v11575_v18 = vld [vmem:[#allocation46_spill] sm:$0xff] }
 0x198   :  { %v1794_v16 = vpop.f32.mrf.mxu1  ;;  %v2552_v44 = vpop.f32.mrf.mxu0 }
 0x199   :  { %v8989_v2 = vadd.f32 %v6611_v37, %v1803_v3  ;;  %v1795_v33 = vadd.f32 %v1794_v16, %v8790_v49  ;;  %v11577_v37 = vld [vmem:[#allocation80_spill] sm:$0xff] }
 0x19a   :  { %v6548_v58 = vpop.f32.mrf.mxu1  ;;  %6779 = vmatmul.mubr.msk.bf16.vlgmr.msra.gmra.mxu1 %vm996_vm3, %v11572_v7  ;;  %v6615_v47 = vpop.f32.mrf.mxu0 }
 0x19b   :  { %v8994_v48 = vadd.f32 %v2539_v28, %v1795_v33  ;;  %v1816_v17 = vadd.f32 %v6548_v58, %v11574_v8  ;;  %6909 = vmatpush3.bf16.msra.mxu1 %v4358_v13  ;;  %6782 = vmatprep.mubr.msk.bf16.mxu1 %vm996_vm3, %v11575_v18  ;;  %v11580_v33 = vld [vmem:[#allocation50_spill] sm:$0xff]  ;;  %v11581_v58 = vld [vmem:[#allocation52_spill] sm:$0xff]  ;;  %v11651_v18 = vld [vmem:[#allocation65_spill] sm:$0xff] }
 0x19c   :  { %v1807_v57 = vpop.f32.mrf.mxu1  ;;  %v2555_v49 = vpop.f32.mrf.mxu0 }
 0x19d   :  { %11573 = vst [vmem:[#allocation48_spill] sm:$0xff] %v8994_v48  ;;  %v8999_v59 = vadd.f32 %v6614_v42, %v1816_v17  ;;  %v1808_v3 = vadd.f32 %v1807_v57, %v11577_v37  ;;  %v11583_v42 = vld [vmem:[#allocation84_spill] sm:$0xff]  ;;  %v11584_v37 = vld [vmem:[#allocation47_spill] sm:$0xff] }
 0x19e   :  { %v6549_v43 = vpop.f32.mrf.mxu1  ;;  %v6618_v28 = vpop.f32.mrf.mxu0  ;;  %6849 = vmatmul.mubr.msk.bf16.gmra.mxu0 %vm996_vm3, %v11580_v33 }
 0x19f   :  { %11576 = vst [vmem:[#allocation92_spill] sm:$0xff] %v8999_v59  ;;  %v9002_v16 = vadd.f32 %v2552_v44, %v1808_v3  ;;  %v1819_v55 = vadd.f32 %v6549_v43, %v11579_v4  ;;  %6852 = vmatprep.mubr.msk.bf16.mxu0 %vm996_vm3, %v11581_v58  ;;  %v11586_v3 = vld [vmem:[#allocation85_spill] sm:$0xff] }
 0x1a0   :  { %v1810_v13 = vpop.f32.mrf.mxu1  ;;  %v2568_v14 = vpop.f32.mrf.mxu0 }
 0x1a1   :  { %11578 = vst [vmem:[#allocation49_spill] sm:$0xff] %v9002_v16  ;;  %v9009_v8 = vadd.f32 %v6615_v47, %v1819_v55  ;;  %v1811_v17 = vadd.f32 %v1810_v13, %v11583_v42  ;;  %v11589_v47 = vld [vmem:[#allocation25_spill] sm:$0xff] }
 0x1a2   :  { %v6552_v57 = vpop.f32.mrf.mxu1  ;;  %6783 = vmatmul.mubr.msk.bf16.gmra.mxu1 %vm996_vm3, %v11584_v37  ;;  %v6619_v4 = vpop.f32.mrf.mxu0 }
 0x1a3   :  { %11582 = vst [vmem:[#allocation45_spill] sm:$0xff] %v9009_v8  ;;  %v9014_v44 = vadd.f32 %v2555_v49, %v1811_v17  ;;  %v1832_v43 = vadd.f32 %v6552_v57, %v11586_v3  ;;  %6786 = vmatprep.mubr.msk.bf16.mxu1 %vm996_vm3, %v11587_v46  ;;  %v11592_v49 = vld [vmem:[#allocation62_spill] sm:$0xff]  ;;  %v11593_v57 = vld [vmem:[#allocation64_spill] sm:$0xff] }
 0x1a4   :  { %v1823_v33 = vpop.f32.mrf.mxu1  ;;  %v2571_v58 = vpop.f32.mrf.mxu0 }
 0x1a5   :  { %11585 = vst [vmem:[#allocation77_spill] sm:$0xff] %v9014_v44  ;;  %v9019_v51 = vadd.f32 %v6618_v28, %v1832_v43  ;;  %v1824_v55 = vadd.f32 %v1823_v33, %v11589_v47  ;;  %v11595_v28 = vld [vmem:[#allocation27_spill] sm:$0xff]  ;;  %v11596_v47 = vld [vmem:[#allocation53_spill] sm:$0xff] }
 0x1a6   :  { %v6553_v13 = vpop.f32.mrf.mxu1  ;;  %v6622_v16 = vpop.f32.mrf.mxu0  ;;  %6853 = vmatmul.mubr.msk.bf16.gmra.mxu0 %vm996_vm3, %v11592_v49 }
 0x1a7   :  { %11588 = vst [vmem:[#allocation80_spill] sm:$0xff] %v9019_v51  ;;  %v9022_v42 = vadd.f32 %v2568_v14, %v1824_v55  ;;  %v1835_v8 = vadd.f32 %v6553_v13, %v11591_v29  ;;  %6856 = vmatprep.mubr.msk.bf16.mxu0 %vm996_vm3, %v11593_v57  ;;  %v11598_v29 = vld [vmem:[#allocation30_spill] sm:$0xff] }
 0x1a8   :  { %v1826_v17 = vpop.f32.mrf.mxu1  ;;  %v2584_v51 = vpop.f32.mrf.mxu0 }
 0x1a9   :  { %11590 = vst [vmem:[#allocation81_spill] sm:$0xff] %v9022_v42  ;;  %v9029_v3 = vadd.f32 %v6619_v4, %v1835_v8  ;;  %v1827_v43 = vadd.f32 %v1826_v17, %v11595_v28  ;;  %v11599_v42 = vld [vmem:[#allocation59_spill] sm:$0xff]  ;;  %v11601_v8 = vld [vmem:[#allocation38_spill] sm:$0xff] }
 0x1aa   :  { %v6556_v33 = vpop.f32.mrf.mxu1  ;;  %6787 = vmatmul.mubr.msk.bf16.gmra.mxu1 %vm996_vm3, %v11596_v47  ;;  %v6623_v13 = vpop.f32.mrf.mxu0 }
 0x1ab   :  { %11594 = vst [vmem:[#allocation50_spill] sm:$0xff] %v9029_v3  ;;  %v9034_v14 = vadd.f32 %v2571_v58, %v1827_v43  ;;  %v1848_v55 = vadd.f32 %v6556_v33, %v11598_v29  ;;  %6790 = vmatprep.mubr.msk.bf16.mxu1 %vm996_vm3, %v11599_v42  ;;  %v11603_v3 = vld [vmem:[#allocation37_spill] sm:$0xff]  ;;  %v11604_v58 = vld [vmem:[#allocation68_spill] sm:$0xff] }
 0x1ac   :  { %v1839_v49 = vpop.f32.mrf.mxu1  ;;  %v2587_v57 = vpop.f32.mrf.mxu0  ;;  %v11605_v33 = vld [vmem:[#allocation69_spill] sm:$0xff] }
 0x1ad   :  { %11597 = vst [vmem:[#allocation52_spill] sm:$0xff] %v9034_v14  ;;  %v9039_v44 = vadd.f32 %v6622_v16, %v1848_v55  ;;  %v1840_v4 = vadd.f32 %v1839_v49, %v11601_v8  ;;  %v11607_v16 = vld [vmem:[#allocation89_spill] sm:$0xff] }
 0x1ae   :  { %v6557_v17 = vpop.f32.mrf.mxu1  ;;  %v6626_v47 = vpop.f32.mrf.mxu0  ;;  %6857 = vmatmul.mubr.msk.bf16.gmra.mxu0 %vm996_vm3, %v11604_v58  ;;  %v11608_v8 = vld [vmem:[#allocation61_spill] sm:$0xff] }
 0x1af   :  { %11600 = vst [vmem:[#allocation84_spill] sm:$0xff] %v9039_v44  ;;  %v9042_v28 = vadd.f32 %v2584_v51, %v1840_v4  ;;  %v1851_v46 = vadd.f32 %v6557_v17, %v11603_v3  ;;  %6860 = vmatprep.mubr.msk.bf16.mxu0 %vm996_vm3, %v11605_v33  ;;  %v11610_v3 = vld [vmem:[#allocation3_spill] sm:$0xff] }
 0x1b0   :  { %v1842_v43 = vpop.f32.mrf.mxu1  ;;  %v2600_v44 = vpop.f32.mrf.mxu0 }
 0x1b1   :  { %11602 = vst [vmem:[#allocation85_spill] sm:$0xff] %v9042_v28  ;;  %v9049_v29 = vadd.f32 %v6623_v13, %v1851_v46  ;;  %v1843_v55 = vadd.f32 %v1842_v43, %v11607_v16  ;;  %v11611_v28 = vld [vmem:[#allocation66_spill] sm:$0xff] }
 0x1b2   :  { %v6560_v49 = vpop.f32.mrf.mxu1  ;;  %6791 = vmatmul.mubr.msk.bf16.gmra.mxu1 %vm996_vm3, %v11608_v8  ;;  %v6627_v17 = vpop.f32.mrf.mxu0  ;;  %v11613_v46 = vld [vmem:[#allocation90_spill] sm:$0xff] }
 0x1b3   :  { %11606 = vst [vmem:[#allocation25_spill] sm:$0xff] %v9049_v29  ;;  %v9054_v51 = vadd.f32 %v2587_v57, %v1843_v55  ;;  %v1864_v4 = vadd.f32 %v6560_v49, %v11610_v3  ;;  %6794 = vmatprep.mubr.msk.bf16.mxu1 %vm996_vm3, %v11611_v28  ;;  %v11615_v29 = vld [vmem:[#allocation91_spill] sm:$0xff]  ;;  %v11617_v49 = vld [vmem:[#allocation54_spill] sm:$0xff] }
 0x1b4   :  { %v1855_v58 = vpop.f32.mrf.mxu1  ;;  %v2603_v33 = vpop.f32.mrf.mxu0  ;;  %v11616_v57 = vld [vmem:[#allocation71_spill] sm:$0xff] }
 0x1b5   :  { %11609 = vst [vmem:[#allocation29_spill] sm:$0xff] %v9054_v51  ;;  %v9059_v14 = vadd.f32 %v6626_v47, %v1864_v4  ;;  %v1856_v13 = vadd.f32 %v1855_v58, %v11613_v46  ;;  %v11619_v47 = vld [vmem:[#allocation93_spill] sm:$0xff]  ;;  %v11620_v46 = vld [vmem:[#allocation67_spill] sm:$0xff] }
 0x1b6   :  { %v6561_v43 = vpop.f32.mrf.mxu1  ;;  %v6630_v8 = vpop.f32.mrf.mxu0  ;;  %6861 = vmatmul.mubr.msk.bf16.gmra.mxu0 %vm996_vm3, %v11616_v57 }
 0x1b7   :  { %11612 = vst [vmem:[#allocation62_spill] sm:$0xff] %v9059_v14  ;;  %v9062_v16 = vadd.f32 %v2600_v44, %v1856_v13  ;;  %v1867_v42 = vadd.f32 %v6561_v43, %v11615_v29  ;;  %6864 = vmatprep.mubr.msk.bf16.mxu0 %vm996_vm3, %v11617_v49  ;;  %v11622_v29 = vld [vmem:[#allocation94_spill] sm:$0xff] }
 0x1b8   :  { %v1858_v55 = vpop.f32.mrf.mxu1  ;;  %v2616_v14 = vpop.f32.mrf.mxu0 }
 0x1b9   :  { %11614 = vst [vmem:[#allocation64_spill] sm:$0xff] %v9062_v16  ;;  %v9069_v3 = vadd.f32 %v6627_v17, %v1867_v42  ;;  %v1859_v4 = vadd.f32 %v1858_v55, %v11619_v47  ;;  %v11623_v16 = vld [vmem:[#allocation70_spill] sm:$0xff]  ;;  %v11625_v42 = vld [vmem:[#allocation95_spill] sm:$0xff] }
 0x1ba   :  { %v6564_v58 = vpop.f32.mrf.mxu1  ;;  %6795 = vmatmul.mubr.msk.bf16.gmra.mxu1 %vm996_vm3, %v11620_v46  ;;  %v6631_v43 = vpop.f32.mrf.mxu0 }
 0x1bb   :  { %11618 = vst [vmem:[#allocation27_spill] sm:$0xff] %v9069_v3  ;;  %v9074_v44 = vadd.f32 %v2603_v33, %v1859_v4  ;;  %v1880_v13 = vadd.f32 %v6564_v58, %v11622_v29  ;;  %6798 = vmatprep.mubr.msk.bf16.mxu1 %vm996_vm3, %v11623_v16  ;;  %v11627_v3 = vld [vmem:[#allocation96_spill] sm:$0xff]  ;;  %v11628_v33 = vld [vmem:[#allocation55_spill] sm:$0xff] }
 0x1bc   :  { %v1871_v57 = vpop.f32.mrf.mxu1  ;;  %v2619_v49 = vpop.f32.mrf.mxu0  ;;  %v11629_v58 = vld [vmem:[#allocation56_spill] sm:$0xff]  ;;  %v11639_v16 = vld [vmem:[#allocation99_spill] sm:$0xff] }
 0x1bd   :  { %11621 = vst [vmem:[#allocation30_spill] sm:$0xff] %v9074_v44  ;;  %v9079_v51 = vadd.f32 %v6630_v8, %v1880_v13  ;;  %v1872_v17 = vadd.f32 %v1871_v57, %v11625_v42  ;;  %v11631_v8 = vld [vmem:[#allocation97_spill] sm:$0xff]  ;;  %v6004_v59 = vrot.slane %v11639_v16, 9 }
 0x1be   :  { %v6565_v55 = vpop.f32.mrf.mxu1  ;;  %v6634_v46 = vpop.f32.mrf.mxu0  ;;  %6865 = vmatmul.mubr.msk.bf16.gmra.mxu0 %vm996_vm3, %v11628_v33  ;;  %v11632_v42 = vld [vmem:[#allocation57_spill] sm:$0xff]  ;;  %v11636_v33 = vld [vmem:[#allocation100_spill] sm:$0xff] }
 0x1bf   :  { %11624 = vst [vmem:[#allocation38_spill] sm:$0xff] %v9079_v51  ;;  %v9082_v47 = vadd.f32 %v2616_v14, %v1872_v17  ;;  %v1883_v28 = vadd.f32 %v6565_v55, %v11627_v3  ;;  %6868 = vmatprep.mubr.msk.bf16.mxu0 %vm996_vm3, %v11629_v58  ;;  %v11634_v3 = vld [vmem:[#allocation98_spill] sm:$0xff]  ;;  %v3539_v44 = vrot.slane %v11636_v33, 5 }
 0x1c0   :  { %v1874_v4 = vpop.f32.mrf.mxu1  ;;  %v2632_v51 = vpop.f32.mrf.mxu0 }
 0x1c1   :  { %11626 = vst [vmem:[#allocation37_spill] sm:$0xff] %v9082_v47  ;;  %v9089_v29 = vadd.f32 %v6631_v43, %v1883_v28  ;;  %v1875_v13 = vadd.f32 %v1874_v4, %v11631_v8  ;;  %v11635_v47 = vld [vmem:[#allocation60_spill] sm:$0xff]  ;;  %v11638_v43 = vld [vmem:[#allocation101_spill] sm:$0xff] }
 0x1c2   :  { %v6568_v57 = vpop.f32.mrf.mxu1  ;;  %6799 = vmatmul.mubr.msk.bf16.gmra.mxu1 %vm996_vm3, %v11632_v42  ;;  %v6635_v55 = vpop.f32.mrf.mxu0 }
 0x1c3   :  { %11630 = vst [vmem:[#allocation68_spill] sm:$0xff] %v9089_v29  ;;  %v9094_v14 = vadd.f32 %v2619_v49, %v1875_v13  ;;  %v1896_v17 = vadd.f32 %v6568_v57, %v11634_v3  ;;  %6802 = vmatprep.mubr.msk.bf16.mxu1 %vm996_vm3, %v11635_v47  ;;  %v11641_v49 = vld [vmem:[#allocation102_spill] sm:$0xff]  ;;  %v11643_v47 = vld [vmem:[#allocation103_spill] sm:$0xff] }
 0x1c4   :  { %v1887_v58 = vpop.f32.mrf.mxu1  ;;  %v2635_v8 = vpop.f32.mrf.mxu0  ;;  %v11642_v3 = vld [vmem:[#allocation58_spill] sm:$0xff]  ;;  %v3542_v33 = vrot.slane %v11643_v47, 5 }
 0x1c5   :  { %11633 = vst [vmem:[#allocation69_spill] sm:$0xff] %v9094_v14  ;;  %v9100_v28 = vadd.f32 %v6634_v46, %v1896_v17  ;;  %v1888_v4 = vadd.f32 %v1887_v58, %v11638_v43  ;;  %v3541_v14 = vrot.slane %v3539_v44, 4  ;;  %v11644_v46 = vld [vmem:[#allocation110_spill] sm:$0xff]  ;;  %v9115_v17 = vld [vmem:[%s11181_s0 + $0xcc] sm:$0xf] }
 0x1c6   :  { %v6569_v29 = vpop.f32.mrf.mxu1  ;;  %v6638_v57 = vpop.f32.mrf.mxu0  ;;  %6869 = vmatmul.mubr.msk.bf16.gmra.mxu0 %vm996_vm3, %v11642_v3  ;;  %v3540_v3 = vsel %vm7914_vm7, %v6004_v59, %v3539_v44 }
 0x1c7   :  { %11637 = vst [vmem:[#allocation89_spill] sm:$0xff] %v9100_v28  ;;  %v9104_v42 = vadd.f32 %v2632_v51, %v1888_v4  ;;  %v1899_v13 = vadd.f32 %v6569_v29, %v11641_v49  ;;  %6872 = vmatprep.mubr.msk.bf16.mxu0 %vm996_vm3, %v11644_v46  ;;  %v9120_v51 = vld [vmem:[%s11181_s0 + $0xd0] sm:$0xf]  ;;  %v11647_v4 = vld [vmem:[#allocation63_spill] sm:$0xff] }
 0x1c8   :  { %v1890_v48 = vpop.f32.mrf.mxu1  ;;  %v11646_v29 = vld [vmem:[#allocation104_spill] sm:$0xff]  ;;  %v2648_v43 = vpop.f32.mrf.mxu0 }
 0x1c9   :  { %11640 = vst [vmem:[#allocation3_spill] sm:$0xff] %v9104_v42  ;;  %v9122_v16 = vadd.f32 %v6635_v55, %v1899_v13  ;;  %v1891_v58 = vadd.f32 %v1890_v48, %v11646_v29  ;;  %v11650_v42 = vld [vmem:[#allocation105_spill] sm:$0xff]  ;;  %v3543_v55 = vsel %vm7914_vm7, %v3541_v14, %v3542_v33  ;;  %v6042_v48 = vcombine.low %v9115_v17, %v9120_v51 }
 0x1ca   :  { %v6572_v47 = vpop.f32.mrf.mxu1  ;;  %6803 = vmatmul.mubr.msk.bf16.gmra.mxu1 %vm996_vm3, %v11647_v4  ;;  %v6639_v37 = vpop.f32.mrf.mxu0 }
 0x1cb   :  { %11645 = vst [vmem:[#allocation90_spill] sm:$0xff] %v9122_v16  ;;  %v9129_v46 = vadd.f32 %v2635_v8, %v1891_v58  ;;  %v1912_v28 = vadd.f32 %v6572_v47, %v11650_v42  ;;  %6806 = vmatprep.mubr.msk.bf16.mxu1 %vm996_vm3, %v11651_v18  ;;  %v11653_v16 = vld [vmem:[#allocation106_spill] sm:$0xff]  ;;  %v9141_v8 = vcombine.low %v3540_v3, %v3543_v55  ;;  %v11655_v58 = vld [vmem:[#allocation107_spill] sm:$0xff] }
 0x1cc   :  { %v1903_v13 = vpop.f32.mrf.mxu1  ;;  %v2651_v59 = vpop.f32.mrf.mxu0 }
 0x1cd   :  { %11649 = vst [vmem:[#allocation91_spill] sm:$0xff] %v9129_v46  ;;  %v9138_v29 = vadd.f32 %v6638_v57, %v1912_v28  ;;  %v1904_v4 = vadd.f32 %v1903_v13, %v11653_v16  ;;  %v11657_v28 = vld [vmem:[#allocation109_spill] sm:$0xff] }
 0x1ce   :  { %v6573_v44 = vpop.f32.mrf.mxu1  ;;  %v6642_v46 = vpop.f32.mrf.mxu0  ;;  %6873 = vmatmul.mubr.msk.bf16.gmra.mxu0 %vm996_vm3, %v6042_v48 }
 0x1cf   :  { %11652 = vst [vmem:[#allocation71_spill] sm:$0xff] %v9138_v29  ;;  %v9143_v42 = vadd.f32 %v2648_v43, %v1904_v4  ;;  %v1915_v47 = vadd.f32 %v6573_v44, %v11655_v58  ;;  %6876 = vmatprep.mubr.msk.bf16.mxu0 %vm996_vm3, %v8306_v40  ;;  %v11658_v4 = vld [vmem:[#allocation4_spill] sm:$0xff]  ;;  %v11660_v40 = vld [vmem:[#allocation111_spill] sm:$0xff] }
 0x1d0   :  { %v1906_v14 = vpop.f32.mrf.mxu1  ;;  %v2664_v16 = vpop.f32.mrf.mxu0  ;;  %v11659_v44 = vld [vmem:[#allocation72_spill] sm:$0xff] }
 0x1d1   :  { %11654 = vst [vmem:[#allocation54_spill] sm:$0xff] %v9143_v42  ;;  %v9149_v33 = vadd.f32 %v6639_v37, %v1915_v47  ;;  %v1907_v57 = vadd.f32 %v1906_v14, %v11657_v28 }
 0x1d2   :  { %v6576_v13 = vpop.f32.mrf.mxu1  ;;  %6807 = vmatmul.mubr.msk.bf16.gmra.mxu1 %vm996_vm3, %v9141_v8  ;;  %v6643_v55 = vpop.f32.mrf.mxu0 }
 0x1d3   :  { %11656 = vst [vmem:[#allocation93_spill] sm:$0xff] %v9149_v33  ;;  %v9154_v43 = vadd.f32 %v2651_v59, %v1907_v57  ;;  %v1928_v3 = vadd.f32 %v6576_v13, %v11658_v4  ;;  %6810 = vmatprep.mubr.msk.bf16.mxu1 %vm996_vm3, %v11659_v44  ;;  %v11661_v33 = vld [vmem:[#allocation112_spill] sm:$0xff] }
 0x1d4   :  { %v1919_v48 = vpop.f32.mrf.mxu1  ;;  %v2667_v47 = vpop.f32.mrf.mxu0  ;;  %v11662_v59 = vld [vmem:[#allocation76_spill] sm:$0xff] }
 0x1d5   :  { %v9159_v58 = vadd.f32 %v6642_v46, %v1928_v3  ;;  %v1920_v37 = vadd.f32 %v1919_v48, %v11660_v40  ;;  %v11664_v46 = vld [vmem:[#allocation113_spill] sm:$0xff] }
 0x1d6   :  { %v6577_v14 = vpop.f32.mrf.mxu1  ;;  %v6714_v29 = vpop.f32.mrf.mxu0  ;;  %6877 = vmatmul.mubr.msk.bf16.gmra.mxu0 %vm996_vm3, %v11662_v59  ;;  %v11665_v48 = vld [vmem:[#allocation73_spill] sm:$0xff] }
 0x1d7   :  { %v9162_v28 = vadd.f32 %v2664_v16, %v1920_v37  ;;  %v1931_v42 = vadd.f32 %v6577_v14, %v11661_v33  ;;  %6880 = vmatprep.mubr.msk.bf16.mxu0 %vm996_vm3, %v8348_v24  ;;  %v11666_v37 = vld [vmem:[#allocation74_spill] sm:$0xff] }
 0x1d8   :  { %v1922_v57 = vpop.f32.mrf.mxu1  ;;  %v3216_v3 = vpop.f32.mrf.mxu0 }
 0x1d9   :  { %v9169_v13 = vadd.f32 %v6643_v55, %v1931_v42  ;;  %v1923_v4 = vadd.f32 %v1922_v57, %v11664_v46 }
 0x1da   :  { %v6648_v44 = vpop.f32.mrf.mxu1  ;;  %6811 = vmatmul.mubr.msk.bf16.gmra.mxu1 %vm996_vm3, %v11665_v48  ;;  %v6715_v40 = vpop.f32.mrf.mxu0 }
 0x1db   :  { %11663 = vst [vmem:[#allocation94_spill] sm:$0xff] %v9169_v13  ;;  %v9174_v16 = vadd.f32 %v2667_v47, %v1923_v4  ;;  %v3055_v33 = vadd.f32 %v6648_v44, %v8805_v53  ;;  %6814 = vmatprep.mubr.msk.bf16.mxu1 %vm996_vm3, %v11666_v37  ;;  %v11667_v44 = vld [vmem:[#allocation75_spill] sm:$0xff] }
 0x1dc   :  { %v2798_v14 = vpop.f32.mrf.mxu1  ;;  %v3219_v42 = vpop.f32.mrf.mxu0 }
 0x1dd   :  { %v9179_v59 = vadd.f32 %v6714_v29, %v3055_v33  ;;  %v3053_v24 = vadd.f32 %v2798_v14, %v8808_v39  ;;  %v11668_v14 = vld [vmem:[#allocation78_spill] sm:$0xff] }
 0x1de   :  { %v6649_v55 = vpop.f32.mrf.mxu1  ;;  %v6718_v13 = vpop.f32.mrf.mxu0  ;;  %6881 = vmatmul.mubr.msk.bf16.gmra.mxu0 %vm996_vm3, %v8392_v56 }
 0x1df   :  { %v9182_v57 = vadd.f32 %v3216_v3, %v3053_v24  ;;  %v3056_v46 = vadd.f32 %v6649_v55, %v8815_v52  ;;  %6884 = vmatprep.mubr.msk.bf16.mxu0 %vm996_vm3, %v8398_v11 }
 0x1e0   :  { %v2801_v53 = vpop.f32.mrf.mxu1  ;;  %v3232_v4 = vpop.f32.mrf.mxu0 }
 0x1e1   :  { %v9189_v47 = vadd.f32 %v6715_v40, %v3056_v46  ;;  %v3054_v29 = vadd.f32 %v2801_v53, %v8820_v35 }
 0x1e2   :  { %v6652_v39 = vpop.f32.mrf.mxu1  ;;  %6815 = vmatmul.mubr.msk.bf16.gmra.mxu1 %vm996_vm3, %v11667_v44  ;;  %v6719_v33 = vpop.f32.mrf.mxu0 }
 0x1e3   :  { %v9194_v3 = vadd.f32 %v3219_v42, %v3054_v29  ;;  %v3059_v52 = vadd.f32 %v6652_v39, %v8825_v9  ;;  %6818 = vmatprep.mubr.msk.bf16.mxu1 %vm996_vm3, %v11668_v14  ;;  %v11670_v39 = vld [vmem:[#allocation79_spill] sm:$0xff] }
 0x1e4   :  { %v2814_v56 = vpop.f32.mrf.mxu1  ;;  %v3235_v40 = vpop.f32.mrf.mxu0 }
 0x1e5   :  { %v9199_v24 = vadd.f32 %v6718_v13, %v3059_v52  ;;  %v3057_v11 = vadd.f32 %v2814_v56, %v8828_v12  ;;  %v11672_v56 = vld [vmem:[#allocation82_spill] sm:$0xff] }
 0x1e6   :  { %v6653_v35 = vpop.f32.mrf.mxu1  ;;  %v6722_v53 = vpop.f32.mrf.mxu0  ;;  %6885 = vmatmul.mubr.msk.bf16.gmra.mxu0 %vm996_vm3, %v8438_v0 }
 0x1e7   :  { %v9202_v55 = vadd.f32 %v3232_v4, %v3057_v11  ;;  %v3060_v46 = vadd.f32 %v6653_v35, %v8835_v25  ;;  %6888 = vmatprep.mubr.msk.bf16.mxu0 %vm996_vm3, %v8444_v36 }
 0x1e8   :  { %v2817_v9 = vpop.f32.mrf.mxu1  ;;  %v3248_v29 = vpop.f32.mrf.mxu0 }
 0x1e9   :  { %v9209_v42 = vadd.f32 %v6719_v33, %v3060_v46  ;;  %v3058_v13 = vadd.f32 %v2817_v9, %v8840_v26  ;;  %v11675_v46 = vld [vmem:[#allocation114_spill] sm:$0xff] }
 0x1ea   :  { %v6656_v12 = vpop.f32.mrf.mxu1  ;;  %6819 = vmatmul.mubr.msk.bf16.gmra.mxu1 %vm996_vm3, %v11670_v39  ;;  %v6723_v52 = vpop.f32.mrf.mxu0 }
 0x1eb   :  { %11669 = vst [vmem:[#allocation95_spill] sm:$0xff] %v9209_v42  ;;  %v9214_v4 = vadd.f32 %v3235_v40, %v3058_v13  ;;  %v3063_v25 = vadd.f32 %v6656_v12, %v8845_v6  ;;  %6822 = vmatprep.mubr.msk.bf16.mxu1 %vm996_vm3, %v11672_v56  ;;  %v11676_v40 = vld [vmem:[#allocation23_spill] sm:$0xff] }
 0x1ec   :  { %v2830_v0 = vpop.f32.mrf.mxu1  ;;  %v3251_v33 = vpop.f32.mrf.mxu0 }
 0x1ed   :  { %11671 = vst [vmem:[#allocation96_spill] sm:$0xff] %v9214_v4  ;;  %v9219_v11 = vadd.f32 %v6722_v53, %v3063_v25  ;;  %v3061_v36 = vadd.f32 %v2830_v0, %v8848_v61  ;;  %v11678_v53 = vld [vmem:[#allocation115_spill] sm:$0xff] }
 0x1ee   :  { %v6657_v26 = vpop.f32.mrf.mxu1  ;;  %v6726_v42 = vpop.f32.mrf.mxu0  ;;  %6889 = vmatmul.mubr.msk.bf16.gmra.mxu0 %vm996_vm3, %v11676_v40  ;;  %v11679_v0 = vld [vmem:[#allocation83_spill] sm:$0xff] }
 0x1ef   :  { %11673 = vst [vmem:[#allocation55_spill] sm:$0xff] %v9219_v11  ;;  %v9222_v35 = vadd.f32 %v3248_v29, %v3061_v36  ;;  %v3064_v9 = vadd.f32 %v6657_v26, %v11675_v46  ;;  %6892 = vmatprep.mubr.msk.bf16.mxu0 %vm996_vm3, %v8485_v45  ;;  %v11680_v36 = vld [vmem:[#allocation116_spill] sm:$0xff]  ;;  %v11682_v45 = vld [vmem:[#allocation117_spill] sm:$0xff] }
 0x1f0   :  { %v2833_v6 = vpop.f32.mrf.mxu1  ;;  %v3264_v25 = vpop.f32.mrf.mxu0 }
 0x1f1   :  { %11674 = vst [vmem:[#allocation56_spill] sm:$0xff] %v9222_v35  ;;  %v9229_v13 = vadd.f32 %v6723_v52, %v3064_v9  ;;  %v3062_v12 = vadd.f32 %v2833_v6, %v11678_v53  ;;  %v11681_v35 = vld [vmem:[#allocation86_spill] sm:$0xff] }
 0x1f2   :  { %v6660_v61 = vpop.f32.mrf.mxu1  ;;  %6823 = vmatmul.mubr.msk.bf16.gmra.mxu1 %vm996_vm3, %v11679_v0  ;;  %v6727_v46 = vpop.f32.mrf.mxu0 }
 0x1f3   :  { %11677 = vst [vmem:[#allocation97_spill] sm:$0xff] %v9229_v13  ;;  %v9234_v29 = vadd.f32 %v3251_v33, %v3062_v12  ;;  %v3067_v26 = vadd.f32 %v6660_v61, %v11680_v36  ;;  %6826 = vmatprep.mubr.msk.bf16.mxu1 %vm996_vm3, %v11681_v35  ;;  %v11683_v13 = vld [vmem:[#allocation118_spill] sm:$0xff] }
 0x1f4   :  { %v2846_v40 = vpop.f32.mrf.mxu1  ;;  %v3267_v9 = vpop.f32.mrf.mxu0 }
 0x1f5   :  { %v9239_v11 = vadd.f32 %v6726_v42, %v3067_v26  ;;  %v3065_v52 = vadd.f32 %v2846_v40, %v11682_v45  ;;  %v11685_v42 = vld [vmem:[#allocation119_spill] sm:$0xff] }
 0x1f6   :  { %v6661_v6 = vpop.f32.mrf.mxu1  ;;  %v6730_v0 = vpop.f32.mrf.mxu0  ;;  %6893 = vmatmul.mubr.msk.bf16.gmra.mxu0 %vm996_vm3, %v8523_v54  ;;  %v11686_v40 = vld [vmem:[#allocation87_spill] sm:$0xff] }
 0x1f7   :  { %v9242_v53 = vadd.f32 %v3264_v25, %v3065_v52  ;;  %v3068_v4 = vadd.f32 %v6661_v6, %v11683_v13  ;;  %6896 = vmatprep.mubr.msk.bf16.mxu0 %vm996_vm3, %v8531_v5  ;;  %v11687_v52 = vld [vmem:[#allocation34_spill] sm:$0xff] }
 0x1f8   :  { %v2849_v33 = vpop.f32.mrf.mxu1  ;;  %v3280_v36 = vpop.f32.mrf.mxu0 }
 0x1f9   :  { %v9249_v12 = vadd.f32 %v6727_v46, %v3068_v4  ;;  %v3066_v61 = vadd.f32 %v2849_v33, %v11685_v42 }
 0x1fa   :  { %v6664_v26 = vpop.f32.mrf.mxu1  ;;  %6827 = vmatmul.mubr.msk.bf16.gmra.mxu1 %vm996_vm3, %v11686_v40  ;;  %v6731_v45 = vpop.f32.mrf.mxu0 }
 0x1fb   :  { %11684 = vst [vmem:[#allocation98_spill] sm:$0xff] %v9249_v12  ;;  %v9254_v25 = vadd.f32 %v3267_v9, %v3066_v61  ;;  %v3071_v13 = vadd.f32 %v6664_v26, %v8899_v32  ;;  %6830 = vmatprep.mubr.msk.bf16.mxu1 %vm996_vm3, %v11687_v52 }
 0x1fc   :  { %v2862_v54 = vpop.f32.mrf.mxu1  ;;  %v3283_v4 = vpop.f32.mrf.mxu0 }
 0x1fd   :  { %v9259_v6 = vadd.f32 %v6730_v0, %v3071_v13  ;;  %v3069_v5 = vadd.f32 %v2862_v54, %v8907_v1  ;;  %v11689_v0 = vld [vmem:[#allocation121_spill] sm:$0xff]  ;;  %v11690_v13 = vld [vmem:[#allocation88_spill] sm:$0xff] }
 0x1fe   :  { %v6665_v46 = vpop.f32.mrf.mxu1  ;;  %v6734_v12 = vpop.f32.mrf.mxu0  ;;  %6897 = vmatmul.mubr.msk.bf16.gmra.mxu0 %vm996_vm3, %v8562_v38  ;;  %v3546_v38 = vrot.slane %v8876_v23, 5 }
 0x1ff   :  { %v9262_v33 = vadd.f32 %v3280_v36, %v3069_v5  ;;  %v3072_v42 = vadd.f32 %v6665_v46, %v8915_v50  ;;  %6900 = vmatprep.mubr.msk.bf16.mxu0 %vm996_vm3, %v8570_v15  ;;  %v11692_v5 = vld [vmem:[#allocation32_spill] sm:$0xff] }
 0x200   :  { %v2865_v32 = vpop.f32.mrf.mxu1  ;;  %v3296_v26 = vpop.f32.mrf.mxu0 }
 0x201   :  { %v9269_v9 = vadd.f32 %v6731_v45, %v3072_v42  ;;  %v3070_v61 = vadd.f32 %v2865_v32, %v11689_v0  ;;  %v6005_v0 = vrot.slane %v8871_v63, 9  ;;  %v9300_v63 = vld [vmem:[%s11181_s0 + $0x1a8] sm:$0xf] }
 0x202   :  { %v6668_v1 = vpop.f32.mrf.mxu1  ;;  %6831 = vmatmul.mubr.msk.bf16.gmra.mxu1 %vm996_vm3, %v11690_v13  ;;  %v6735_v54 = vpop.f32.mrf.mxu0 }
 0x203   :  { %11688 = vst [vmem:[#allocation100_spill] sm:$0xff] %v9269_v9  ;;  %v9274_v36 = vadd.f32 %v3283_v4, %v3070_v61  ;;  %v3075_v50 = vadd.f32 %v6668_v1, %v8925_v27  ;;  %6834 = vmatprep.mubr.msk.bf16.mxu1 %vm996_vm3, %v11692_v5  ;;  %v3548_v61 = vrot.slane %v3546_v38, 4  ;;  %v11693_v1 = vld [vmem:[#allocation120_spill] sm:$0xff] }
 0x204   :  { %v2878_v15 = vpop.f32.mrf.mxu1  ;;  %v3299_v42 = vpop.f32.mrf.mxu0  ;;  %v3549_v23 = vrot.slane %v11693_v1, 5  ;;  %v11697_v1 = vld [vmem:[#allocation40_spill] sm:$0xff] }
 0x205   :  { %11691 = vst [vmem:[#allocation101_spill] sm:$0xff] %v9274_v36  ;;  %v9280_v45 = vadd.f32 %v6734_v12, %v3075_v50  ;;  %v3073_v46 = vadd.f32 %v2878_v15, %v8928_v20  ;;  %v9295_v20 = vld [vmem:[%s11181_s0 + $0x1a4] sm:$0xf]  ;;  %v11695_v50 = vld [vmem:[#allocation35_spill] sm:$0xff] }
 0x206   :  { %v6669_v32 = vpop.f32.mrf.mxu1  ;;  %v6738_v27 = vpop.f32.mrf.mxu0  ;;  %6901 = vmatmul.mubr.msk.bf16.gmra.mxu0 %vm996_vm3, %v8592_v41 }
 0x207   :  { %v9284_v9 = vadd.f32 %v3296_v26, %v3073_v46  ;;  %v3076_v4 = vadd.f32 %v6669_v32, %v8939_v21  ;;  %6904 = vmatprep.mubr.msk.bf16.mxu0 %vm996_vm3, %v8956_v30  ;;  %v3547_v30 = vsel %vm7914_vm7, %v6005_v0, %v3546_v38 }
 0x208   :  { %v2881_v36 = vpop.f32.mrf.mxu1  ;;  %v3312_v12 = vpop.f32.mrf.mxu0 }
 0x209   :  { %v9302_v21 = vadd.f32 %v6735_v54, %v3076_v4  ;;  %v3074_v41 = vadd.f32 %v2881_v36, %v8944_v60  ;;  %v3550_v54 = vsel %vm7914_vm7, %v3548_v61, %v3549_v23  ;;  %v6043_v60 = vcombine.low %v9295_v20, %v9300_v63 }
 0x20a   :  { %v6672_v26 = vpop.f32.mrf.mxu1  ;;  %6835 = vmatmul.mubr.msk.bf16.gmra.mxu1 %vm996_vm3, %v11695_v50  ;;  %v6739_v32 = vpop.f32.mrf.mxu0  ;;  %v9321_v0 = vcombine.low %v3547_v30, %v3550_v54  ;;  %v11702_v30 = vld [vmem:[#allocation5_spill] sm:$0xff] }
 0x20b   :  { %11694 = vst [vmem:[#allocation99_spill] sm:$0xff] %v9302_v21  ;;  %v9309_v15 = vadd.f32 %v3299_v42, %v3074_v41  ;;  %v3079_v46 = vadd.f32 %v6672_v26, %v8951_v10  ;;  %6838 = vmatprep.mubr.msk.bf16.mxu1 %vm996_vm3, %v11697_v1 }
 0x20c   :  { %v2894_v36 = vpop.f32.mrf.mxu1  ;;  %v3315_v38 = vpop.f32.mrf.mxu0 }
 0x20d   :  { %11696 = vst [vmem:[#allocation102_spill] sm:$0xff] %v9309_v15  ;;  %v9318_v4 = vadd.f32 %v6738_v27, %v3079_v46  ;;  %v3077_v21 = vadd.f32 %v2894_v36, %v8958_v22  ;;  %v11766_v15 = vld [vmem:[#allocation63_spill] sm:$0xff] }
 0x20e   :  { %v6673_v42 = vpop.f32.mrf.mxu1  ;;  %v6742_v26 = vpop.f32.mrf.mxu0  ;;  %6905 = vmatmul.mubr.msk.bf16.gmra.mxu0 %vm996_vm3, %v6043_v60 }
 0x20f   :  { %11698 = vst [vmem:[#allocation58_spill] sm:$0xff] %v9318_v4  ;;  %v9323_v10 = vadd.f32 %v3312_v12, %v3077_v21  ;;  %v3080_v41 = vadd.f32 %v6673_v42, %v8965_v62  ;;  %6976 = vmatprep.mubr.msk.bf16.mxu0 %vm996_vm3, %v11572_v7 }
 0x210   :  { %v2897_v61 = vpop.f32.mrf.mxu1  ;;  %v3328_v22 = vpop.f32.mrf.mxu0 }
 0x211   :  { %11699 = vst [vmem:[#allocation103_spill] sm:$0xff] %v9323_v10  ;;  %v9329_v23 = vadd.f32 %v6739_v32, %v3080_v41  ;;  %v3078_v27 = vadd.f32 %v2897_v61, %v8970_v34  ;;  %v11706_v61 = vld [vmem:[#allocation47_spill] sm:$0xff] }
 0x212   :  { %v6676_v46 = vpop.f32.mrf.mxu1  ;;  %6839 = vmatmul.mubr.msk.bf16.gmra.mxu1 %vm996_vm3, %v9321_v0  ;;  %v6743_v12 = vpop.f32.mrf.mxu0 }
 0x213   :  { %11700 = vst [vmem:[#allocation110_spill] sm:$0xff] %v9329_v23  ;;  %v9334_v21 = vadd.f32 %v3315_v38, %v3078_v27  ;;  %v3083_v62 = vadd.f32 %v6676_v46, %v8975_v31  ;;  %6910 = vmatprep.mubr.msk.bf16.mxu1 %vm996_vm3, %v11702_v30  ;;  %v11705_v38 = vld [vmem:[#allocation46_spill] sm:$0xff]  ;;  %v11709_v30 = vld [vmem:[#allocation7_spill] sm:$0xff] }
 0x214   :  { %v2910_v54 = vpop.f32.mrf.mxu1  ;;  %v3331_v32 = vpop.f32.mrf.mxu0 }
 0x215   :  { %11701 = vst [vmem:[#allocation104_spill] sm:$0xff] %v9334_v21  ;;  %v9339_v60 = vadd.f32 %v6742_v26, %v3083_v62  ;;  %v3081_v7 = vadd.f32 %v2910_v54, %v8980_v19  ;;  %v11708_v26 = vld [vmem:[#allocation48_spill] sm:$0xff] }
 0x216   :  { %v6677_v34 = vpop.f32.mrf.mxu1  ;;  %v6746_v41 = vpop.f32.mrf.mxu0  ;;  %6977 = vmatmul.mubr.msk.bf16.vlgmr.msra.gmra.mxu0 %vm996_vm3, %v11705_v38 }
 0x217   :  { %11703 = vst [vmem:[#allocation42_spill] sm:$0xff] %v9339_v60  ;;  %v9342_v36 = vadd.f32 %v3328_v22, %v3081_v7  ;;  %v3084_v42 = vadd.f32 %v6677_v34, %v8989_v2  ;;  %6980 = vmatprep.mubr.msk.bf16.mxu0 %vm996_vm3, %v11706_v61  ;;  %v11711_v2 = vld [vmem:[#allocation92_spill] sm:$0xff]  ;;  %v11712_v34 = vld [vmem:[#allocation9_spill] sm:$0xff] }
 0x218   :  { %v2913_v31 = vpop.f32.mrf.mxu1  ;;  %v3344_v62 = vpop.f32.mrf.mxu0 }
 0x219   :  { %11704 = vst [vmem:[#allocation105_spill] sm:$0xff] %v9342_v36  ;;  %v9349_v27 = vadd.f32 %v6743_v12, %v3084_v42  ;;  %v3082_v46 = vadd.f32 %v2913_v31, %v11708_v26  ;;  %v11714_v12 = vld [vmem:[#allocation49_spill] sm:$0xff] }
 0x21a   :  { %v6680_v19 = vpop.f32.mrf.mxu1  ;;  %6911 = vmatmul.mubr.msk.bf16.vlgmr.msra.gmra.mxu1 %vm996_vm3, %v11709_v30  ;;  %v6747_v7 = vpop.f32.mrf.mxu0 }
 0x21b   :  { %11707 = vst [vmem:[#allocation65_spill] sm:$0xff] %v9349_v27  ;;  %v9354_v22 = vadd.f32 %v3331_v32, %v3082_v46  ;;  %v3087_v54 = vadd.f32 %v6680_v19, %v11711_v2  ;;  %6914 = vmatprep.mubr.msk.bf16.mxu1 %vm996_vm3, %v11712_v34  ;;  %v11716_v27 = vld [vmem:[#allocation45_spill] sm:$0xff]  ;;  %v11717_v32 = vld [vmem:[#allocation51_spill] sm:$0xff] }
 0x21c   :  { %v2926_v38 = vpop.f32.mrf.mxu1  ;;  %v3347_v61 = vpop.f32.mrf.mxu0  ;;  %v11718_v19 = vld [vmem:[#allocation53_spill] sm:$0xff] }
 0x21d   :  { %11710 = vst [vmem:[#allocation106_spill] sm:$0xff] %v9354_v22  ;;  %v9359_v36 = vadd.f32 %v6746_v41, %v3087_v54  ;;  %v3085_v42 = vadd.f32 %v2926_v38, %v11714_v12  ;;  %v11720_v41 = vld [vmem:[#allocation77_spill] sm:$0xff]  ;;  %v11721_v12 = vld [vmem:[#allocation11_spill] sm:$0xff] }
 0x21e   :  { %v6681_v31 = vpop.f32.mrf.mxu1  ;;  %v6750_v30 = vpop.f32.mrf.mxu0  ;;  %6981 = vmatmul.mubr.msk.bf16.gmra.mxu0 %vm996_vm3, %v11717_v32 }
 0x21f   :  { %11713 = vst [vmem:[#allocation107_spill] sm:$0xff] %v9359_v36  ;;  %v9362_v26 = vadd.f32 %v3344_v62, %v3085_v42  ;;  %v3088_v60 = vadd.f32 %v6681_v31, %v11716_v27  ;;  %6984 = vmatprep.mubr.msk.bf16.mxu0 %vm996_vm3, %v11718_v19  ;;  %v11723_v27 = vld [vmem:[#allocation80_spill] sm:$0xff] }
 0x220   :  { %v2929_v46 = vpop.f32.mrf.mxu1  ;;  %v3360_v34 = vpop.f32.mrf.mxu0 }
 0x221   :  { %11715 = vst [vmem:[#allocation109_spill] sm:$0xff] %v9362_v26  ;;  %v9369_v2 = vadd.f32 %v6747_v7, %v3088_v60  ;;  %v3086_v54 = vadd.f32 %v2929_v46, %v11720_v41  ;;  %v11724_v26 = vld [vmem:[#allocation13_spill] sm:$0xff] }
 0x222   :  { %v6684_v38 = vpop.f32.mrf.mxu1  ;;  %6915 = vmatmul.mubr.msk.bf16.gmra.mxu1 %vm996_vm3, %v11721_v12  ;;  %v6751_v31 = vpop.f32.mrf.mxu0  ;;  %v11726_v60 = vld [vmem:[#allocation81_spill] sm:$0xff] }
 0x223   :  { %11719 = vst [vmem:[#allocation4_spill] sm:$0xff] %v9369_v2  ;;  %v9374_v62 = vadd.f32 %v3347_v61, %v3086_v54  ;;  %v3091_v42 = vadd.f32 %v6684_v38, %v11723_v27  ;;  %6918 = vmatprep.mubr.msk.bf16.mxu1 %vm996_vm3, %v11724_v26  ;;  %v11728_v2 = vld [vmem:[#allocation50_spill] sm:$0xff]  ;;  %v11729_v61 = vld [vmem:[#allocation59_spill] sm:$0xff]  ;;  %v11730_v38 = vld [vmem:[#allocation61_spill] sm:$0xff] }
 0x224   :  { %v2942_v32 = vpop.f32.mrf.mxu1  ;;  %v3363_v19 = vpop.f32.mrf.mxu0 }
 0x225   :  { %11722 = vst [vmem:[#allocation72_spill] sm:$0xff] %v9374_v62  ;;  %v9379_v36 = vadd.f32 %v6750_v30, %v3091_v42  ;;  %v3089_v7 = vadd.f32 %v2942_v32, %v11726_v60  ;;  %v11732_v30 = vld [vmem:[#allocation52_spill] sm:$0xff]  ;;  %v11733_v60 = vld [vmem:[#allocation15_spill] sm:$0xff] }
 0x226   :  { %v6685_v46 = vpop.f32.mrf.mxu1  ;;  %v6754_v12 = vpop.f32.mrf.mxu0  ;;  %6985 = vmatmul.mubr.msk.bf16.gmra.mxu0 %vm996_vm3, %v11729_v61 }
 0x227   :  { %11725 = vst [vmem:[#allocation111_spill] sm:$0xff] %v9379_v36  ;;  %v9382_v41 = vadd.f32 %v3360_v34, %v3089_v7  ;;  %v3092_v22 = vadd.f32 %v6685_v46, %v11728_v2  ;;  %6988 = vmatprep.mubr.msk.bf16.mxu0 %vm996_vm3, %v11730_v38  ;;  %v11735_v2 = vld [vmem:[#allocation84_spill] sm:$0xff] }
 0x228   :  { %v2945_v54 = vpop.f32.mrf.mxu1  ;;  %v3376_v42 = vpop.f32.mrf.mxu0 }
 0x229   :  { %11727 = vst [vmem:[#allocation112_spill] sm:$0xff] %v9382_v41  ;;  %v9389_v26 = vadd.f32 %v6751_v31, %v3092_v22  ;;  %v3090_v27 = vadd.f32 %v2945_v54, %v11732_v30  ;;  %v11736_v41 = vld [vmem:[#allocation17_spill] sm:$0xff] }
 0x22a   :  { %v6688_v32 = vpop.f32.mrf.mxu1  ;;  %6919 = vmatmul.mubr.msk.bf16.gmra.mxu1 %vm996_vm3, %v11733_v60  ;;  %v6755_v46 = vpop.f32.mrf.mxu0  ;;  %v11738_v22 = vld [vmem:[#allocation85_spill] sm:$0xff] }
 0x22b   :  { %11731 = vst [vmem:[#allocation76_spill] sm:$0xff] %v9389_v26  ;;  %v9394_v34 = vadd.f32 %v3363_v19, %v3090_v27  ;;  %v3095_v7 = vadd.f32 %v6688_v32, %v11735_v2  ;;  %6922 = vmatprep.mubr.msk.bf16.mxu1 %vm996_vm3, %v11736_v41  ;;  %v11740_v26 = vld [vmem:[#allocation25_spill] sm:$0xff]  ;;  %v11741_v19 = vld [vmem:[#allocation66_spill] sm:$0xff]  ;;  %v11742_v32 = vld [vmem:[#allocation67_spill] sm:$0xff] }
 0x22c   :  { %v2958_v61 = vpop.f32.mrf.mxu1  ;;  %v3379_v38 = vpop.f32.mrf.mxu0 }
 0x22d   :  { %11734 = vst [vmem:[#allocation113_spill] sm:$0xff] %v9394_v34  ;;  %v9399_v36 = vadd.f32 %v6754_v12, %v3095_v7  ;;  %v3093_v31 = vadd.f32 %v2958_v61, %v11738_v22  ;;  %v11744_v12 = vld [vmem:[#allocation29_spill] sm:$0xff]  ;;  %v11745_v22 = vld [vmem:[#allocation19_spill] sm:$0xff] }
 0x22e   :  { %v6689_v54 = vpop.f32.mrf.mxu1  ;;  %v6758_v60 = vpop.f32.mrf.mxu0  ;;  %6989 = vmatmul.mubr.msk.bf16.gmra.mxu0 %vm996_vm3, %v11741_v19 }
 0x22f   :  { %11737 = vst [vmem:[#allocation73_spill] sm:$0xff] %v9399_v36  ;;  %v9402_v30 = vadd.f32 %v3376_v42, %v3093_v31  ;;  %v3096_v62 = vadd.f32 %v6689_v54, %v11740_v26  ;;  %6992 = vmatprep.mubr.msk.bf16.mxu0 %vm996_vm3, %v11742_v32  ;;  %v11747_v26 = vld [vmem:[#allocation62_spill] sm:$0xff] }
 0x230   :  { %v2961_v27 = vpop.f32.mrf.mxu1  ;;  %v3392_v7 = vpop.f32.mrf.mxu0 }
 0x231   :  { %11739 = vst [vmem:[#allocation74_spill] sm:$0xff] %v9402_v30  ;;  %v9409_v41 = vadd.f32 %v6755_v46, %v3096_v62  ;;  %v3094_v2 = vadd.f32 %v2961_v27, %v11744_v12  ;;  %v11748_v30 = vld [vmem:[#allocation21_spill] sm:$0xff]  ;;  %v11750_v62 = vld [vmem:[#allocation64_spill] sm:$0xff] }
 0x232   :  { %v6692_v61 = vpop.f32.mrf.mxu1  ;;  %6923 = vmatmul.mubr.msk.bf16.gmra.mxu1 %vm996_vm3, %v11745_v22  ;;  %v6759_v54 = vpop.f32.mrf.mxu0 }
 0x233   :  { %11743 = vst [vmem:[#allocation75_spill] sm:$0xff] %v9409_v41  ;;  %v9414_v42 = vadd.f32 %v3379_v38, %v3094_v2  ;;  %v3099_v31 = vadd.f32 %v6692_v61, %v11747_v26  ;;  %6926 = vmatprep.mubr.msk.bf16.mxu1 %vm996_vm3, %v11748_v30  ;;  %v11752_v41 = vld [vmem:[#allocation27_spill] sm:$0xff]  ;;  %v11753_v38 = vld [vmem:[#allocation70_spill] sm:$0xff]  ;;  %v11754_v61 = vld [vmem:[#allocation57_spill] sm:$0xff] }
 0x234   :  { %v2974_v19 = vpop.f32.mrf.mxu1  ;;  %v3395_v32 = vpop.f32.mrf.mxu0 }
 0x235   :  { %11746 = vst [vmem:[#allocation78_spill] sm:$0xff] %v9414_v42  ;;  %v9419_v36 = vadd.f32 %v6758_v60, %v3099_v31  ;;  %v3097_v46 = vadd.f32 %v2974_v19, %v11750_v62  ;;  %v11756_v60 = vld [vmem:[#allocation30_spill] sm:$0xff]  ;;  %v4296_v19 = vshrl.u32 %v9115_v17, 16 }
 0x236   :  { %v6693_v27 = vpop.f32.mrf.mxu1  ;;  %v6762_v22 = vpop.f32.mrf.mxu0  ;;  %6993 = vmatmul.mubr.msk.bf16.gmra.mxu0 %vm996_vm3, %v11753_v38  ;;  %v11759_v38 = vld [vmem:[#allocation38_spill] sm:$0xff] }
 0x237   :  { %11749 = vst [vmem:[#allocation79_spill] sm:$0xff] %v9419_v36  ;;  %v9422_v12 = vadd.f32 %v3392_v7, %v3097_v46  ;;  %v3100_v34 = vadd.f32 %v6693_v27, %v11752_v41  ;;  %6996 = vmatprep.mubr.msk.bf16.mxu0 %vm996_vm3, %v11754_v61  ;;  %v4299_v7 = vshll.u32 %v9115_v17, 16  ;;  %v11757_v46 = vld [vmem:[#allocation24_spill] sm:$0xff]  ;;  %v4309_v41 = vshrl.u32 %v9120_v51, 16 }
 0x238   :  { %v2977_v2 = vpop.f32.mrf.mxu1  ;;  %v3408_v31 = vpop.f32.mrf.mxu0 }
 0x239   :  { %11751 = vst [vmem:[#allocation82_spill] sm:$0xff] %v9422_v12  ;;  %v9429_v30 = vadd.f32 %v6759_v54, %v3100_v34  ;;  %v3098_v26 = vadd.f32 %v2977_v2, %v11756_v60  ;;  %v11760_v34 = vld [vmem:[#allocation28_spill] sm:$0xff]  ;;  %v4305_v54 = vshll.u32 %v9120_v51, 16  ;;  %v4301_v23 = vrot.slane %v4299_v7, 5  ;;  %v11769_v7 = vld [vmem:[#allocation33_spill] sm:$0xff] }
 0x23a   :  { %v6696_v62 = vpop.f32.mrf.mxu1  ;;  %6927 = vmatmul.mubr.msk.bf16.gmra.mxu1 %vm996_vm3, %v11757_v46  ;;  %v6763_v61 = vpop.f32.mrf.mxu0  ;;  %v4298_v46 = vrot.slane %v4296_v19, 4 }
 0x23b   :  { %11755 = vst [vmem:[#allocation114_spill] sm:$0xff] %v9429_v30  ;;  %v9437_v27 = vadd.f32 %v3395_v32, %v3098_v26  ;;  %v3103_v12 = vadd.f32 %v6696_v62, %v11759_v38  ;;  %6930 = vmatprep.mubr.msk.bf16.mxu1 %vm996_vm3, %v11760_v34  ;;  %v11762_v30 = vld [vmem:[#allocation37_spill] sm:$0xff]  ;;  %v11764_v32 = vld [vmem:[#allocation68_spill] sm:$0xff]  ;;  %v4307_v34 = vrot.slane %v4305_v54, 5 }
 0x23c   :  { %v2990_v2 = vpop.f32.mrf.mxu1  ;;  %v3411_v42 = vpop.f32.mrf.mxu0  ;;  %v11765_v38 = vld [vmem:[#allocation60_spill] sm:$0xff] }
 0x23d   :  { %11758 = vst [vmem:[#allocation23_spill] sm:$0xff] %v9437_v27  ;;  %v9443_v60 = vadd.f32 %v6762_v22, %v3103_v12  ;;  %v3101_v36 = vadd.f32 %v2990_v2, %v11762_v30  ;;  %v4311_v27 = vrot.slane %v4309_v41, 4  ;;  %v71_v12 = vld [vmem:[%s11181_s0 + $0xd4] sm:$0x1]  ;;  %v4717_v22 = vrot.slane %v9120_v51, 5  ;;  %v11768_v30 = vld [vmem:[#allocation69_spill] sm:$0xff] }
 0x23e   :  { %v6697_v21 = vpop.f32.mrf.mxu1  ;;  %v6766_v62 = vpop.f32.mrf.mxu0  ;;  %6997 = vmatmul.mubr.msk.bf16.gmra.mxu0 %vm996_vm3, %v11765_v38  ;;  %v4302_v41 = vor.u32 %v4301_v23, %v4298_v46  ;;  %v11771_v2 = vld [vmem:[#allocation89_spill] sm:$0xff]  ;;  %v11772_v38 = vld [vmem:[#allocation39_spill] sm:$0xff]  ;;  %v4315_v51 = vshll.u32 %v71_v12, 16 }
 0x23f   :  { %11761 = vst [vmem:[#allocation115_spill] sm:$0xff] %v9443_v60  ;;  %v9446_v10 = vadd.f32 %v3408_v31, %v3101_v36  ;;  %v3104_v26 = vadd.f32 %v6697_v21, %v11764_v32  ;;  %7000 = vmatprep.mubr.msk.bf16.mxu0 %vm996_vm3, %v11766_v15  ;;  %v11773_v60 = vld [vmem:[#allocation3_spill] sm:$0xff] }
 0x240   :  { %v2993_v4 = vpop.f32.mrf.mxu1  ;;  %v3424_v31 = vpop.f32.mrf.mxu0  ;;  %v4303_v46 = vrot.slane %v4302_v41, 4 }
 0x241   :  { %11763 = vst [vmem:[#allocation116_spill] sm:$0xff] %v9446_v10  ;;  %v9457_v36 = vadd.f32 %v6763_v61, %v3104_v26  ;;  %v3102_v21 = vadd.f32 %v2993_v4, %v11768_v30  ;;  %v4312_v10 = vor.u32 %v4311_v27, %v4307_v34  ;;  %v6111_v26 = vrot.slane %v9115_v17, 9 }
 0x242   :  { %v6700_v19 = vpop.f32.mrf.mxu1  ;;  %6931 = vmatmul.mubr.msk.bf16.gmra.mxu1 %vm996_vm3, %v11769_v7  ;;  %v6767_v32 = vpop.f32.mrf.mxu0  ;;  %v4719_v4 = vrot.slane %v4717_v22, 4  ;;  %v4720_v30 = vrot.slane %v71_v12, 5 }
 0x243   :  { %11767 = vst [vmem:[#allocation86_spill] sm:$0xff] %v9457_v36  ;;  %v9462_v54 = vadd.f32 %v3411_v42, %v3102_v21  ;;  %v3107_v15 = vadd.f32 %v6700_v19, %v11771_v2  ;;  %6934 = vmatprep.mubr.msk.bf16.mxu1 %vm996_vm3, %v11772_v38  ;;  %v11774_v19 = vld [vmem:[#allocation90_spill] sm:$0xff]  ;;  %v4313_v27 = vrot.slane %v4312_v10, 4  ;;  %v4317_v38 = vrot.slane %v4315_v51, 5 }
 0x244   :  { %v3006_v61 = vpop.f32.mrf.mxu1  ;;  %v3427_v23 = vpop.f32.mrf.mxu0  ;;  %v4308_v10 = vsel %vm7202_vm4, %v4303_v46, %v4307_v34  ;;  %v11781_v46 = vld [vmem:[#allocation93_spill] sm:$0xff] }
 0x245   :  { %11770 = vst [vmem:[#allocation117_spill] sm:$0xff] %v9462_v54  ;;  %v9468_v36 = vadd.f32 %v6766_v62, %v3107_v15  ;;  %v3105_v7 = vadd.f32 %v3006_v61, %v11773_v60  ;;  %v4718_v60 = vsel %vm7914_vm7, %v6111_v26, %v4717_v22  ;;  %v4721_v62 = vsel %vm7914_vm7, %v4719_v4, %v4720_v30  ;;  %v11779_v26 = vld [vmem:[#allocation108_spill] sm:$0xff] }
 0x246   :  { %v6701_v42 = vpop.f32.mrf.mxu1  ;;  %v6770_v54 = vpop.f32.mrf.mxu0  ;;  %7001 = vmatmul.mubr.msk.bf16.gmra.mxu0 %vm996_vm3, %v11651_v18  ;;  %v6114_v4 = vcombine.low %v4718_v60, %v4721_v62  ;;  %v11812_v18 = vld [vmem:[#allocation104_spill] sm:$0xff] }
 0x247   :  { %v9471_v21 = vadd.f32 %v3424_v31, %v3105_v7  ;;  %v3108_v2 = vadd.f32 %v6701_v42, %v11774_v19  ;;  %7004 = vmatprep.mubr.msk.bf16.mxu0 %vm996_vm3, %v9141_v8  ;;  %v11775_v31 = vld [vmem:[#allocation91_spill] sm:$0xff] }
 0x248   :  { %v3009_v17 = vpop.f32.mrf.mxu1  ;;  %v3440_v15 = vpop.f32.mrf.mxu0  ;;  %v11776_v7 = vld [vmem:[#allocation43_spill] sm:$0xff] }
 0x249   :  { %v9482_v12 = vadd.f32 %v6767_v32, %v3108_v2  ;;  %v3106_v41 = vadd.f32 %v3009_v17, %v11775_v31  ;;  %v11778_v8 = vld [vmem:[#allocation71_spill] sm:$0xff]  ;;  %v4318_v32 = vsel %vm7202_vm4, %v4313_v27, %v4317_v38  ;;  %v11780_v2 = vld [vmem:[#allocation54_spill] sm:$0xff] }
 0x24a   :  { %v6704_v61 = vpop.f32.mrf.mxu1  ;;  %6935 = vmatmul.mubr.msk.bf16.gmra.mxu1 %vm996_vm3, %v11776_v7  ;;  %v6771_v22 = vpop.f32.mrf.mxu0  ;;  %v6077_v34 = vcombine.low %v4308_v10, %v4318_v32 }
 0x24b   :  { %v9489_v51 = vadd.f32 %v3427_v23, %v3106_v41  ;;  %v3111_v42 = vadd.f32 %v6704_v61, %v11778_v8  ;;  %6938 = vmatprep.mubr.msk.bf16.mxu1 %vm996_vm3, %v11779_v26 }
 0x24c   :  { %v3022_v30 = vpop.f32.mrf.mxu1  ;;  %v3443_v31 = vpop.f32.mrf.mxu0 }
 0x24d   :  { %v9496_v19 = vadd.f32 %v6770_v54, %v3111_v42  ;;  %v3109_v17 = vadd.f32 %v3022_v30, %v11780_v2  ;;  %v11782_v42 = vld [vmem:[#allocation6_spill] sm:$0xff] }
 0x24e   :  { %v6705_v7 = vpop.f32.mrf.mxu1  ;;  %v6774_v61 = vpop.f32.mrf.mxu0  ;;  %7005 = vmatmul.mubr.msk.bf16.gmra.mxu0 %vm996_vm3, %v6114_v4  ;;  %v11783_v30 = vld [vmem:[#allocation94_spill] sm:$0xff] }
 0x24f   :  { %v9499_v23 = vadd.f32 %v3440_v15, %v3109_v17  ;;  %v3112_v41 = vadd.f32 %v6705_v7, %v11781_v46  ;;  %7008 = vmatprep.mubr.msk.bf16.mxu0 %vm996_vm3, %v11665_v48  ;;  %v11784_v46 = vld [vmem:[#allocation8_spill] sm:$0xff] }
 0x250   :  { %v3025_v8 = vpop.f32.mrf.mxu1  ;;  %v3456_v38 = vpop.f32.mrf.mxu0 }
 0x251   :  { %v9505_v27 = vadd.f32 %v6771_v22, %v3112_v41  ;;  %v3110_v54 = vadd.f32 %v3025_v8, %v9154_v43 }
 0x252   :  { %v6708_v60 = vpop.f32.mrf.mxu1  ;;  %6939 = vmatmul.mubr.msk.bf16.gmra.mxu1 %vm996_vm3, %v6077_v34  ;;  %v6775_v10 = vpop.f32.mrf.mxu0 }
 0x253   :  { %v9509_v62 = vadd.f32 %v3443_v31, %v3110_v54  ;;  %v3115_v15 = vadd.f32 %v6708_v60, %v9159_v58  ;;  %6942 = vmatprep.mubr.msk.bf16.mxu1 %vm996_vm3, %v11782_v42  ;;  %v11785_v54 = vld [vmem:[#allocation10_spill] sm:$0xff] }
 0x254   :  { %v3038_v26 = vpop.f32.mrf.mxu1  ;;  %v3459_v22 = vpop.f32.mrf.mxu0 }
 0x255   :  { %v9514_v32 = vadd.f32 %v6774_v61, %v3115_v15  ;;  %v3113_v48 = vadd.f32 %v3038_v26, %v9162_v28 }
 0x256   :  { %v6709_v4 = vpop.f32.mrf.mxu1  ;;  %v6846_v17 = vpop.f32.mrf.mxu0  ;;  %7009 = vmatmul.mubr.msk.bf16.gmra.mxu0 %vm996_vm3, %v11666_v37 }
 0x257   :  { %v9517_v43 = vadd.f32 %v3456_v38, %v3113_v48  ;;  %v3116_v2 = vadd.f32 %v6709_v4, %v11783_v30  ;;  %7012 = vmatprep.mubr.msk.bf16.mxu0 %vm996_vm3, %v11667_v44  ;;  %v11786_v4 = vld [vmem:[#allocation12_spill] sm:$0xff] }
 0x258   :  { %v3041_v58 = vpop.f32.mrf.mxu1  ;;  %v3976_v34 = vpop.f32.mrf.mxu0 }
 0x259   :  { %v9524_v31 = vadd.f32 %v6775_v10, %v3116_v2  ;;  %v3114_v7 = vadd.f32 %v3041_v58, %v9174_v16 }
 0x25a   :  { %v6780_v28 = vpop.f32.mrf.mxu1  ;;  %6943 = vmatmul.mubr.msk.bf16.gmra.mxu1 %vm996_vm3, %v11784_v46  ;;  %v6847_v8 = vpop.f32.mrf.mxu0 }
 0x25b   :  { %v9529_v41 = vadd.f32 %v3459_v22, %v3114_v7  ;;  %v3859_v61 = vadd.f32 %v6780_v28, %v9179_v59  ;;  %6946 = vmatprep.mubr.msk.bf16.mxu1 %vm996_vm3, %v11785_v54  ;;  %v11788_v28 = vld [vmem:[#allocation95_spill] sm:$0xff] }
 0x25c   :  { %v3602_v37 = vpop.f32.mrf.mxu1  ;;  %v3979_v60 = vpop.f32.mrf.mxu0 }
 0x25d   :  { %v9534_v38 = vadd.f32 %v6846_v17, %v3859_v61  ;;  %v3857_v44 = vadd.f32 %v3602_v37, %v9182_v57  ;;  %v11787_v17 = vld [vmem:[#allocation14_spill] sm:$0xff]  ;;  %v11790_v37 = vld [vmem:[#allocation96_spill] sm:$0xff] }
 0x25e   :  { %v6781_v16 = vpop.f32.mrf.mxu1  ;;  %v6850_v42 = vpop.f32.mrf.mxu0  ;;  %7013 = vmatmul.mubr.msk.bf16.gmra.mxu0 %vm996_vm3, %v11668_v14 }
 0x25f   :  { %v9537_v15 = vadd.f32 %v3976_v34, %v3857_v44  ;;  %v3860_v10 = vadd.f32 %v6781_v16, %v9189_v47  ;;  %7016 = vmatprep.mubr.msk.bf16.mxu0 %vm996_vm3, %v11670_v39  ;;  %v11791_v16 = vld [vmem:[#allocation16_spill] sm:$0xff] }
 0x260   :  { %v3605_v59 = vpop.f32.mrf.mxu1  ;;  %v3992_v22 = vpop.f32.mrf.mxu0 }
 0x261   :  { %v9544_v26 = vadd.f32 %v6847_v8, %v3860_v10  ;;  %v3858_v48 = vadd.f32 %v3605_v59, %v9194_v3  ;;  %v11789_v8 = vld [vmem:[#allocation83_spill] sm:$0xff] }
 0x262   :  { %v6784_v57 = vpop.f32.mrf.mxu1  ;;  %6947 = vmatmul.mubr.msk.bf16.gmra.mxu1 %vm996_vm3, %v11786_v4  ;;  %v6851_v2 = vpop.f32.mrf.mxu0  ;;  %v11794_v4 = vld [vmem:[#allocation56_spill] sm:$0xff] }
 0x263   :  { %v9549_v30 = vadd.f32 %v3979_v60, %v3858_v48  ;;  %v3863_v47 = vadd.f32 %v6784_v57, %v9199_v24  ;;  %6950 = vmatprep.mubr.msk.bf16.mxu1 %vm996_vm3, %v11787_v17 }
 0x264   :  { %v3618_v14 = vpop.f32.mrf.mxu1  ;;  %v3995_v7 = vpop.f32.mrf.mxu0 }
 0x265   :  { %v9554_v58 = vadd.f32 %v6850_v42, %v3863_v47  ;;  %v3861_v39 = vadd.f32 %v3618_v14, %v9202_v55  ;;  %v11792_v42 = vld [vmem:[#allocation55_spill] sm:$0xff] }
 0x266   :  { %v6785_v3 = vpop.f32.mrf.mxu1  ;;  %v6854_v61 = vpop.f32.mrf.mxu0  ;;  %7017 = vmatmul.mubr.msk.bf16.gmra.mxu0 %vm996_vm3, %v11672_v56 }
 0x267   :  { %v9557_v34 = vadd.f32 %v3992_v22, %v3861_v39  ;;  %v3864_v46 = vadd.f32 %v6785_v3, %v11788_v28  ;;  %7020 = vmatprep.mubr.msk.bf16.mxu0 %vm996_vm3, %v11789_v8  ;;  %v11793_v22 = vld [vmem:[#allocation18_spill] sm:$0xff]  ;;  %v11795_v39 = vld [vmem:[#allocation97_spill] sm:$0xff] }
 0x268   :  { %v3621_v24 = vpop.f32.mrf.mxu1  ;;  %v4008_v60 = vpop.f32.mrf.mxu0 }
 0x269   :  { %v9564_v54 = vadd.f32 %v6851_v2, %v3864_v46  ;;  %v3862_v44 = vadd.f32 %v3621_v24, %v11790_v37  ;;  %v11796_v37 = vld [vmem:[#allocation20_spill] sm:$0xff] }
 0x26a   :  { %v6788_v55 = vpop.f32.mrf.mxu1  ;;  %6951 = vmatmul.mubr.msk.bf16.gmra.mxu1 %vm996_vm3, %v11791_v16  ;;  %v6855_v48 = vpop.f32.mrf.mxu0  ;;  %v11797_v16 = vld [vmem:[#allocation22_spill] sm:$0xff] }
 0x26b   :  { %v9569_v10 = vadd.f32 %v3995_v7, %v3862_v44  ;;  %v3867_v59 = vadd.f32 %v6788_v55, %v11792_v42  ;;  %6954 = vmatprep.mubr.msk.bf16.mxu1 %vm996_vm3, %v11793_v22  ;;  %v11798_v22 = vld [vmem:[#allocation98_spill] sm:$0xff] }
 0x26c   :  { %v3634_v56 = vpop.f32.mrf.mxu1  ;;  %v4011_v2 = vpop.f32.mrf.mxu0 }
 0x26d   :  { %v9574_v57 = vadd.f32 %v6854_v61, %v3867_v59  ;;  %v3865_v47 = vadd.f32 %v3634_v56, %v11794_v4 }
 0x26e   :  { %v6789_v17 = vpop.f32.mrf.mxu1  ;;  %v6858_v28 = vpop.f32.mrf.mxu0  ;;  %7021 = vmatmul.mubr.msk.bf16.gmra.mxu0 %vm996_vm3, %v11681_v35 }
 0x26f   :  { %v9577_v14 = vadd.f32 %v4008_v60, %v3865_v47  ;;  %v3868_v3 = vadd.f32 %v6789_v17, %v11795_v39  ;;  %7024 = vmatprep.mubr.msk.bf16.mxu0 %vm996_vm3, %v11686_v40  ;;  %v4323_v39 = vshll.u32 %v9295_v20, 16 }
 0x270   :  { %v3637_v7 = vpop.f32.mrf.mxu1  ;;  %v4024_v24 = vpop.f32.mrf.mxu0 }
 0x271   :  { %v9584_v46 = vadd.f32 %v6855_v48, %v3868_v3  ;;  %v3866_v61 = vadd.f32 %v3637_v7, %v9234_v29  ;;  %v4333_v7 = vshrl.u32 %v9300_v63, 16 }
 0x272   :  { %v6792_v8 = vpop.f32.mrf.mxu1  ;;  %6955 = vmatmul.mubr.msk.bf16.gmra.mxu1 %vm996_vm3, %v11796_v37  ;;  %v6859_v55 = vpop.f32.mrf.mxu0 }
 0x273   :  { %v9589_v44 = vadd.f32 %v4011_v2, %v3866_v61  ;;  %v3871_v60 = vadd.f32 %v6792_v8, %v9239_v11  ;;  %6958 = vmatprep.mubr.msk.bf16.mxu1 %vm996_vm3, %v11797_v16 }
 0x274   :  { %v3650_v35 = vpop.f32.mrf.mxu1  ;;  %v4027_v59 = vpop.f32.mrf.mxu0 }
 0x275   :  { %v9594_v42 = vadd.f32 %v6858_v28, %v3871_v60  ;;  %v3869_v40 = vadd.f32 %v3650_v35, %v9242_v53  ;;  %v4320_v53 = vshrl.u32 %v9295_v20, 16  ;;  %v11799_v28 = vld [vmem:[#allocation26_spill] sm:$0xff] }
 0x276   :  { %v6793_v29 = vpop.f32.mrf.mxu1  ;;  %v6862_v4 = vpop.f32.mrf.mxu0  ;;  %7025 = vmatmul.mubr.msk.bf16.gmra.mxu0 %vm996_vm3, %v11687_v52 }
 0x277   :  { %v9597_v48 = vadd.f32 %v4024_v24, %v3869_v40  ;;  %v3872_v56 = vadd.f32 %v6793_v29, %v11798_v22  ;;  %7028 = vmatprep.mubr.msk.bf16.mxu0 %vm996_vm3, %v11690_v13  ;;  %v11800_v24 = vld [vmem:[#allocation31_spill] sm:$0xff]  ;;  %v4322_v35 = vrot.slane %v4320_v53, 4  ;;  %v4325_v40 = vrot.slane %v4323_v39, 5  ;;  %v11802_v53 = vld [vmem:[#allocation101_spill] sm:$0xff] }
 0x278   :  { %v3653_v11 = vpop.f32.mrf.mxu1  ;;  %v4040_v17 = vpop.f32.mrf.mxu0 }
 0x279   :  { %v9604_v47 = vadd.f32 %v6859_v55, %v3872_v56  ;;  %v3870_v2 = vadd.f32 %v3653_v11, %v9254_v25  ;;  %v4329_v25 = vshll.u32 %v9300_v63, 16  ;;  %v4335_v11 = vrot.slane %v4333_v7, 4 }
 0x27a   :  { %v6796_v3 = vpop.f32.mrf.mxu1  ;;  %6959 = vmatmul.mubr.msk.bf16.gmra.mxu1 %vm996_vm3, %v11799_v28  ;;  %v6863_v13 = vpop.f32.mrf.mxu0 }
 0x27b   :  { %v9612_v52 = vadd.f32 %v4027_v59, %v3870_v2  ;;  %v3875_v61 = vadd.f32 %v6796_v3, %v9259_v6  ;;  %6962 = vmatprep.mubr.msk.bf16.mxu1 %vm996_vm3, %v11800_v24  ;;  %v11801_v59 = vld [vmem:[#allocation100_spill] sm:$0xff]  ;;  %v4331_v56 = vrot.slane %v4329_v25, 5  ;;  %v11804_v25 = vld [vmem:[#allocation41_spill] sm:$0xff] }
 0x27c   :  { %v3666_v8 = vpop.f32.mrf.mxu1  ;;  %v4043_v55 = vpop.f32.mrf.mxu0 }
 0x27d   :  { %v9618_v37 = vadd.f32 %v6862_v4, %v3875_v61  ;;  %v3873_v60 = vadd.f32 %v3666_v8, %v9262_v33  ;;  %v125_v33 = vld [vmem:[%s11181_s0 + $0x1ac] sm:$0x1]  ;;  %v4724_v4 = vrot.slane %v9300_v63, 5  ;;  %v11803_v61 = vld [vmem:[#allocation36_spill] sm:$0xff]  ;;  %v4336_v8 = vor.u32 %v4335_v11, %v4331_v56 }
 0x27e   :  { %v6797_v16 = vpop.f32.mrf.mxu1  ;;  %v6866_v6 = vpop.f32.mrf.mxu0  ;;  %7029 = vmatmul.mubr.msk.bf16.gmra.mxu0 %vm996_vm3, %v11692_v5  ;;  %v4326_v5 = vor.u32 %v4325_v40, %v4322_v35  ;;  %v4339_v63 = vshll.u32 %v125_v33, 16 }
 0x27f   :  { %v9621_v29 = vadd.f32 %v4040_v17, %v3873_v60  ;;  %v3876_v22 = vadd.f32 %v6797_v16, %v11801_v59  ;;  %7032 = vmatprep.mubr.msk.bf16.mxu0 %vm996_vm3, %v11695_v50  ;;  %v6112_v60 = vrot.slane %v9295_v20, 9  ;;  %v4726_v16 = vrot.slane %v4724_v4, 4 }
 0x280   :  { %v3669_v2 = vpop.f32.mrf.mxu1  ;;  %v4056_v3 = vpop.f32.mrf.mxu0  ;;  %v4727_v59 = vrot.slane %v125_v33, 5  ;;  %v4327_v40 = vrot.slane %v4326_v5, 4  ;;  %v4337_v11 = vrot.slane %v4336_v8, 4 }
 0x281   :  { %v9632_v17 = vadd.f32 %v6863_v13, %v3876_v22  ;;  %v3874_v39 = vadd.f32 %v3669_v2, %v11802_v53 }
 0x282   :  { %v6800_v28 = vpop.f32.mrf.mxu1  ;;  %6963 = vmatmul.mubr.msk.bf16.gmra.mxu1 %vm996_vm3, %v11803_v61  ;;  %v6867_v24 = vpop.f32.mrf.mxu0  ;;  %v4341_v61 = vrot.slane %v4339_v63, 5 }
 0x283   :  { %v9637_v7 = vadd.f32 %v4043_v55, %v3874_v39  ;;  %v3879_v50 = vadd.f32 %v6800_v28, %v9280_v45  ;;  %6966 = vmatprep.mubr.msk.bf16.mxu1 %vm996_vm3, %v11804_v25  ;;  %v11805_v45 = vld [vmem:[#allocation99_spill] sm:$0xff] }
 0x284   :  { %v3682_v13 = vpop.f32.mrf.mxu1  ;;  %v4059_v35 = vpop.f32.mrf.mxu0  ;;  %v4342_v49 = vsel %vm7202_vm4, %v4337_v11, %v4341_v61 }
 0x285   :  { %v9643_v22 = vadd.f32 %v6866_v6, %v3879_v50  ;;  %v3877_v2 = vadd.f32 %v3682_v13, %v9284_v9  ;;  %v4725_v9 = vsel %vm7914_vm7, %v6112_v60, %v4724_v4  ;;  %v4728_v6 = vsel %vm7914_vm7, %v4726_v16, %v4727_v59  ;;  %v11807_v13 = vld [vmem:[#allocation44_spill] sm:$0xff]  ;;  %v11809_v60 = vld [vmem:[#allocation122_spill] sm:$0xff] }
 0x286   :  { %v6801_v55 = vpop.f32.mrf.mxu1  ;;  %v6870_v28 = vpop.f32.mrf.mxu0  ;;  %7033 = vmatmul.mubr.msk.bf16.gmra.mxu0 %vm996_vm3, %v11697_v1  ;;  %v4332_v1 = vsel %vm7202_vm4, %v4327_v40, %v4331_v56  ;;  %v11811_v40 = vld [vmem:[#allocation110_spill] sm:$0xff] }
 0x287   :  { %v9646_v53 = vadd.f32 %v4056_v3, %v3877_v2  ;;  %v3880_v39 = vadd.f32 %v6801_v55, %v11805_v45  ;;  %7036 = vmatprep.mubr.msk.bf16.mxu0 %vm996_vm3, %v9321_v0  ;;  %v11806_v3 = vld [vmem:[#allocation102_spill] sm:$0xff]  ;;  %v11810_v2 = vld [vmem:[#allocation103_spill] sm:$0xff]  ;;  %v6078_v56 = vcombine.low %v4332_v1, %v4342_v49 }
 0x288   :  { %v3685_v20 = vpop.f32.mrf.mxu1  ;;  %v4072_v50 = vpop.f32.mrf.mxu0  ;;  %v11808_v0 = vld [vmem:[#allocation58_spill] sm:$0xff] }
 0x289   :  { %v9657_v33 = vadd.f32 %v6867_v24, %v3880_v39  ;;  %v3878_v5 = vadd.f32 %v3685_v20, %v11806_v3  ;;  %v6115_v24 = vcombine.low %v4725_v9, %v4728_v6  ;;  %v11813_v6 = vld [vmem:[#allocation42_spill] sm:$0xff] }
 0x28a   :  { %v6804_v25 = vpop.f32.mrf.mxu1  ;;  %6967 = vmatmul.mubr.msk.bf16.gmra.mxu1 %vm996_vm3, %v11807_v13  ;;  %v6871_v4 = vpop.f32.mrf.mxu0 }
 0x28b   :  { %v9664_v8 = vadd.f32 %v4059_v35, %v3878_v5  ;;  %v3883_v63 = vadd.f32 %v6804_v25, %v11808_v0  ;;  %6970 = vmatprep.mubr.msk.bf16.mxu1 %vm996_vm3, %v11809_v60 }
 0x28c   :  { %v3698_v16 = vpop.f32.mrf.mxu1  ;;  %v4075_v45 = vpop.f32.mrf.mxu0 }
 0x28d   :  { %v9671_v59 = vadd.f32 %v6870_v28, %v3883_v63  ;;  %v3881_v55 = vadd.f32 %v3698_v16, %v11810_v2  ;;  %v11814_v63 = vld [vmem:[#allocation105_spill] sm:$0xff] }
 0x28e   :  { %v6805_v39 = vpop.f32.mrf.mxu1  ;;  %v6874_v3 = vpop.f32.mrf.mxu0  ;;  %7037 = vmatmul.mubr.msk.bf16.gmra.mxu0 %vm996_vm3, %v6115_v24  ;;  %v11815_v16 = vld [vmem:[#allocation65_spill] sm:$0xff] }
 0x28f   :  { %v9674_v35 = vadd.f32 %v4072_v50, %v3881_v55  ;;  %v3884_v20 = vadd.f32 %v6805_v39, %v11811_v40 }
 0x290   :  { %v3701_v5 = vpop.f32.mrf.mxu1  ;;  %v4088_v61 = vpop.f32.mrf.mxu0 }
 0x291   :  { %v9678_v25 = vadd.f32 %v6871_v4, %v3884_v20  ;;  %v3882_v11 = vadd.f32 %v3701_v5, %v11812_v18 }
 0x292   :  { %v6808_v28 = vpop.f32.mrf.mxu1  ;;  %6971 = vmatmul.mubr.msk.bf16.gmra.mxu1 %vm996_vm3, %v6078_v56  ;;  %v6875_v50 = vpop.f32.mrf.mxu0 }
 0x293   :  { %v9682_v9 = vadd.f32 %v4075_v45, %v3882_v11  ;;  %v3887_v13 = vadd.f32 %v6808_v28, %v11813_v6  ;;  %v11816_v45 = vld [vmem:[#allocation106_spill] sm:$0xff] }
 0x294   :  { %v3714_v1 = vpop.f32.mrf.mxu1  ;;  %v4091_v49 = vpop.f32.mrf.mxu0 }
 0x295   :  { %v9685_v0 = vadd.f32 %v6874_v3, %v3887_v13  ;;  %v3885_v60 = vadd.f32 %v3714_v1, %v11814_v63  ;;  %v11818_v3 = vld [vmem:[#allocation107_spill] sm:$0xff] }
 0x296   :  { %v6809_v24 = vpop.f32.mrf.mxu1  ;;  %v6878_v55 = vpop.f32.mrf.mxu0 }
 0x297   :  { %v9688_v4 = vadd.f32 %v4088_v61, %v3885_v60  ;;  %v3888_v2 = vadd.f32 %v6809_v24, %v11815_v16  ;;  %v11820_v61 = vld [vmem:[#allocation109_spill] sm:$0xff] }
 0x298   :  { %v3717_v39 = vpop.f32.mrf.mxu1  ;;  %v4104_v20 = vpop.f32.mrf.mxu0 }
 0x299   :  { %v9691_v40 = vadd.f32 %v6875_v50, %v3888_v2  ;;  %v3886_v56 = vadd.f32 %v3717_v39, %v11816_v45  ;;  %v11822_v50 = vld [vmem:[#allocation4_spill] sm:$0xff] }
 0x29a   :  { %v6812_v5 = vpop.f32.mrf.mxu1  ;;  %v6879_v28 = vpop.f32.mrf.mxu0 }
 0x29b   :  { %v9694_v18 = vadd.f32 %v4091_v49, %v3886_v56  ;;  %v3891_v11 = vadd.f32 %v6812_v5, %v11818_v3  ;;  %v11824_v49 = vld [vmem:[#allocation72_spill] sm:$0xff] }
 0x29c   :  { %v3730_v6 = vpop.f32.mrf.mxu1  ;;  %v4107_v63 = vpop.f32.mrf.mxu0 }
 0x29d   :  { %11817 = vst [vmem:[#allocation118_spill] sm:$0xff] %v9694_v18  ;;  %v9697_v13 = vadd.f32 %v6878_v55, %v3891_v11  ;;  %v3889_v1 = vadd.f32 %v3730_v6, %v11820_v61  ;;  %v11826_v55 = vld [vmem:[#allocation111_spill] sm:$0xff] }
 0x29e   :  { %v6813_v60 = vpop.f32.mrf.mxu1  ;;  %v6882_v2 = vpop.f32.mrf.mxu0 }
 0x29f   :  { %11819 = vst [vmem:[#allocation119_spill] sm:$0xff] %v9697_v13  ;;  %v9700_v24 = vadd.f32 %v4104_v20, %v3889_v1  ;;  %v3892_v16 = vadd.f32 %v6813_v60, %v11822_v50  ;;  %v11828_v20 = vld [vmem:[#allocation112_spill] sm:$0xff] }
 0x2a0   :  { %v3733_v39 = vpop.f32.mrf.mxu1  ;;  %v4120_v18 = vpop.f32.mrf.mxu0 }
 0x2a1   :  { %11821 = vst [vmem:[#allocation87_spill] sm:$0xff] %v9700_v24  ;;  %v9703_v45 = vadd.f32 %v6879_v28, %v3892_v16  ;;  %v3890_v56 = vadd.f32 %v3733_v39, %v11824_v49  ;;  %v11830_v28 = vld [vmem:[#allocation76_spill] sm:$0xff] }
 0x2a2   :  { %v6816_v5 = vpop.f32.mrf.mxu1  ;;  %v6883_v13 = vpop.f32.mrf.mxu0 }
 0x2a3   :  { %11823 = vst [vmem:[#allocation34_spill] sm:$0xff] %v9703_v45  ;;  %v9706_v3 = vadd.f32 %v4107_v63, %v3890_v56  ;;  %v3895_v11 = vadd.f32 %v6816_v5, %v11826_v55  ;;  %v11832_v63 = vld [vmem:[#allocation113_spill] sm:$0xff] }
 0x2a4   :  { %v3746_v6 = vpop.f32.mrf.mxu1  ;;  %v4123_v24 = vpop.f32.mrf.mxu0 }
 0x2a5   :  { %11825 = vst [vmem:[#allocation121_spill] sm:$0xff] %v9706_v3  ;;  %v9709_v61 = vadd.f32 %v6882_v2, %v3895_v11  ;;  %v3893_v1 = vadd.f32 %v3746_v6, %v11828_v20  ;;  %v11834_v2 = vld [vmem:[#allocation73_spill] sm:$0xff] }
 0x2a6   :  { %v6817_v60 = vpop.f32.mrf.mxu1  ;;  %v6886_v45 = vpop.f32.mrf.mxu0 }
 0x2a7   :  { %11827 = vst [vmem:[#allocation88_spill] sm:$0xff] %v9709_v61  ;;  %v9712_v50 = vadd.f32 %v4120_v18, %v3893_v1  ;;  %v3896_v16 = vadd.f32 %v6817_v60, %v11830_v28  ;;  %v11836_v18 = vld [vmem:[#allocation74_spill] sm:$0xff] }
 0x2a8   :  { %v3749_v39 = vpop.f32.mrf.mxu1  ;;  %v4136_v3 = vpop.f32.mrf.mxu0 }
 0x2a9   :  { %11829 = vst [vmem:[#allocation32_spill] sm:$0xff] %v9712_v50  ;;  %v9715_v49 = vadd.f32 %v6883_v13, %v3896_v16  ;;  %v3894_v56 = vadd.f32 %v3749_v39, %v11832_v63  ;;  %v11838_v13 = vld [vmem:[#allocation75_spill] sm:$0xff] }
 0x2aa   :  { %v6820_v5 = vpop.f32.mrf.mxu1  ;;  %v6887_v61 = vpop.f32.mrf.mxu0 }
 0x2ab   :  { %11831 = vst [vmem:[#allocation120_spill] sm:$0xff] %v9715_v49  ;;  %v9718_v55 = vadd.f32 %v4123_v24, %v3894_v56  ;;  %v3899_v11 = vadd.f32 %v6820_v5, %v11834_v2  ;;  %v11840_v24 = vld [vmem:[#allocation78_spill] sm:$0xff] }
 0x2ac   :  { %v3762_v6 = vpop.f32.mrf.mxu1  ;;  %v4139_v50 = vpop.f32.mrf.mxu0 }
 0x2ad   :  { %11833 = vst [vmem:[#allocation35_spill] sm:$0xff] %v9718_v55  ;;  %v9721_v20 = vadd.f32 %v6886_v45, %v3899_v11  ;;  %v3897_v1 = vadd.f32 %v3762_v6, %v11836_v18  ;;  %v11842_v45 = vld [vmem:[#allocation79_spill] sm:$0xff] }
 0x2ae   :  { %v6821_v60 = vpop.f32.mrf.mxu1  ;;  %v6890_v49 = vpop.f32.mrf.mxu0 }
 0x2af   :  { %11835 = vst [vmem:[#allocation40_spill] sm:$0xff] %v9721_v20  ;;  %v9724_v28 = vadd.f32 %v4136_v3, %v3897_v1  ;;  %v3900_v16 = vadd.f32 %v6821_v60, %v11838_v13  ;;  %v11844_v3 = vld [vmem:[#allocation82_spill] sm:$0xff] }
 0x2b0   :  { %v3765_v39 = vpop.f32.mrf.mxu1  ;;  %v4152_v55 = vpop.f32.mrf.mxu0 }
 0x2b1   :  { %11837 = vst [vmem:[#allocation5_spill] sm:$0xff] %v9724_v28  ;;  %v9727_v63 = vadd.f32 %v6887_v61, %v3900_v16  ;;  %v3898_v56 = vadd.f32 %v3765_v39, %v11840_v24  ;;  %v11846_v61 = vld [vmem:[#allocation114_spill] sm:$0xff] }
 0x2b2   :  { %v6824_v5 = vpop.f32.mrf.mxu1  ;;  %v6891_v20 = vpop.f32.mrf.mxu0 }
 0x2b3   :  { %11839 = vst [vmem:[#allocation46_spill] sm:$0xff] %v9727_v63  ;;  %v9730_v2 = vadd.f32 %v4139_v50, %v3898_v56  ;;  %v3903_v11 = vadd.f32 %v6824_v5, %v11842_v45  ;;  %v11848_v50 = vld [vmem:[#allocation23_spill] sm:$0xff] }
 0x2b4   :  { %v3778_v6 = vpop.f32.mrf.mxu1  ;;  %v4155_v28 = vpop.f32.mrf.mxu0 }
 0x2b5   :  { %11841 = vst [vmem:[#allocation47_spill] sm:$0xff] %v9730_v2  ;;  %v9733_v18 = vadd.f32 %v6890_v49, %v3903_v11  ;;  %v3901_v1 = vadd.f32 %v3778_v6, %v11844_v3  ;;  %v11850_v49 = vld [vmem:[#allocation115_spill] sm:$0xff] }
 0x2b6   :  { %v6825_v60 = vpop.f32.mrf.mxu1  ;;  %v6894_v63 = vpop.f32.mrf.mxu0 }
 0x2b7   :  { %11843 = vst [vmem:[#allocation48_spill] sm:$0xff] %v9733_v18  ;;  %v9736_v13 = vadd.f32 %v4152_v55, %v3901_v1  ;;  %v3904_v16 = vadd.f32 %v6825_v60, %v11846_v61  ;;  %v11851_v55 = vld [vmem:[#allocation116_spill] sm:$0xff] }
 0x2b8   :  { %v3781_v39 = vpop.f32.mrf.mxu1  ;;  %v4168_v2 = vpop.f32.mrf.mxu0 }
 0x2b9   :  { %11845 = vst [vmem:[#allocation7_spill] sm:$0xff] %v9736_v13  ;;  %v9739_v24 = vadd.f32 %v6891_v20, %v3904_v16  ;;  %v3902_v56 = vadd.f32 %v3781_v39, %v11848_v50  ;;  %v11852_v20 = vld [vmem:[#allocation86_spill] sm:$0xff] }
 0x2ba   :  { %v6828_v5 = vpop.f32.mrf.mxu1  ;;  %v6895_v18 = vpop.f32.mrf.mxu0 }
 0x2bb   :  { %11847 = vst [vmem:[#allocation92_spill] sm:$0xff] %v9739_v24  ;;  %v9742_v45 = vadd.f32 %v4155_v28, %v3902_v56  ;;  %v3907_v11 = vadd.f32 %v6828_v5, %v11850_v49  ;;  %v11853_v28 = vld [vmem:[#allocation117_spill] sm:$0xff] }
 0x2bc   :  { %v3794_v6 = vpop.f32.mrf.mxu1  ;;  %v4171_v13 = vpop.f32.mrf.mxu0 }
 0x2bd   :  { %11849 = vst [vmem:[#allocation9_spill] sm:$0xff] %v9742_v45  ;;  %v9745_v3 = vadd.f32 %v6894_v63, %v3907_v11  ;;  %v3905_v1 = vadd.f32 %v3794_v6, %v11851_v55 }
 0x2be   :  { %v6829_v60 = vpop.f32.mrf.mxu1  ;;  %v6898_v24 = vpop.f32.mrf.mxu0 }
 0x2bf   :  { %v9748_v61 = vadd.f32 %v4168_v2, %v3905_v1  ;;  %v3908_v16 = vadd.f32 %v6829_v60, %v11852_v20 }
 0x2c0   :  { %v3797_v39 = vpop.f32.mrf.mxu1  ;;  %v4184_v45 = vpop.f32.mrf.mxu0 }
 0x2c1   :  { %v9751_v50 = vadd.f32 %v6895_v18, %v3908_v16  ;;  %v3906_v56 = vadd.f32 %v3797_v39, %v11853_v28 }
 0x2c2   :  { %v6832_v5 = vpop.f32.mrf.mxu1  ;;  %v6899_v11 = vpop.f32.mrf.mxu0 }
 0x2c3   :  { %v9754_v49 = vadd.f32 %v4171_v13, %v3906_v56  ;;  %v3911_v63 = vadd.f32 %v6832_v5, %v9468_v36 }
 0x2c4   :  { %v3810_v6 = vpop.f32.mrf.mxu1  ;;  %v4187_v1 = vpop.f32.mrf.mxu0 }
 0x2c5   :  { %v9757_v55 = vadd.f32 %v6898_v24, %v3911_v63  ;;  %v3909_v2 = vadd.f32 %v3810_v6, %v9471_v21 }
 0x2c6   :  { %v6833_v60 = vpop.f32.mrf.mxu1  ;;  %v6902_v16 = vpop.f32.mrf.mxu0 }
 0x2c7   :  { %v9760_v20 = vadd.f32 %v4184_v45, %v3909_v2  ;;  %v3912_v18 = vadd.f32 %v6833_v60, %v9482_v12 }
 0x2c8   :  { %v3813_v39 = vpop.f32.mrf.mxu1  ;;  %v4200_v56 = vpop.f32.mrf.mxu0 }
 0x2c9   :  { %v9763_v28 = vadd.f32 %v6899_v11, %v3912_v18  ;;  %v3910_v13 = vadd.f32 %v3813_v39, %v9489_v51 }
 0x2ca   :  { %v6836_v36 = vpop.f32.mrf.mxu1  ;;  %v6903_v63 = vpop.f32.mrf.mxu0 }
 0x2cb   :  { %v9766_v5 = vadd.f32 %v4187_v1, %v3910_v13  ;;  %v3915_v24 = vadd.f32 %v6836_v36, %v9496_v19 }
 0x2cc   :  { %v3826_v21 = vpop.f32.mrf.mxu1  ;;  %v4203_v2 = vpop.f32.mrf.mxu0 }
 0x2cd   :  { %v9769_v6 = vadd.f32 %v6902_v16, %v3915_v24  ;;  %v3913_v45 = vadd.f32 %v3826_v21, %v9499_v23 }
 0x2ce   :  { %v6837_v12 = vpop.f32.mrf.mxu1  ;;  %v6906_v18 = vpop.f32.mrf.mxu0 }
 0x2cf   :  { %v9772_v60 = vadd.f32 %v4200_v56, %v3913_v45  ;;  %v3916_v11 = vadd.f32 %v6837_v12, %v9505_v27 }
 0x2d0   :  { %v3829_v51 = vpop.f32.mrf.mxu1  ;;  %v4216_v13 = vpop.f32.mrf.mxu0 }
 0x2d1   :  { %v9775_v39 = vadd.f32 %v6903_v63, %v3916_v11  ;;  %v3914_v1 = vadd.f32 %v3829_v51, %v9509_v62 }
 0x2d2   :  { %v6840_v19 = vpop.f32.mrf.mxu1  ;;  %v6907_v24 = vpop.f32.mrf.mxu0 }
 0x2d3   :  { %v9778_v36 = vadd.f32 %v4203_v2, %v3914_v1  ;;  %v3919_v16 = vadd.f32 %v6840_v19, %v9514_v32 }
 0x2d4   :  { %v3842_v23 = vpop.f32.mrf.mxu1  ;;  %v4219_v45 = vpop.f32.mrf.mxu0 }
 0x2d5   :  { %v9781_v21 = vadd.f32 %v6906_v18, %v3919_v16  ;;  %v3917_v56 = vadd.f32 %v3842_v23, %v9517_v43 }
 0x2d6   :  { %v6841_v27 = vpop.f32.mrf.mxu1  ;;  %v6978_v11 = vpop.f32.mrf.mxu0 }
 0x2d7   :  { %11854 = vst [vmem:[#allocation49_spill] sm:$0xff] %v9781_v21  ;;  %v9784_v12 = vadd.f32 %v4216_v13, %v3917_v56  ;;  %v3920_v63 = vadd.f32 %v6841_v27, %v9524_v31 }
 0x2d8   :  { %v3845_v62 = vpop.f32.mrf.mxu1  ;;  %v4780_v1 = vpop.f32.mrf.mxu0 }
 0x2d9   :  { %v9787_v51 = vadd.f32 %v6907_v24, %v3920_v63  ;;  %v3918_v2 = vadd.f32 %v3845_v62, %v9529_v41 }
 0x2da   :  { %v6912_v32 = vpop.f32.mrf.mxu1  ;;  %v6979_v18 = vpop.f32.mrf.mxu0 }
 0x2db   :  { %v9790_v19 = vadd.f32 %v4219_v45, %v3918_v2  ;;  %v4651_v13 = vadd.f32 %v6912_v32, %v9534_v38 }
 0x2dc   :  { %v4394_v16 = vpop.f32.mrf.mxu1  ;;  %v4783_v23 = vpop.f32.mrf.mxu0 }
 0x2dd   :  { %11855 = vst [vmem:[#allocation45_spill] sm:$0xff] %v9790_v19  ;;  %v4649_v43 = vadd.f32 %v4394_v16, %v9537_v15  ;;  %v9798_v45 = vadd.f32 %v6978_v11, %v4651_v13 }
 0x2de   :  { %v6913_v21 = vpop.f32.mrf.mxu1  ;;  %v6982_v56 = vpop.f32.mrf.mxu0 }
 0x2df   :  { %v9794_v27 = vadd.f32 %v4780_v1, %v4649_v43  ;;  %v4652_v24 = vadd.f32 %v6913_v21, %v9544_v26  ;;  %v5102_v11 = vsel %vm996_vm3, %v9798_v45, 0.0 }
 0x2e0   :  { %v4397_v31 = vpop.f32.mrf.mxu1  ;;  %v4796_v63 = vpop.f32.mrf.mxu0 }
 0x2e1   :  { %v4650_v41 = vadd.f32 %v4397_v31, %v9549_v30  ;;  %v5099_v16 = vsel %vm996_vm3, %v9794_v27, 0.0  ;;  %v9804_v38 = vadd.f32 %v6979_v18, %v4652_v24 }
 0x2e2   :  { %v6916_v62 = vpop.f32.mrf.mxu1  ;;  %v6983_v19 = vpop.f32.mrf.mxu0 }
 0x2e3   :  { %v9800_v2 = vadd.f32 %v4783_v23, %v4650_v41  ;;  %v4655_v43 = vadd.f32 %v6916_v62, %v9554_v58  ;;  %v5104_v18 = vsel %vm996_vm3, %v9804_v38, 0.0 }
 0x2e4   :  { %v4410_v15 = vpop.f32.mrf.mxu1  ;;  %v4799_v21 = vpop.f32.mrf.mxu0 }
 0x2e5   :  { %11856 = vst [vmem:[#allocation51_spill] sm:$0xff] %v9800_v2  ;;  %v5100_v1 = vsel %vm996_vm3, %v9800_v2, 0.0  ;;  %v4653_v26 = vadd.f32 %v4410_v15, %v9557_v34  ;;  %v9818_v2 = vadd.f32 %v6982_v56, %v4655_v43 }
 0x2e6   :  { %v5101_v30 = vadd.f32 %v5100_v1, %v5099_v16  ;;  %v6917_v32 = vpop.f32.mrf.mxu1  ;;  %v6986_v13 = vpop.f32.mrf.mxu0 }
 0x2e7   :  { %v9812_v23 = vadd.f32 %v4796_v63, %v4653_v26  ;;  %v4656_v24 = vadd.f32 %v6917_v32, %v9564_v54  ;;  %v5110_v56 = vsel %vm996_vm3, %v9818_v2, 0.0 }
 0x2e8   :  { %v5103_v31 = vadd.f32 %v5102_v11, %v5101_v30  ;;  %v4413_v41 = vpop.f32.mrf.mxu1  ;;  %v4812_v15 = vpop.f32.mrf.mxu0 }
 0x2e9   :  { %v4654_v34 = vadd.f32 %v4413_v41, %v9569_v10  ;;  %v5106_v58 = vsel %vm996_vm3, %v9812_v23, 0.0  ;;  %v9824_v11 = vadd.f32 %v6983_v19, %v4656_v24 }
 0x2ea   :  { %v5105_v16 = vadd.f32 %v5104_v18, %v5103_v31  ;;  %v6920_v1 = vpop.f32.mrf.mxu1  ;;  %v6987_v62 = vpop.f32.mrf.mxu0 }
 0x2eb   :  { %v9822_v63 = vadd.f32 %v4799_v21, %v4654_v34  ;;  %v4659_v43 = vadd.f32 %v6920_v1, %v9574_v57  ;;  %v5112_v19 = vsel %vm996_vm3, %v9824_v11, 0.0 }
 0x2ec   :  { %v5107_v26 = vadd.f32 %v5106_v58, %v5105_v16  ;;  %v4426_v30 = vpop.f32.mrf.mxu1  ;;  %v4815_v32 = vpop.f32.mrf.mxu0 }
 0x2ed   :  { %v5108_v54 = vsel %vm996_vm3, %v9822_v63, 0.0  ;;  %v4657_v10 = vadd.f32 %v4426_v30, %v9577_v14 }
 0x2ee   :  { %v5109_v31 = vadd.f32 %v5108_v54, %v5107_v26  ;;  %v6921_v41 = vpop.f32.mrf.mxu1  ;;  %v6990_v18 = vpop.f32.mrf.mxu0  ;;  %v9838_v54 = vadd.f32 %v6986_v13, %v4659_v43 }
 0x2ef   :  { %v9832_v21 = vadd.f32 %v4812_v15, %v4657_v10  ;;  %v4660_v24 = vadd.f32 %v6921_v41, %v9584_v46 }
 0x2f0   :  { %v5111_v34 = vadd.f32 %v5110_v56, %v5109_v31  ;;  %v4429_v16 = vpop.f32.mrf.mxu1  ;;  %v4828_v58 = vpop.f32.mrf.mxu0  ;;  %v5118_v13 = vsel %vm996_vm3, %v9838_v54, 0.0 }
 0x2f1   :  { %v4658_v14 = vadd.f32 %v4429_v16, %v9589_v44  ;;  %v5114_v57 = vsel %vm996_vm3, %v9832_v21, 0.0  ;;  %v9844_v56 = vadd.f32 %v6987_v62, %v4660_v24 }
 0x2f2   :  { %v5113_v26 = vadd.f32 %v5112_v19, %v5111_v34  ;;  %v6924_v30 = vpop.f32.mrf.mxu1  ;;  %v6991_v1 = vpop.f32.mrf.mxu0 }
 0x2f3   :  { %v9842_v15 = vadd.f32 %v4815_v32, %v4658_v14  ;;  %v4663_v43 = vadd.f32 %v6924_v30, %v9594_v42  ;;  %v5120_v62 = vsel %vm996_vm3, %v9844_v56, 0.0 }
 0x2f4   :  { %v5115_v10 = vadd.f32 %v5114_v57, %v5113_v26  ;;  %v4442_v31 = vpop.f32.mrf.mxu1  ;;  %v4831_v41 = vpop.f32.mrf.mxu0 }
 0x2f5   :  { %v5116_v46 = vsel %vm996_vm3, %v9842_v15, 0.0  ;;  %v4661_v44 = vadd.f32 %v4442_v31, %v9597_v48 }
 0x2f6   :  { %v5117_v34 = vadd.f32 %v5116_v46, %v5115_v10  ;;  %v6925_v16 = vpop.f32.mrf.mxu1  ;;  %v6994_v19 = vpop.f32.mrf.mxu0  ;;  %v9858_v46 = vadd.f32 %v6990_v18, %v4663_v43 }
 0x2f7   :  { %v9852_v32 = vadd.f32 %v4828_v58, %v4661_v44  ;;  %v4664_v24 = vadd.f32 %v6925_v16, %v9604_v47 }
 0x2f8   :  { %v5119_v14 = vadd.f32 %v5118_v13, %v5117_v34  ;;  %v4445_v26 = vpop.f32.mrf.mxu1  ;;  %v4844_v57 = vpop.f32.mrf.mxu0  ;;  %v5126_v18 = vsel %vm996_vm3, %v9858_v46, 0.0 }
 0x2f9   :  { %v4662_v48 = vadd.f32 %v4445_v26, %v9612_v52  ;;  %v5122_v42 = vsel %vm996_vm3, %v9852_v32, 0.0  ;;  %v9864_v13 = vadd.f32 %v6991_v1, %v4664_v24 }
 0x2fa   :  { %v5121_v10 = vadd.f32 %v5120_v62, %v5119_v14  ;;  %v6928_v31 = vpop.f32.mrf.mxu1  ;;  %v6995_v30 = vpop.f32.mrf.mxu0 }
 0x2fb   :  { %v9862_v58 = vadd.f32 %v4831_v41, %v4662_v48  ;;  %v4667_v43 = vadd.f32 %v6928_v31, %v9618_v37  ;;  %v5128_v1 = vsel %vm996_vm3, %v9864_v13, 0.0 }
 0x2fc   :  { %v5123_v44 = vadd.f32 %v5122_v42, %v5121_v10  ;;  %v4458_v34 = vpop.f32.mrf.mxu1  ;;  %v4847_v16 = vpop.f32.mrf.mxu0 }
 0x2fd   :  { %v5124_v47 = vsel %vm996_vm3, %v9862_v58, 0.0  ;;  %v4665_v52 = vadd.f32 %v4458_v34, %v9621_v29 }
 0x2fe   :  { %v5125_v14 = vadd.f32 %v5124_v47, %v5123_v44  ;;  %v6929_v26 = vpop.f32.mrf.mxu1  ;;  %v6998_v62 = vpop.f32.mrf.mxu0  ;;  %v9878_v47 = vadd.f32 %v6994_v19, %v4667_v43 }
 0x2ff   :  { %v9872_v41 = vadd.f32 %v4844_v57, %v4665_v52  ;;  %v4668_v24 = vadd.f32 %v6929_v26, %v9632_v17 }
 0x300   :  { %v5127_v48 = vadd.f32 %v5126_v18, %v5125_v14  ;;  %v4461_v10 = vpop.f32.mrf.mxu1  ;;  %v4860_v42 = vpop.f32.mrf.mxu0  ;;  %v5134_v19 = vsel %vm996_vm3, %v9878_v47, 0.0 }
 0x301   :  { %v4666_v29 = vadd.f32 %v4461_v10, %v9637_v7  ;;  %v5130_v37 = vsel %vm996_vm3, %v9872_v41, 0.0  ;;  %v9884_v18 = vadd.f32 %v6995_v30, %v4668_v24 }
 0x302   :  { %v5129_v44 = vadd.f32 %v5128_v1, %v5127_v48  ;;  %v6932_v34 = vpop.f32.mrf.mxu1  ;;  %v6999_v31 = vpop.f32.mrf.mxu0 }
 0x303   :  { %v9882_v57 = vadd.f32 %v4847_v16, %v4666_v29  ;;  %v4671_v43 = vadd.f32 %v6932_v34, %v9643_v22  ;;  %v5136_v30 = vsel %vm996_vm3, %v9884_v18, 0.0 }
 0x304   :  { %v5131_v52 = vadd.f32 %v5130_v37, %v5129_v44  ;;  %v4474_v14 = vpop.f32.mrf.mxu1  ;;  %v4863_v26 = vpop.f32.mrf.mxu0 }
 0x305   :  { %v5132_v17 = vsel %vm996_vm3, %v9882_v57, 0.0  ;;  %v4669_v7 = vadd.f32 %v4474_v14, %v9646_v53 }
 0x306   :  { %v5133_v48 = vadd.f32 %v5132_v17, %v5131_v52  ;;  %v6933_v10 = vpop.f32.mrf.mxu1  ;;  %v7002_v1 = vpop.f32.mrf.mxu0  ;;  %v9898_v17 = vadd.f32 %v6998_v62, %v4671_v43 }
 0x307   :  { %v9892_v16 = vadd.f32 %v4860_v42, %v4669_v7  ;;  %v4672_v24 = vadd.f32 %v6933_v10, %v9657_v33 }
 0x308   :  { %v5135_v29 = vadd.f32 %v5134_v19, %v5133_v48  ;;  %v4477_v44 = vpop.f32.mrf.mxu1  ;;  %v4876_v37 = vpop.f32.mrf.mxu0  ;;  %v5142_v62 = vsel %vm996_vm3, %v9898_v17, 0.0 }
 0x309   :  { %v4670_v53 = vadd.f32 %v4477_v44, %v9664_v8  ;;  %v5138_v22 = vsel %vm996_vm3, %v9892_v16, 0.0  ;;  %v9904_v19 = vadd.f32 %v6999_v31, %v4672_v24 }
 0x30a   :  { %v5137_v52 = vadd.f32 %v5136_v30, %v5135_v29  ;;  %v6936_v14 = vpop.f32.mrf.mxu1  ;;  %v7003_v34 = vpop.f32.mrf.mxu0 }
 0x30b   :  { %v9902_v42 = vadd.f32 %v4863_v26, %v4670_v53  ;;  %v4675_v43 = vadd.f32 %v6936_v14, %v9671_v59  ;;  %v5144_v31 = vsel %vm996_vm3, %v9904_v19, 0.0 }
 0x30c   :  { %v5139_v7 = vadd.f32 %v5138_v22, %v5137_v52  ;;  %v4490_v48 = vpop.f32.mrf.mxu1  ;;  %v4879_v10 = vpop.f32.mrf.mxu0 }
 0x30d   :  { %v5140_v33 = vsel %vm996_vm3, %v9902_v42, 0.0  ;;  %v4673_v8 = vadd.f32 %v4490_v48, %v9674_v35 }
 0x30e   :  { %v5141_v29 = vadd.f32 %v5140_v33, %v5139_v7  ;;  %v6937_v44 = vpop.f32.mrf.mxu1  ;;  %v7006_v30 = vpop.f32.mrf.mxu0  ;;  %v9918_v33 = vadd.f32 %v7002_v1, %v4675_v43 }
 0x30f   :  { %v9912_v26 = vadd.f32 %v4876_v37, %v4673_v8  ;;  %v4676_v24 = vadd.f32 %v6937_v44, %v9678_v25 }
 0x310   :  { %v5143_v53 = vadd.f32 %v5142_v62, %v5141_v29  ;;  %v4493_v52 = vpop.f32.mrf.mxu1  ;;  %v4892_v22 = vpop.f32.mrf.mxu0  ;;  %11857 = vst [vmem:[#allocation53_spill] sm:$0xff] %v9918_v33  ;;  %v5150_v1 = vsel %vm996_vm3, %v9918_v33, 0.0 }
 0x311   :  { %v4674_v35 = vadd.f32 %v4493_v52, %v9682_v9  ;;  %v5146_v59 = vsel %vm996_vm3, %v9912_v26, 0.0  ;;  %v9924_v62 = vadd.f32 %v7003_v34, %v4676_v24 }
 0x312   :  { %v5145_v7 = vadd.f32 %v5144_v31, %v5143_v53  ;;  %v6940_v48 = vpop.f32.mrf.mxu1  ;;  %v7007_v14 = vpop.f32.mrf.mxu0 }
 0x313   :  { %v9922_v37 = vadd.f32 %v4879_v10, %v4674_v35  ;;  %11859 = vst [vmem:[#allocation11_spill] sm:$0xff] %v9924_v62  ;;  %v4679_v43 = vadd.f32 %v6940_v48, %v9685_v0  ;;  %v5152_v34 = vsel %vm996_vm3, %v9924_v62, 0.0  ;;  %v11869_v62 = vld [vmem:[#allocation121_spill] sm:$0xff] }
 0x314   :  { %v5147_v8 = vadd.f32 %v5146_v59, %v5145_v7  ;;  %v4506_v29 = vpop.f32.mrf.mxu1  ;;  %v4895_v44 = vpop.f32.mrf.mxu0  ;;  %v11861_v59 = vld [vmem:[#allocation118_spill] sm:$0xff] }
 0x315   :  { %11858 = vst [vmem:[#allocation77_spill] sm:$0xff] %v9922_v37  ;;  %v5148_v25 = vsel %vm996_vm3, %v9922_v37, 0.0  ;;  %v4677_v9 = vadd.f32 %v4506_v29, %v9688_v4  ;;  %v9938_v37 = vadd.f32 %v7006_v30, %v4679_v43  ;;  %v11866_v43 = vld [vmem:[#allocation119_spill] sm:$0xff] }
 0x316   :  { %v5149_v53 = vadd.f32 %v5148_v25, %v5147_v8  ;;  %v6941_v52 = vpop.f32.mrf.mxu1  ;;  %v7010_v31 = vpop.f32.mrf.mxu0 }
 0x317   :  { %v9932_v10 = vadd.f32 %v4892_v22, %v4677_v9  ;;  %v4680_v24 = vadd.f32 %v6941_v52, %v9691_v40  ;;  %11862 = vst [vmem:[#allocation13_spill] sm:$0xff] %v9938_v37  ;;  %v11865_v52 = vld [vmem:[#allocation87_spill] sm:$0xff]  ;;  %v5158_v30 = vsel %vm996_vm3, %v9938_v37, 0.0 }
 0x318   :  { %v5151_v35 = vadd.f32 %v5150_v1, %v5149_v53  ;;  %v4509_v7 = vpop.f32.mrf.mxu1  ;;  %v4908_v29 = vpop.f32.mrf.mxu0 }
 0x319   :  { %11860 = vst [vmem:[#allocation80_spill] sm:$0xff] %v9932_v10  ;;  %v4678_v4 = vadd.f32 %v4509_v7, %v11861_v59  ;;  %v5154_v0 = vsel %vm996_vm3, %v9932_v10, 0.0  ;;  %v9944_v1 = vadd.f32 %v7007_v14, %v4680_v24  ;;  %v11868_v24 = vld [vmem:[#allocation34_spill] sm:$0xff] }
 0x31a   :  { %v5153_v8 = vadd.f32 %v5152_v34, %v5151_v35  ;;  %v6944_v25 = vpop.f32.mrf.mxu1  ;;  %v7011_v48 = vpop.f32.mrf.mxu0 }
 0x31b   :  { %v9942_v22 = vadd.f32 %v4895_v44, %v4678_v4  ;;  %11864 = vst [vmem:[#allocation50_spill] sm:$0xff] %v9944_v1  ;;  %v4683_v10 = vadd.f32 %v6944_v25, %v11866_v43  ;;  %v5160_v14 = vsel %vm996_vm3, %v9944_v1, 0.0  ;;  %v11877_v1 = vld [vmem:[#allocation35_spill] sm:$0xff] }
 0x31c   :  { %v5155_v9 = vadd.f32 %v5154_v0, %v5153_v8  ;;  %v4522_v53 = vpop.f32.mrf.mxu1  ;;  %v4911_v59 = vpop.f32.mrf.mxu0 }
 0x31d   :  { %11863 = vst [vmem:[#allocation81_spill] sm:$0xff] %v9942_v22  ;;  %v5156_v40 = vsel %vm996_vm3, %v9942_v22, 0.0  ;;  %v4681_v7 = vadd.f32 %v4522_v53, %v11865_v52  ;;  %v9958_v33 = vadd.f32 %v7010_v31, %v4683_v10  ;;  %v11874_v31 = vld [vmem:[#allocation88_spill] sm:$0xff] }
 0x31e   :  { %v5157_v35 = vadd.f32 %v5156_v40, %v5155_v9  ;;  %v6945_v34 = vpop.f32.mrf.mxu1  ;;  %v7014_v4 = vpop.f32.mrf.mxu0 }
 0x31f   :  { %v9952_v44 = vadd.f32 %v4908_v29, %v4681_v7  ;;  %v4684_v22 = vadd.f32 %v6945_v34, %v11868_v24  ;;  %11870 = vst [vmem:[#allocation61_spill] sm:$0xff] %v9958_v33  ;;  %v11873_v24 = vld [vmem:[#allocation32_spill] sm:$0xff]  ;;  %v5166_v10 = vsel %vm996_vm3, %v9958_v33, 0.0 }
 0x320   :  { %v5159_v8 = vadd.f32 %v5158_v30, %v5157_v35  ;;  %v4525_v0 = vpop.f32.mrf.mxu1  ;;  %v4924_v52 = vpop.f32.mrf.mxu0 }
 0x321   :  { %11867 = vst [vmem:[#allocation59_spill] sm:$0xff] %v9952_v44  ;;  %v4682_v53 = vadd.f32 %v4525_v0, %v11869_v62  ;;  %v5162_v25 = vsel %vm996_vm3, %v9952_v44, 0.0  ;;  %v9964_v43 = vadd.f32 %v7011_v48, %v4684_v22  ;;  %v11876_v48 = vld [vmem:[#allocation120_spill] sm:$0xff] }
 0x322   :  { %v5161_v9 = vadd.f32 %v5160_v14, %v5159_v8  ;;  %v6948_v40 = vpop.f32.mrf.mxu1  ;;  %v7015_v7 = vpop.f32.mrf.mxu0 }
 0x323   :  { %v9962_v29 = vadd.f32 %v4911_v59, %v4682_v53  ;;  %11872 = vst [vmem:[#allocation15_spill] sm:$0xff] %v9964_v43  ;;  %v4687_v44 = vadd.f32 %v6948_v40, %v11874_v31  ;;  %v5168_v22 = vsel %vm996_vm3, %v9964_v43, 0.0  ;;  %v11885_v43 = vld [vmem:[#allocation47_spill] sm:$0xff] }
 0x324   :  { %v5163_v35 = vadd.f32 %v5162_v25, %v5161_v9  ;;  %v4538_v30 = vpop.f32.mrf.mxu1  ;;  %v4927_v0 = vpop.f32.mrf.mxu0 }
 0x325   :  { %11871 = vst [vmem:[#allocation52_spill] sm:$0xff] %v9962_v29  ;;  %v5164_v34 = vsel %vm996_vm3, %v9962_v29, 0.0  ;;  %v4685_v62 = vadd.f32 %v4538_v30, %v11873_v24  ;;  %v9978_v37 = vadd.f32 %v7014_v4, %v4687_v44  ;;  %v11882_v4 = vld [vmem:[#allocation40_spill] sm:$0xff] }
 0x326   :  { %v5165_v8 = vadd.f32 %v5164_v34, %v5163_v35  ;;  %v6949_v14 = vpop.f32.mrf.mxu1  ;;  %v7018_v53 = vpop.f32.mrf.mxu0 }
 0x327   :  { %v9972_v59 = vadd.f32 %v4924_v52, %v4685_v62  ;;  %v4688_v29 = vadd.f32 %v6949_v14, %v11876_v48  ;;  %11878 = vst [vmem:[#allocation17_spill] sm:$0xff] %v9978_v37  ;;  %v11881_v48 = vld [vmem:[#allocation5_spill] sm:$0xff]  ;;  %v5174_v44 = vsel %vm996_vm3, %v9978_v37, 0.0 }
 0x328   :  { %v5167_v9 = vadd.f32 %v5166_v10, %v5165_v8  ;;  %v4541_v25 = vpop.f32.mrf.mxu1  ;;  %v4940_v24 = vpop.f32.mrf.mxu0 }
 0x329   :  { %11875 = vst [vmem:[#allocation84_spill] sm:$0xff] %v9972_v59  ;;  %v4686_v30 = vadd.f32 %v4541_v25, %v11877_v1  ;;  %v5170_v40 = vsel %vm996_vm3, %v9972_v59, 0.0  ;;  %v9984_v31 = vadd.f32 %v7015_v7, %v4688_v29  ;;  %v11884_v7 = vld [vmem:[#allocation46_spill] sm:$0xff] }
 0x32a   :  { %v5169_v35 = vadd.f32 %v5168_v22, %v5167_v9  ;;  %v6952_v34 = vpop.f32.mrf.mxu1  ;;  %v7019_v62 = vpop.f32.mrf.mxu0 }
 0x32b   :  { %v9982_v52 = vadd.f32 %v4927_v0, %v4686_v30  ;;  %11880 = vst [vmem:[#allocation25_spill] sm:$0xff] %v9984_v31  ;;  %v4691_v59 = vadd.f32 %v6952_v34, %v11882_v4  ;;  %v5176_v29 = vsel %vm996_vm3, %v9984_v31, 0.0  ;;  %v11892_v31 = vld [vmem:[#allocation9_spill] sm:$0xff] }
 0x32c   :  { %v5171_v8 = vadd.f32 %v5170_v40, %v5169_v35  ;;  %v4554_v10 = vpop.f32.mrf.mxu1  ;;  %v4943_v25 = vpop.f32.mrf.mxu0 }
 0x32d   :  { %11879 = vst [vmem:[#allocation85_spill] sm:$0xff] %v9982_v52  ;;  %v5172_v14 = vsel %vm996_vm3, %v9982_v52, 0.0  ;;  %v4689_v1 = vadd.f32 %v4554_v10, %v11881_v48  ;;  %v9998_v33 = vadd.f32 %v7018_v53, %v4691_v59  ;;  %v11889_v53 = vld [vmem:[#allocation48_spill] sm:$0xff] }
 0x32e   :  { %v5173_v9 = vadd.f32 %v5172_v14, %v5171_v8  ;;  %v6953_v22 = vpop.f32.mrf.mxu1  ;;  %v7022_v30 = vpop.f32.mrf.mxu0 }
 0x32f   :  { %v9992_v0 = vadd.f32 %v4940_v24, %v4689_v1  ;;  %v4692_v52 = vadd.f32 %v6953_v22, %v11884_v7  ;;  %v11888_v7 = vld [vmem:[#allocation7_spill] sm:$0xff]  ;;  %v5182_v59 = vsel %vm996_vm3, %v9998_v33, 0.0 }
 0x330   :  { %v5175_v35 = vadd.f32 %v5174_v44, %v5173_v9  ;;  %v4557_v40 = vpop.f32.mrf.mxu1  ;;  %v4956_v48 = vpop.f32.mrf.mxu0 }
 0x331   :  { %11883 = vst [vmem:[#allocation66_spill] sm:$0xff] %v9992_v0  ;;  %v4690_v10 = vadd.f32 %v4557_v40, %v11885_v43  ;;  %v5178_v34 = vsel %vm996_vm3, %v9992_v0, 0.0  ;;  %v10004_v4 = vadd.f32 %v7019_v62, %v4692_v52  ;;  %v11891_v62 = vld [vmem:[#allocation92_spill] sm:$0xff] }
 0x332   :  { %v5177_v8 = vadd.f32 %v5176_v29, %v5175_v35  ;;  %v6956_v14 = vpop.f32.mrf.mxu1  ;;  %v7023_v1 = vpop.f32.mrf.mxu0 }
 0x333   :  { %v10002_v24 = vadd.f32 %v4943_v25, %v4690_v10  ;;  %11887 = vst [vmem:[#allocation29_spill] sm:$0xff] %v10004_v4  ;;  %v4695_v0 = vadd.f32 %v6956_v14, %v11889_v53  ;;  %v5184_v52 = vsel %vm996_vm3, %v10004_v4, 0.0 }
 0x334   :  { %v5179_v9 = vadd.f32 %v5178_v34, %v5177_v8  ;;  %v4570_v44 = vpop.f32.mrf.mxu1  ;;  %v4959_v40 = vpop.f32.mrf.mxu0 }
 0x335   :  { %11886 = vst [vmem:[#allocation67_spill] sm:$0xff] %v10002_v24  ;;  %v5180_v22 = vsel %vm996_vm3, %v10002_v24, 0.0  ;;  %v4693_v43 = vadd.f32 %v4570_v44, %v11888_v7  ;;  %v10018_v37 = vadd.f32 %v7022_v30, %v4695_v0 }
 0x336   :  { %v5181_v35 = vadd.f32 %v5180_v22, %v5179_v9  ;;  %v6957_v29 = vpop.f32.mrf.mxu1  ;;  %v7026_v10 = vpop.f32.mrf.mxu0 }
 0x337   :  { %v10012_v25 = vadd.f32 %v4956_v48, %v4693_v43  ;;  %v4696_v24 = vadd.f32 %v6957_v29, %v11891_v62  ;;  %11893 = vst [vmem:[#allocation62_spill] sm:$0xff] %v10018_v37  ;;  %v5190_v0 = vsel %vm996_vm3, %v10018_v37, 0.0 }
 0x338   :  { %v5183_v8 = vadd.f32 %v5182_v59, %v5181_v35  ;;  %v4573_v34 = vpop.f32.mrf.mxu1  ;;  %v4972_v7 = vpop.f32.mrf.mxu0 }
 0x339   :  { %11890 = vst [vmem:[#allocation19_spill] sm:$0xff] %v10012_v25  ;;  %v4694_v44 = vadd.f32 %v4573_v34, %v11892_v31  ;;  %v5186_v14 = vsel %vm996_vm3, %v10012_v25, 0.0  ;;  %v10024_v53 = vadd.f32 %v7023_v1, %v4696_v24 }
 0x33a   :  { %v5185_v9 = vadd.f32 %v5184_v52, %v5183_v8  ;;  %v6960_v22 = vpop.f32.mrf.mxu1  ;;  %v7027_v43 = vpop.f32.mrf.mxu0 }
 0x33b   :  { %v10022_v48 = vadd.f32 %v4959_v40, %v4694_v44  ;;  %11894 = vst [vmem:[#allocation21_spill] sm:$0xff] %v10024_v53  ;;  %v4699_v30 = vadd.f32 %v6960_v22, %v9745_v3  ;;  %v5192_v24 = vsel %vm996_vm3, %v10024_v53, 0.0 }
 0x33c   :  { %v5187_v35 = vadd.f32 %v5186_v14, %v5185_v9  ;;  %v4586_v59 = vpop.f32.mrf.mxu1  ;;  %v4975_v34 = vpop.f32.mrf.mxu0 }
 0x33d   :  { %v5188_v29 = vsel %vm996_vm3, %v10022_v48, 0.0  ;;  %v4697_v31 = vadd.f32 %v4586_v59, %v9748_v61 }
 0x33e   :  { %v5189_v8 = vadd.f32 %v5188_v29, %v5187_v35  ;;  %v6961_v52 = vpop.f32.mrf.mxu1  ;;  %v7030_v62 = vpop.f32.mrf.mxu0  ;;  %v10038_v29 = vadd.f32 %v7026_v10, %v4699_v30 }
 0x33f   :  { %v10032_v40 = vadd.f32 %v4972_v7, %v4697_v31  ;;  %v4700_v1 = vadd.f32 %v6961_v52, %v9751_v50 }
 0x340   :  { %v5191_v44 = vadd.f32 %v5190_v0, %v5189_v8  ;;  %v4589_v9 = vpop.f32.mrf.mxu1  ;;  %v4988_v14 = vpop.f32.mrf.mxu0  ;;  %v5198_v10 = vsel %vm996_vm3, %v10038_v29, 0.0 }
 0x341   :  { %v4698_v61 = vadd.f32 %v4589_v9, %v9754_v49  ;;  %v5194_v3 = vsel %vm996_vm3, %v10032_v40, 0.0  ;;  %v10044_v0 = vadd.f32 %v7027_v43, %v4700_v1 }
 0x342   :  { %v5193_v35 = vadd.f32 %v5192_v24, %v5191_v44  ;;  %v6964_v59 = vpop.f32.mrf.mxu1  ;;  %v7031_v22 = vpop.f32.mrf.mxu0 }
 0x343   :  { %v10042_v7 = vadd.f32 %v4975_v34, %v4698_v61  ;;  %v4703_v30 = vadd.f32 %v6964_v59, %v9757_v55  ;;  %v5200_v43 = vsel %vm996_vm3, %v10044_v0, 0.0 }
 0x344   :  { %v5195_v31 = vadd.f32 %v5194_v3, %v5193_v35  ;;  %v4602_v8 = vpop.f32.mrf.mxu1  ;;  %v4991_v52 = vpop.f32.mrf.mxu0 }
 0x345   :  { %v5196_v50 = vsel %vm996_vm3, %v10042_v7, 0.0  ;;  %v4701_v49 = vadd.f32 %v4602_v8, %v9760_v20 }
 0x346   :  { %v5197_v44 = vadd.f32 %v5196_v50, %v5195_v31  ;;  %v6965_v9 = vpop.f32.mrf.mxu1  ;;  %v7034_v24 = vpop.f32.mrf.mxu0  ;;  %v10058_v50 = vadd.f32 %v7030_v62, %v4703_v30 }
 0x347   :  { %v10052_v34 = vadd.f32 %v4988_v14, %v4701_v49  ;;  %v4704_v1 = vadd.f32 %v6965_v9, %v9763_v28 }
 0x348   :  { %v5199_v61 = vadd.f32 %v5198_v10, %v5197_v44  ;;  %v4605_v35 = vpop.f32.mrf.mxu1  ;;  %v5004_v3 = vpop.f32.mrf.mxu0  ;;  %v5206_v62 = vsel %vm996_vm3, %v10058_v50, 0.0 }
 0x349   :  { %v4702_v20 = vadd.f32 %v4605_v35, %v9766_v5  ;;  %v5202_v55 = vsel %vm996_vm3, %v10052_v34, 0.0  ;;  %v10064_v10 = vadd.f32 %v7031_v22, %v4704_v1 }
 0x34a   :  { %v5201_v31 = vadd.f32 %v5200_v43, %v5199_v61  ;;  %v6968_v8 = vpop.f32.mrf.mxu1  ;;  %v7035_v59 = vpop.f32.mrf.mxu0 }
 0x34b   :  { %v10062_v14 = vadd.f32 %v4991_v52, %v4702_v20  ;;  %v4707_v30 = vadd.f32 %v6968_v8, %v9769_v6  ;;  %v5208_v22 = vsel %vm996_vm3, %v10064_v10, 0.0 }
 0x34c   :  { %v5203_v49 = vadd.f32 %v5202_v55, %v5201_v31  ;;  %v4618_v44 = vpop.f32.mrf.mxu1  ;;  %v5007_v9 = vpop.f32.mrf.mxu0 }
 0x34d   :  { %v5204_v28 = vsel %vm996_vm3, %v10062_v14, 0.0  ;;  %v4705_v5 = vadd.f32 %v4618_v44, %v9772_v60 }
 0x34e   :  { %v5205_v61 = vadd.f32 %v5204_v28, %v5203_v49  ;;  %v6969_v35 = vpop.f32.mrf.mxu1  ;;  %v7038_v43 = vpop.f32.mrf.mxu0  ;;  %v5093_v28 = vadd.f32 %v7034_v24, %v4707_v30 }
 0x34f   :  { %v5091_v52 = vadd.f32 %v5004_v3, %v4705_v5  ;;  %v4708_v1 = vadd.f32 %v6969_v35, %v9775_v39 }
 0x350   :  { %v5207_v20 = vadd.f32 %v5206_v62, %v5205_v61  ;;  %v4621_v31 = vpop.f32.mrf.mxu1  ;;  %v5020_v49 = vpop.f32.mrf.mxu0  ;;  %v5214_v39 = vsel %vm996_vm3, %v5093_v28, 0.0 }
 0x351   :  { %v4706_v55 = vadd.f32 %v4621_v31, %v9778_v36  ;;  %v5210_v53 = vsel %vm996_vm3, %v5091_v52, 0.0  ;;  %v5094_v3 = vadd.f32 %v7035_v59, %v4708_v1  ;;  %v11895_v36 = vld [vmem:[#allocation49_spill] sm:$0xff] }
 0x352   :  { %v5209_v60 = vadd.f32 %v5208_v22, %v5207_v20  ;;  %v6972_v44 = vpop.f32.mrf.mxu1  ;;  %v7039_v4 = vpop.f32.mrf.mxu0 }
 0x353   :  { %v5092_v37 = vadd.f32 %v5007_v9, %v4706_v55  ;;  %v4711_v35 = vadd.f32 %v6972_v44, %v11895_v36  ;;  %v5216_v30 = vsel %vm996_vm3, %v5094_v3, 0.0  ;;  %v11896_v9 = vld [vmem:[#allocation45_spill] sm:$0xff] }
 0x354   :  { %v5211_v25 = vadd.f32 %v5210_v53, %v5209_v60  ;;  %v4634_v6 = vpop.f32.mrf.mxu1  ;;  %v5023_v1 = vpop.f32.mrf.mxu0 }
 0x355   :  { %v5212_v8 = vsel %vm996_vm3, %v5092_v37, 0.0  ;;  %v4709_v5 = vadd.f32 %v4634_v6, %v9784_v12  ;;  %v5097_v55 = vadd.f32 %v7038_v43, %v4711_v35 }
 0x356   :  { %v5213_v61 = vadd.f32 %v5212_v8, %v5211_v25  ;;  %v6973_v62 = vpop.f32.mrf.mxu1 }
 0x357   :  { %v5095_v20 = vadd.f32 %v5020_v49, %v4709_v5  ;;  %v4712_v53 = vadd.f32 %v6973_v62, %v9787_v51  ;;  %v5222_v49 = vsel %vm996_vm3, %v5097_v55, 0.0 }
 0x358   :  { %v5215_v31 = vadd.f32 %v5214_v39, %v5213_v61  ;;  %v4637_v24 = vpop.f32.mrf.mxu1 }
 0x359   :  { %v4710_v59 = vadd.f32 %v4637_v24, %v11896_v9  ;;  %v5218_v12 = vsel %vm996_vm3, %v5095_v20, 0.0  ;;  %v5098_v6 = vadd.f32 %v7039_v4, %v4712_v53 }
 0x35a   :  { %v5217_v22 = vadd.f32 %v5216_v30, %v5215_v31 }
 0x35b   :  { %v5096_v25 = vadd.f32 %v5023_v1, %v4710_v59  ;;  %v5224_v61 = vsel %vm996_vm3, %v5098_v6, 0.0 }
 0x35c   :  { %v5219_v60 = vadd.f32 %v5218_v12, %v5217_v22 }
 0x35d   :  { %v5220_v8 = vsel %vm996_vm3, %v5096_v25, 0.0 }
 0x35e   :  { %v5221_v44 = vadd.f32 %v5220_v8, %v5219_v60 }
 0x360   :  { %v5223_v5 = vadd.f32 %v5222_v49, %v5221_v44 }
 0x362   :  { %v5225_v39 = vadd.f32 %v5224_v61, %v5223_v5 }
 0x364   :  { %v5226_v51 = vrot.slane %v5225_v39, 4 }
 0x366   :  { %v5227_v62 = vadd.f32 %v5226_v51, %v5225_v39 }
 0x368   :  { %v5228_v36 = vrot.slane %v5227_v62, 2 }
 0x36a   :  { %v5229_v31 = vadd.f32 %v5228_v36, %v5227_v62 }
 0x36c   :  { %v5230_v24 = vrot.slane %v5229_v31, 1 }
 0x36e   :  { %v5231_v43 = vadd.f32 %v5230_v24, %v5229_v31 }
 0x370   :  { %v10088_v35 = vmul.f32 0.001953125, %v5231_v43 }
 0x372   :  { %v10092_v4 = vsub.f32 %v10022_v48, %v10088_v35  ;;  %v10096_v30 = vsub.f32 %v10032_v40, %v10088_v35  ;;  %v10100_v53 = vsub.f32 %v10042_v7, %v10088_v35  ;;  %v10104_v9 = vsub.f32 %v10038_v29, %v10088_v35 }
 0x373   :  { %v10108_v59 = vsub.f32 %v10044_v0, %v10088_v35  ;;  %v10112_v48 = vsub.f32 %v10052_v34, %v10088_v35  ;;  %v10116_v40 = vsub.f32 %v10062_v14, %v10088_v35  ;;  %v10120_v7 = vsub.f32 %v10058_v50, %v10088_v35 }
 0x374   :  { %11897 = vst [vmem:[#allocation64_spill] sm:$0xff] %v10092_v4  ;;  %v10124_v29 = vsub.f32 %v10064_v10, %v10088_v35  ;;  %v10127_v22 = vsub.f32 %v5091_v52, %v10088_v35  ;;  %v10130_v0 = vsub.f32 %v5092_v37, %v10088_v35  ;;  %v10133_v34 = vsub.f32 %v5093_v28, %v10088_v35  ;;  %v11903_v28 = vld [vmem:[#allocation51_spill] sm:$0xff] }
 0x375   :  { %v10136_v14 = vsub.f32 %v5094_v3, %v10088_v35  ;;  %v10139_v1 = vsub.f32 %v5095_v20, %v10088_v35  ;;  %v10142_v50 = vsub.f32 %v5096_v25, %v10088_v35  ;;  %v10145_v10 = vsub.f32 %v5097_v55, %v10088_v35 }
 0x376   :  { %v10148_v52 = vsub.f32 %v5098_v6, %v10088_v35  ;;  %v10152_v37 = vsub.f32 %v9794_v27, %v10088_v35  ;;  %v10156_v3 = vsub.f32 %v11903_v28, %v10088_v35  ;;  %v10160_v20 = vsub.f32 %v9798_v45, %v10088_v35 }
 0x377   :  { %11898 = vst [vmem:[#allocation27_spill] sm:$0xff] %v10136_v14  ;;  %11899 = vst [vmem:[#allocation70_spill] sm:$0xff] %v10139_v1  ;;  %v10164_v12 = vsub.f32 %v9804_v38, %v10088_v35  ;;  %v10172_v27 = vsub.f32 %v9812_v23, %v10088_v35  ;;  %v10178_v45 = vsub.f32 %v9822_v63, %v10088_v35 }
 0x378   :  { %11900 = vst [vmem:[#allocation57_spill] sm:$0xff] %v10142_v50  ;;  %11901 = vst [vmem:[#allocation30_spill] sm:$0xff] %v10145_v10  ;;  %v5297_v55 = vmul.f32 %v10152_v37, %v10152_v37  ;;  %v5298_v25 = vmul.f32 %v10156_v3, %v10156_v3  ;;  %v5299_v60 = vmul.f32 %v10160_v20, %v10160_v20 }
 0x379   :  { %11902 = vst [vmem:[#allocation24_spill] sm:$0xff] %v10148_v52  ;;  %v5300_v38 = vmul.f32 %v10164_v12, %v10164_v12  ;;  %v10186_v49 = vsub.f32 %v9818_v2, %v10088_v35  ;;  %v5301_v23 = vmul.f32 %v10172_v27, %v10172_v27  ;;  %v10193_v63 = vsub.f32 %v9824_v11, %v10088_v35 }
 0x37a   :  { %v5361_v6 = vsel %vm996_vm3, %v5297_v55, 0.0  ;;  %v5362_v8 = vsel %vm996_vm3, %v5298_v25, 0.0  ;;  %v5364_v5 = vsel %vm996_vm3, %v5299_v60, 0.0  ;;  %v5302_v39 = vmul.f32 %v10178_v45, %v10178_v45 }
 0x37b   :  { %v5363_v44 = vadd.f32 %v5362_v8, %v5361_v6  ;;  %v5366_v51 = vsel %vm996_vm3, %v5300_v38, 0.0  ;;  %v10200_v2 = vsub.f32 %v9832_v21, %v10088_v35  ;;  %v5303_v36 = vmul.f32 %v10186_v49, %v10186_v49 }
 0x37c   :  { %v5368_v31 = vsel %vm996_vm3, %v5301_v23, 0.0  ;;  %v10207_v11 = vsub.f32 %v9842_v15, %v10088_v35  ;;  %v5304_v43 = vmul.f32 %v10193_v63, %v10193_v63  ;;  %v5370_v28 = vsel %vm996_vm3, %v5302_v39, 0.0 }
 0x37d   :  { %v5365_v61 = vadd.f32 %v5364_v5, %v5363_v44  ;;  %v10214_v21 = vsub.f32 %v9838_v54, %v10088_v35  ;;  %v5305_v25 = vmul.f32 %v10200_v2, %v10200_v2  ;;  %v5372_v60 = vsel %vm996_vm3, %v5303_v36, 0.0 }
 0x37e   :  { %v10221_v15 = vsub.f32 %v9844_v56, %v10088_v35  ;;  %v5306_v6 = vmul.f32 %v10207_v11, %v10207_v11  ;;  %v5374_v8 = vsel %vm996_vm3, %v5304_v43, 0.0  ;;  %v10228_v54 = vsub.f32 %v9852_v32, %v10088_v35 }
 0x37f   :  { %v5367_v62 = vadd.f32 %v5366_v51, %v5365_v61  ;;  %v5307_v23 = vmul.f32 %v10214_v21, %v10214_v21  ;;  %v5376_v5 = vsel %vm996_vm3, %v5305_v25, 0.0  ;;  %v10235_v56 = vsub.f32 %v9862_v58, %v10088_v35 }
 0x380   :  { %v5308_v39 = vmul.f32 %v10221_v15, %v10221_v15  ;;  %v5378_v51 = vsel %vm996_vm3, %v5306_v6, 0.0  ;;  %v10242_v32 = vsub.f32 %v9858_v46, %v10088_v35  ;;  %v5309_v36 = vmul.f32 %v10228_v54, %v10228_v54 }
 0x381   :  { %v5369_v24 = vadd.f32 %v5368_v31, %v5367_v62  ;;  %v5380_v31 = vsel %vm996_vm3, %v5307_v23, 0.0  ;;  %v10249_v58 = vsub.f32 %v9864_v13, %v10088_v35  ;;  %v5310_v43 = vmul.f32 %v10235_v56, %v10235_v56 }
 0x382   :  { %v10256_v46 = vsub.f32 %v9872_v41, %v10088_v35  ;;  %v5311_v25 = vmul.f32 %v10242_v32, %v10242_v32  ;;  %v10263_v13 = vsub.f32 %v9882_v57, %v10088_v35  ;;  %v10270_v41 = vsub.f32 %v9878_v47, %v10088_v35 }
 0x383   :  { %v5371_v55 = vadd.f32 %v5370_v28, %v5369_v24  ;;  %v5382_v28 = vsel %vm996_vm3, %v5308_v39, 0.0  ;;  %v5312_v6 = vmul.f32 %v10249_v58, %v10249_v58  ;;  %v10277_v57 = vsub.f32 %v9884_v18, %v10088_v35 }
 0x384   :  { %v5313_v23 = vmul.f32 %v10256_v46, %v10256_v46  ;;  %v5314_v39 = vmul.f32 %v10263_v13, %v10263_v13  ;;  %v10284_v47 = vsub.f32 %v9892_v16, %v10088_v35  ;;  %v10291_v18 = vsub.f32 %v9902_v42, %v10088_v35 }
 0x385   :  { %v5373_v38 = vadd.f32 %v5372_v60, %v5371_v55  ;;  %v5384_v60 = vsel %vm996_vm3, %v5309_v36, 0.0  ;;  %v5315_v36 = vmul.f32 %v10270_v41, %v10270_v41  ;;  %v10298_v16 = vsub.f32 %v9898_v17, %v10088_v35 }
 0x386   :  { %v10305_v42 = vsub.f32 %v9904_v19, %v10088_v35  ;;  %v10312_v17 = vsub.f32 %v9912_v26, %v10088_v35 }
 0x387   :  { %v5375_v44 = vadd.f32 %v5374_v8, %v5373_v38  ;;  %v5386_v8 = vsel %vm996_vm3, %v5310_v43, 0.0  ;;  %v5316_v43 = vmul.f32 %v10277_v57, %v10277_v57 }
 0x389   :  { %v5377_v61 = vadd.f32 %v5376_v5, %v5375_v44  ;;  %v5388_v5 = vsel %vm996_vm3, %v5311_v25, 0.0  ;;  %v5317_v25 = vmul.f32 %v10284_v47, %v10284_v47 }
 0x38b   :  { %v5379_v62 = vadd.f32 %v5378_v51, %v5377_v61  ;;  %v5390_v51 = vsel %vm996_vm3, %v5312_v6, 0.0  ;;  %v5318_v6 = vmul.f32 %v10291_v18, %v10291_v18 }
 0x38d   :  { %v5381_v24 = vadd.f32 %v5380_v31, %v5379_v62  ;;  %v5392_v31 = vsel %vm996_vm3, %v5313_v23, 0.0  ;;  %v5319_v23 = vmul.f32 %v10298_v16, %v10298_v16 }
 0x38f   :  { %v5383_v55 = vadd.f32 %v5382_v28, %v5381_v24  ;;  %v5394_v28 = vsel %vm996_vm3, %v5314_v39, 0.0  ;;  %v11904_v39 = vld [vmem:[#allocation77_spill] sm:$0xff] }
 0x390   :  { %v10319_v19 = vsub.f32 %v11904_v39, %v10088_v35  ;;  %v11908_v39 = vld [vmem:[#allocation81_spill] sm:$0xff] }
 0x391   :  { %v5385_v38 = vadd.f32 %v5384_v60, %v5383_v55  ;;  %v5396_v60 = vsel %vm996_vm3, %v5315_v36, 0.0 }
 0x393   :  { %v5387_v44 = vadd.f32 %v5386_v8, %v5385_v38  ;;  %v5398_v8 = vsel %vm996_vm3, %v5316_v43, 0.0  ;;  %v5404_v43 = vsel %vm996_vm3, %v5319_v23, 0.0 }
 0x395   :  { %v5389_v61 = vadd.f32 %v5388_v5, %v5387_v44  ;;  %v5400_v5 = vsel %vm996_vm3, %v5317_v25, 0.0 }
 0x397   :  { %v5391_v62 = vadd.f32 %v5390_v51, %v5389_v61  ;;  %v5320_v51 = vmul.f32 %v10305_v42, %v10305_v42 }
 0x399   :  { %v5393_v24 = vadd.f32 %v5392_v31, %v5391_v62  ;;  %v5402_v62 = vsel %vm996_vm3, %v5318_v6, 0.0  ;;  %v11905_v31 = vld [vmem:[#allocation53_spill] sm:$0xff] }
 0x39a   :  { %v10326_v26 = vsub.f32 %v11905_v31, %v10088_v35 }
 0x39b   :  { %v5395_v55 = vadd.f32 %v5394_v28, %v5393_v24  ;;  %v5321_v24 = vmul.f32 %v10312_v17, %v10312_v17 }
 0x39d   :  { %v5397_v38 = vadd.f32 %v5396_v60, %v5395_v55  ;;  %v11906_v55 = vld [vmem:[#allocation11_spill] sm:$0xff]  ;;  %v5322_v60 = vmul.f32 %v10319_v19, %v10319_v19  ;;  %v5408_v23 = vsel %vm996_vm3, %v5321_v24, 0.0 }
 0x39e   :  { %v10333_v25 = vsub.f32 %v11906_v55, %v10088_v35 }
 0x39f   :  { %v5399_v44 = vadd.f32 %v5398_v8, %v5397_v38  ;;  %v5406_v38 = vsel %vm996_vm3, %v5320_v51, 0.0  ;;  %v11907_v8 = vld [vmem:[#allocation80_spill] sm:$0xff]  ;;  %v5410_v51 = vsel %vm996_vm3, %v5322_v60, 0.0 }
 0x3a1   :  { %v5401_v61 = vadd.f32 %v5400_v5, %v5399_v44  ;;  %v10340_v44 = vsub.f32 %v11907_v8, %v10088_v35  ;;  %v5323_v5 = vmul.f32 %v10326_v26, %v10326_v26 }
 0x3a3   :  { %v5403_v36 = vadd.f32 %v5402_v62, %v5401_v61  ;;  %v10347_v62 = vsub.f32 %v11908_v39, %v10088_v35  ;;  %v5325_v55 = vmul.f32 %v10340_v44, %v10340_v44  ;;  %v5412_v24 = vsel %vm996_vm3, %v5323_v5, 0.0  ;;  %v11914_v39 = vld [vmem:[#allocation59_spill] sm:$0xff] }
 0x3a5   :  { %v5405_v28 = vadd.f32 %v5404_v43, %v5403_v36  ;;  %11909 = vst [vmem:[#allocation38_spill] sm:$0xff] %v10347_v62  ;;  %v5324_v36 = vmul.f32 %v10333_v25, %v10333_v25  ;;  %v11910_v43 = vld [vmem:[#allocation13_spill] sm:$0xff]  ;;  %v5416_v5 = vsel %vm996_vm3, %v5325_v55, 0.0 }
 0x3a7   :  { %v5407_v6 = vadd.f32 %v5406_v38, %v5405_v28  ;;  %v10354_v28 = vsub.f32 %v11910_v43, %v10088_v35  ;;  %v5414_v60 = vsel %vm996_vm3, %v5324_v36, 0.0 }
 0x3a9   :  { %v5409_v61 = vadd.f32 %v5408_v23, %v5407_v6  ;;  %11911 = vst [vmem:[#allocation28_spill] sm:$0xff] %v10354_v28  ;;  %v11912_v6 = vld [vmem:[#allocation50_spill] sm:$0xff]  ;;  %v5326_v23 = vmul.f32 %v10347_v62, %v10347_v62  ;;  %v5327_v43 = vmul.f32 %v10354_v28, %v10354_v28 }
 0x3aa   :  { %v10361_v8 = vsub.f32 %v11912_v6, %v10088_v35 }
 0x3ab   :  { %v5411_v31 = vadd.f32 %v5410_v51, %v5409_v61  ;;  %v10368_v51 = vsub.f32 %v11914_v39, %v10088_v35  ;;  %v5418_v36 = vsel %vm996_vm3, %v5326_v23, 0.0  ;;  %v5420_v55 = vsel %vm996_vm3, %v5327_v43, 0.0 }
 0x3ac   :  { %11913 = vst [vmem:[#allocation37_spill] sm:$0xff] %v10361_v8  ;;  %v5328_v62 = vmul.f32 %v10361_v8, %v10361_v8 }
 0x3ad   :  { %v5413_v38 = vadd.f32 %v5412_v24, %v5411_v31  ;;  %11915 = vst [vmem:[#allocation68_spill] sm:$0xff] %v10368_v51  ;;  %v11916_v24 = vld [vmem:[#allocation52_spill] sm:$0xff]  ;;  %v5329_v28 = vmul.f32 %v10368_v51, %v10368_v51 }
 0x3ae   :  { %v10375_v6 = vsub.f32 %v11916_v24, %v10088_v35  ;;  %v5422_v23 = vsel %vm996_vm3, %v5328_v62, 0.0 }
 0x3af   :  { %v5415_v61 = vadd.f32 %v5414_v60, %v5413_v38  ;;  %v11918_v60 = vld [vmem:[#allocation61_spill] sm:$0xff]  ;;  %v5424_v43 = vsel %vm996_vm3, %v5329_v28, 0.0 }
 0x3b0   :  { %11917 = vst [vmem:[#allocation60_spill] sm:$0xff] %v10375_v6  ;;  %v10382_v39 = vsub.f32 %v11918_v60, %v10088_v35  ;;  %v5330_v8 = vmul.f32 %v10375_v6, %v10375_v6 }
 0x3b1   :  { %v5417_v31 = vadd.f32 %v5416_v5, %v5415_v61  ;;  %v11920_v5 = vld [vmem:[#allocation15_spill] sm:$0xff] }
 0x3b2   :  { %11919 = vst [vmem:[#allocation63_spill] sm:$0xff] %v10382_v39  ;;  %v10389_v24 = vsub.f32 %v11920_v5, %v10088_v35  ;;  %v5331_v51 = vmul.f32 %v10382_v39, %v10382_v39  ;;  %v5426_v62 = vsel %vm996_vm3, %v5330_v8, 0.0 }
 0x3b3   :  { %v5419_v38 = vadd.f32 %v5418_v36, %v5417_v31  ;;  %v11922_v36 = vld [vmem:[#allocation84_spill] sm:$0xff] }
 0x3b4   :  { %11921 = vst [vmem:[#allocation69_spill] sm:$0xff] %v10389_v24  ;;  %v10396_v60 = vsub.f32 %v11922_v36, %v10088_v35  ;;  %v5332_v6 = vmul.f32 %v10389_v24, %v10389_v24  ;;  %v5428_v28 = vsel %vm996_vm3, %v5331_v51, 0.0 }
 0x3b5   :  { %v5421_v61 = vadd.f32 %v5420_v55, %v5419_v38  ;;  %v11924_v55 = vld [vmem:[#allocation85_spill] sm:$0xff] }
 0x3b6   :  { %11923 = vst [vmem:[#allocation33_spill] sm:$0xff] %v10396_v60  ;;  %v10403_v5 = vsub.f32 %v11924_v55, %v10088_v35  ;;  %v5333_v39 = vmul.f32 %v10396_v60, %v10396_v60  ;;  %v5430_v8 = vsel %vm996_vm3, %v5332_v6, 0.0 }
 0x3b7   :  { %v5423_v31 = vadd.f32 %v5422_v23, %v5421_v61  ;;  %v11926_v23 = vld [vmem:[#allocation17_spill] sm:$0xff] }
 0x3b8   :  { %11925 = vst [vmem:[#allocation89_spill] sm:$0xff] %v10403_v5  ;;  %v10410_v36 = vsub.f32 %v11926_v23, %v10088_v35  ;;  %v5334_v24 = vmul.f32 %v10403_v5, %v10403_v5  ;;  %v5432_v51 = vsel %vm996_vm3, %v5333_v39, 0.0 }
 0x3b9   :  { %v5425_v38 = vadd.f32 %v5424_v43, %v5423_v31  ;;  %v11928_v43 = vld [vmem:[#allocation25_spill] sm:$0xff] }
 0x3ba   :  { %11927 = vst [vmem:[#allocation39_spill] sm:$0xff] %v10410_v36  ;;  %v10417_v55 = vsub.f32 %v11928_v43, %v10088_v35  ;;  %v5335_v60 = vmul.f32 %v10410_v36, %v10410_v36  ;;  %v5434_v6 = vsel %vm996_vm3, %v5334_v24, 0.0 }
 0x3bb   :  { %v5427_v61 = vadd.f32 %v5426_v62, %v5425_v38  ;;  %v11930_v62 = vld [vmem:[#allocation66_spill] sm:$0xff] }
 0x3bc   :  { %11929 = vst [vmem:[#allocation3_spill] sm:$0xff] %v10417_v55  ;;  %v10424_v23 = vsub.f32 %v11930_v62, %v10088_v35  ;;  %v5336_v5 = vmul.f32 %v10417_v55, %v10417_v55  ;;  %v5436_v39 = vsel %vm996_vm3, %v5335_v60, 0.0 }
 0x3bd   :  { %v5429_v31 = vadd.f32 %v5428_v28, %v5427_v61  ;;  %v11932_v28 = vld [vmem:[#allocation67_spill] sm:$0xff] }
 0x3be   :  { %11931 = vst [vmem:[#allocation90_spill] sm:$0xff] %v10424_v23  ;;  %v10431_v43 = vsub.f32 %v11932_v28, %v10088_v35  ;;  %v5337_v62 = vmul.f32 %v10424_v23, %v10424_v23  ;;  %v5438_v24 = vsel %vm996_vm3, %v5336_v5, 0.0 }
 0x3bf   :  { %v5431_v38 = vadd.f32 %v5430_v8, %v5429_v31  ;;  %v10438_v8 = vsub.f32 %v9998_v33, %v10088_v35 }
 0x3c0   :  { %11933 = vst [vmem:[#allocation91_spill] sm:$0xff] %v10431_v43  ;;  %v5338_v55 = vmul.f32 %v10431_v43, %v10431_v43  ;;  %v5440_v60 = vsel %vm996_vm3, %v5337_v62, 0.0  ;;  %v11937_v43 = vld [vmem:[#allocation62_spill] sm:$0xff] }
 0x3c1   :  { %v5433_v61 = vadd.f32 %v5432_v51, %v5431_v38  ;;  %11934 = vst [vmem:[#allocation43_spill] sm:$0xff] %v10438_v8  ;;  %v11935_v51 = vld [vmem:[#allocation29_spill] sm:$0xff]  ;;  %v5339_v23 = vmul.f32 %v10438_v8, %v10438_v8  ;;  %v10462_v5 = vsub.f32 %v11937_v43, %v10088_v35 }
 0x3c2   :  { %v10445_v28 = vsub.f32 %v11935_v51, %v10088_v35  ;;  %v5442_v51 = vsel %vm996_vm3, %v5338_v55, 0.0  ;;  %v11938_v8 = vld [vmem:[#allocation21_spill] sm:$0xff] }
 0x3c3   :  { %v5435_v31 = vadd.f32 %v5434_v6, %v5433_v61  ;;  %v11936_v6 = vld [vmem:[#allocation19_spill] sm:$0xff]  ;;  %v10469_v62 = vsub.f32 %v11938_v8, %v10088_v35  ;;  %v5343_v43 = vmul.f32 %v10462_v5, %v10462_v5 }
 0x3c4   :  { %v10452_v33 = vsub.f32 %v11936_v6, %v10088_v35  ;;  %v5345_v35 = vmul.f32 %v10096_v30, %v10096_v30 }
 0x3c5   :  { %v5437_v38 = vadd.f32 %v5436_v39, %v5435_v31  ;;  %v5340_v39 = vmul.f32 %v10445_v28, %v10445_v28  ;;  %v5452_v8 = vsel %vm996_vm3, %v5343_v43, 0.0  ;;  %v5349_v43 = vmul.f32 %v10112_v48, %v10112_v48 }
 0x3c7   :  { %v5439_v61 = vadd.f32 %v5438_v24, %v5437_v38  ;;  %v5341_v38 = vmul.f32 %v10452_v33, %v10452_v33  ;;  %v5444_v24 = vsel %vm996_vm3, %v5339_v23, 0.0  ;;  %v5446_v55 = vsel %vm996_vm3, %v5340_v39, 0.0 }
 0x3c8   :  { %v5344_v23 = vmul.f32 %v10469_v62, %v10469_v62  ;;  %v5346_v39 = vmul.f32 %v10100_v53, %v10100_v53 }
 0x3c9   :  { %v5441_v31 = vadd.f32 %v5440_v60, %v5439_v61  ;;  %v5342_v61 = vmul.f32 %v10092_v4, %v10092_v4 }
 0x3cb   :  { %v5443_v36 = vadd.f32 %v5442_v51, %v5441_v31  ;;  %v5448_v31 = vsel %vm996_vm3, %v5341_v38, 0.0  ;;  %v5347_v38 = vmul.f32 %v10104_v9, %v10104_v9 }
 0x3cd   :  { %v5445_v6 = vadd.f32 %v5444_v24, %v5443_v36  ;;  %v5450_v36 = vsel %vm996_vm3, %v5342_v61, 0.0  ;;  %v5348_v61 = vmul.f32 %v10108_v59, %v10108_v59 }
 0x3cf   :  { %v5447_v60 = vadd.f32 %v5446_v55, %v5445_v6  ;;  %v5454_v6 = vsel %vm996_vm3, %v5344_v23, 0.0  ;;  %v5462_v23 = vsel %vm996_vm3, %v5348_v61, 0.0  ;;  %v5354_v61 = vmul.f32 %v10130_v0, %v10130_v0 }
 0x3d1   :  { %v5449_v51 = vadd.f32 %v5448_v31, %v5447_v60  ;;  %v5456_v60 = vsel %vm996_vm3, %v5345_v35, 0.0  ;;  %v5351_v35 = vmul.f32 %v10120_v7, %v10120_v7 }
 0x3d3   :  { %v5451_v24 = vadd.f32 %v5450_v36, %v5449_v51  ;;  %v5458_v51 = vsel %vm996_vm3, %v5346_v39, 0.0  ;;  %v5352_v39 = vmul.f32 %v10124_v29, %v10124_v29 }
 0x3d5   :  { %v5453_v4 = vadd.f32 %v5452_v8, %v5451_v24  ;;  %v5460_v24 = vsel %vm996_vm3, %v5347_v38, 0.0  ;;  %v5353_v38 = vmul.f32 %v10127_v22, %v10127_v22 }
 0x3d7   :  { %v5455_v55 = vadd.f32 %v5454_v6, %v5453_v4  ;;  %v5350_v4 = vmul.f32 %v10116_v40, %v10116_v40 }
 0x3d9   :  { %v5457_v31 = vadd.f32 %v5456_v60, %v5455_v55  ;;  %v5464_v55 = vsel %vm996_vm3, %v5349_v43, 0.0  ;;  %v5355_v43 = vmul.f32 %v10133_v34, %v10133_v34 }
 0x3db   :  { %v5459_v36 = vadd.f32 %v5458_v51, %v5457_v31  ;;  %v5466_v31 = vsel %vm996_vm3, %v5350_v4, 0.0  ;;  %v5356_v4 = vmul.f32 %v10136_v14, %v10136_v14 }
 0x3dd   :  { %v5461_v8 = vadd.f32 %v5460_v24, %v5459_v36  ;;  %v5468_v36 = vsel %vm996_vm3, %v5351_v35, 0.0  ;;  %v5357_v35 = vmul.f32 %v10139_v1, %v10139_v1 }
 0x3df   :  { %v5463_v6 = vadd.f32 %v5462_v23, %v5461_v8  ;;  %v5470_v8 = vsel %vm996_vm3, %v5352_v39, 0.0  ;;  %v5358_v39 = vmul.f32 %v10142_v50, %v10142_v50 }
 0x3e1   :  { %v5465_v60 = vadd.f32 %v5464_v55, %v5463_v6  ;;  %v5472_v6 = vsel %vm996_vm3, %v5353_v38, 0.0  ;;  %v5359_v38 = vmul.f32 %v10145_v10, %v10145_v10 }
 0x3e3   :  { %v5467_v51 = vadd.f32 %v5466_v31, %v5465_v60  ;;  %v5474_v60 = vsel %vm996_vm3, %v5354_v61, 0.0  ;;  %v5360_v61 = vmul.f32 %v10148_v52, %v10148_v52 }
 0x3e5   :  { %v5469_v24 = vadd.f32 %v5468_v36, %v5467_v51  ;;  %v5476_v51 = vsel %vm996_vm3, %v5355_v43, 0.0  ;;  %v5484_v43 = vsel %vm996_vm3, %v5359_v38, 0.0 }
 0x3e7   :  { %v5471_v23 = vadd.f32 %v5470_v8, %v5469_v24  ;;  %v5478_v24 = vsel %vm996_vm3, %v5356_v4, 0.0 }
 0x3e9   :  { %v5473_v55 = vadd.f32 %v5472_v6, %v5471_v23  ;;  %v5480_v23 = vsel %vm996_vm3, %v5357_v35, 0.0 }
 0x3eb   :  { %v5475_v31 = vadd.f32 %v5474_v60, %v5473_v55  ;;  %v5482_v55 = vsel %vm996_vm3, %v5358_v39, 0.0  ;;  %v5495_v39 = vld [vmem:[%s11182_s2] sm:$0x1] }
 0x3ed   :  { %v5477_v36 = vadd.f32 %v5476_v51, %v5475_v31  ;;  %v5486_v51 = vsel %vm996_vm3, %v5360_v61, 0.0 }
 0x3ef   :  { %v5479_v8 = vadd.f32 %v5478_v24, %v5477_v36 }
 0x3f1   :  { %v5481_v6 = vadd.f32 %v5480_v23, %v5479_v8  ;;  %v5500_v23 = vlaneseq }
 0x3f3   :  { %v5483_v60 = vadd.f32 %v5482_v55, %v5481_v6  ;;  %v5501_v52 = vshrl.u32 %v5500_v23, 7  ;;  %v11946_v23 = vld [vmem:[#allocation33_spill] sm:$0xff] }
 0x3f5   :  { %v5485_v31 = vadd.f32 %v5484_v43, %v5483_v60  ;;  %v5502_v38 = vsub.s32 0, %v5501_v52  ;;  %v11939_v60 = vld [vmem:[#allocation38_spill] sm:$0xff]  ;;  %v11940_v43 = vld [vmem:[#allocation28_spill] sm:$0xff] }
 0x3f7   :  { %v5487_v50 = vadd.f32 %v5486_v51, %v5485_v31  ;;  %v11941_v31 = vld [vmem:[#allocation37_spill] sm:$0xff]  ;;  %v11942_v51 = vld [vmem:[#allocation68_spill] sm:$0xff] }
 0x3f9   :  { %v5488_v4 = vrot.slane %v5487_v50, 4 }
 0x3fb   :  { %v5489_v36 = vadd.f32 %v5488_v4, %v5487_v50  ;;  %v11943_v4 = vld [vmem:[#allocation60_spill] sm:$0xff] }
 0x3fd   :  { %v5490_v24 = vrot.slane %v5489_v36, 2 }
 0x3ff   :  { %v5491_v1 = vadd.f32 %v5490_v24, %v5489_v36  ;;  %v11944_v36 = vld [vmem:[#allocation63_spill] sm:$0xff] }
 0x401   :  { %v5492_v10 = vrot.slane %v5491_v1, 1 }
 0x403   :  { %v5493_v14 = vadd.f32 %v5492_v10, %v5491_v1 }
 0x405   :  { %v5494_v35 = vmul.f32 0.001953125, %v5493_v14 }
 0x407   :  { %v5496_v8 = vadd.f32 1e-05, %v5494_v35  ;;  %v11945_v35 = vld [vmem:[#allocation69_spill] sm:$0xff] }
 0x409   :  { %7088 = vrsqrt.f32 %v5496_v8 }
 0x416   :  { %v7089_v6 = vpop.eup %7088 }
 0x417   :  { %v5498_v55 = vmul.f32 %v7089_v6, %v5495_v39 }
 0x419   :  { %v10533_v61 = vrot.slane %v5498_v55, %v5502_v38  ;;  %v11947_v38 = vld [vmem:[#allocation89_spill] sm:$0xff]  ;;  %v11948_v55 = vld [vmem:[#allocation39_spill] sm:$0xff] }
 0x41b   :  { %v10537_v50 = vmul.f32 %v10533_v61, %v10152_v37  ;;  %v10541_v14 = vmul.f32 %v10533_v61, %v10156_v3  ;;  %v10545_v1 = vmul.f32 %v10533_v61, %v10160_v20  ;;  %v10549_v10 = vmul.f32 %v10533_v61, %v10164_v12 }
 0x41c   :  { %v10553_v52 = vmul.f32 %v10533_v61, %v10172_v27  ;;  %v10557_v37 = vmul.f32 %v10533_v61, %v10178_v45  ;;  %v10561_v3 = vmul.f32 %v10533_v61, %v10186_v49  ;;  %v10565_v20 = vmul.f32 %v10533_v61, %v10193_v63 }
 0x41d   :  { %v10569_v12 = vmul.f32 %v10533_v61, %v10200_v2  ;;  %v10573_v27 = vmul.f32 %v10533_v61, %v10207_v11  ;;  %v10577_v45 = vmul.f32 %v10533_v61, %v10214_v21  ;;  %v10581_v49 = vmul.f32 %v10533_v61, %v10221_v15 }
 0x41e   :  { %v10585_v63 = vmul.f32 %v10533_v61, %v10228_v54  ;;  %v10589_v2 = vmul.f32 %v10533_v61, %v10235_v56  ;;  %v10593_v11 = vmul.f32 %v10533_v61, %v10242_v32  ;;  %v10597_v21 = vmul.f32 %v10533_v61, %v10249_v58 }
 0x41f   :  { %v10601_v15 = vmul.f32 %v10533_v61, %v10256_v46  ;;  %v10605_v54 = vmul.f32 %v10533_v61, %v10263_v13  ;;  %v10609_v56 = vmul.f32 %v10533_v61, %v10270_v41  ;;  %v10613_v32 = vmul.f32 %v10533_v61, %v10277_v57 }
 0x420   :  { %v10617_v58 = vmul.f32 %v10533_v61, %v10284_v47  ;;  %v10621_v46 = vmul.f32 %v10533_v61, %v10291_v18  ;;  %v10625_v13 = vmul.f32 %v10533_v61, %v10298_v16  ;;  %v10629_v41 = vmul.f32 %v10533_v61, %v10305_v42 }
 0x421   :  { %v10633_v57 = vmul.f32 %v10533_v61, %v10312_v17  ;;  %v10637_v47 = vmul.f32 %v10533_v61, %v10319_v19  ;;  %v10641_v18 = vmul.f32 %v10533_v61, %v10326_v26  ;;  %v10645_v16 = vmul.f32 %v10533_v61, %v10333_v25 }
 0x422   :  { %v10649_v42 = vmul.f32 %v10533_v61, %v10340_v44  ;;  %v10653_v17 = vmul.f32 %v10533_v61, %v11939_v60  ;;  %v10657_v19 = vmul.f32 %v10533_v61, %v11940_v43  ;;  %v10661_v26 = vmul.f32 %v10533_v61, %v11941_v31  ;;  %v11949_v43 = vld [vmem:[#allocation3_spill] sm:$0xff] }
 0x423   :  { %v10665_v25 = vmul.f32 %v10533_v61, %v11942_v51  ;;  %v10669_v44 = vmul.f32 %v10533_v61, %v11943_v4  ;;  %v10673_v24 = vmul.f32 %v10533_v61, %v11944_v36  ;;  %v10677_v8 = vmul.f32 %v10533_v61, %v11945_v35  ;;  %v11951_v51 = vld [vmem:[#allocation90_spill] sm:$0xff]  ;;  %v11952_v36 = vld [vmem:[#allocation91_spill] sm:$0xff] }
 0x424   :  { %v10681_v39 = vmul.f32 %v10533_v61, %v11946_v23  ;;  %v10685_v6 = vmul.f32 %v10533_v61, %v11947_v38  ;;  %v10689_v60 = vmul.f32 %v10533_v61, %v11948_v55  ;;  %v10693_v31 = vmul.f32 %v10533_v61, %v11949_v43  ;;  %v11953_v23 = vld [vmem:[#allocation43_spill] sm:$0xff] }
 0x425   :  { %v10697_v4 = vmul.f32 %v10533_v61, %v11951_v51  ;;  %v10701_v35 = vmul.f32 %v10533_v61, %v11952_v36  ;;  %v10705_v38 = vmul.f32 %v10533_v61, %v11953_v23  ;;  %v10709_v55 = vmul.f32 %v10533_v61, %v10445_v28 }
 0x426   :  { %11950 = vst [vmem:[#allocation2_spill] sm:$0xff] %v10693_v31  ;;  %v10713_v43 = vmul.f32 %v10533_v61, %v10452_v33  ;;  %v11954_v31 = vld [vmem:[#allocation64_spill] sm:$0xff]  ;;  %v10721_v36 = vmul.f32 %v10533_v61, %v10462_v5  ;;  %v10725_v23 = vmul.f32 %v10533_v61, %v10469_v62  ;;  %v10729_v28 = vmul.f32 %v10533_v61, %v10096_v30 }
 0x427   :  { %v10717_v51 = vmul.f32 %v10533_v61, %v11954_v31  ;;  %v10733_v33 = vmul.f32 %v10533_v61, %v10100_v53  ;;  %v10737_v31 = vmul.f32 %v10533_v61, %v10104_v9  ;;  %v10741_v5 = vmul.f32 %v10533_v61, %v10108_v59  ;;  %v10762_v59 = vld [vmem:[%s11183_s3] ss:$0 sm:$0xff] }
 0x428   :  { %v10745_v62 = vmul.f32 %v10533_v61, %v10112_v48  ;;  %v10749_v30 = vmul.f32 %v10533_v61, %v10116_v40  ;;  %v10753_v53 = vmul.f32 %v10533_v61, %v10120_v7  ;;  %v10757_v9 = vmul.f32 %v10533_v61, %v10124_v29 }
 0x429   :  { %v10766_v48 = vmul.f32 %v10533_v61, %v10127_v22  ;;  %v10770_v40 = vmul.f32 %v10533_v61, %v10130_v0  ;;  %v10774_v7 = vmul.f32 %v10533_v61, %v10133_v34 }
 0x42a   :  { %11955 = vst [vmem:[#allocation71_spill] sm:$0xff] %v10745_v62  ;;  %11956 = vst [vmem:[#allocation108_spill] sm:$0xff] %v10749_v30  ;;  %v11964_v62 = vld [vmem:[#allocation57_spill] sm:$0xff] }
 0x42b   :  { %11957 = vst [vmem:[#allocation54_spill] sm:$0xff] %v10753_v53  ;;  %11958 = vst [vmem:[#allocation93_spill] sm:$0xff] %v10757_v9  ;;  %v11961_v53 = vld [vmem:[#allocation27_spill] sm:$0xff]  ;;  %v11963_v9 = vld [vmem:[#allocation70_spill] sm:$0xff]  ;;  %v10786_v22 = vmul.f32 %v10533_v61, %v11964_v62  ;;  %v5579_v62 = vadd.f32 %v10762_v59, %v10549_v10  ;;  %v5586_v10 = vadd.f32 %v10762_v59, %v10577_v45 }
 0x42c   :  { %11959 = vst [vmem:[#allocation6_spill] sm:$0xff] %v10766_v48  ;;  %11960 = vst [vmem:[#allocation94_spill] sm:$0xff] %v10770_v40  ;;  %v10778_v29 = vmul.f32 %v10533_v61, %v11961_v53  ;;  %v10782_v30 = vmul.f32 %v10533_v61, %v11963_v9  ;;  %v11965_v48 = vld [vmem:[#allocation30_spill] sm:$0xff]  ;;  %v11967_v40 = vld [vmem:[#allocation24_spill] sm:$0xff]  ;;  %v5576_v53 = vadd.f32 %v10762_v59, %v10537_v50 }
 0x42d   :  { %v10790_v0 = vmul.f32 %v10533_v61, %v11965_v48  ;;  %v10794_v34 = vmul.f32 %v10533_v61, %v11967_v40  ;;  %v5578_v9 = vadd.f32 %v10762_v59, %v10545_v1  ;;  %v5580_v48 = vadd.f32 %v10762_v59, %v10553_v52  ;;  %5643 = vst.msk [vmem:[%s11184_s4 + $0x18] sm:$0xff] %vm996_vm3, %v5579_v62 }
 0x42e   :  { %11962 = vst [vmem:[#allocation8_spill] sm:$0xff] %v10778_v29  ;;  %v5577_v29 = vadd.f32 %v10762_v59, %v10541_v14  ;;  %v5582_v61 = vadd.f32 %v10762_v59, %v10561_v3  ;;  %v5583_v50 = vadd.f32 %v10762_v59, %v10565_v20  ;;  %v5584_v14 = vadd.f32 %v10762_v59, %v10569_v12 }
 0x42f   :  { %11966 = vst [vmem:[#allocation10_spill] sm:$0xff] %v10790_v0  ;;  %v5581_v0 = vadd.f32 %v10762_v59, %v10557_v37  ;;  %v5585_v1 = vadd.f32 %v10762_v59, %v10573_v27  ;;  %v5587_v52 = vadd.f32 %v10762_v59, %v10581_v49  ;;  %5640 = vst.msk [vmem:[%s11184_s4] sm:$0xff] %vm996_vm3, %v5576_v53 }
 0x430   :  { %5641 = vst.msk [vmem:[%s11184_s4 + $0x8] sm:$0xff] %vm996_vm3, %v5577_v29  ;;  %5642 = vst.msk [vmem:[%s11184_s4 + $0x10] sm:$0xff] %vm996_vm3, %v5578_v9  ;;  %v5588_v37 = vadd.f32 %v10762_v59, %v10585_v63  ;;  %v5589_v3 = vadd.f32 %v10762_v59, %v10589_v2  ;;  %v5590_v20 = vadd.f32 %v10762_v59, %v10593_v11 }
 0x431   :  { %v5591_v12 = vadd.f32 %v10762_v59, %v10597_v21  ;;  %5644 = vst.msk [vmem:[%s11184_s4 + $0x20] sm:$0xff] %vm996_vm3, %v5580_v48  ;;  %5645 = vst.msk [vmem:[%s11184_s4 + $0x28] sm:$0xff] %vm996_vm3, %v5581_v0  ;;  %v5592_v27 = vadd.f32 %v10762_v59, %v10601_v15  ;;  %v5593_v45 = vadd.f32 %v10762_v59, %v10605_v54 }
 0x432   :  { %5646 = vst.msk [vmem:[%s11184_s4 + $0x30] sm:$0xff] %vm996_vm3, %v5582_v61  ;;  %5647 = vst.msk [vmem:[%s11184_s4 + $0x38] sm:$0xff] %vm996_vm3, %v5583_v50  ;;  %v5594_v49 = vadd.f32 %v10762_v59, %v10609_v56  ;;  %v5595_v63 = vadd.f32 %v10762_v59, %v10613_v32  ;;  %v5596_v2 = vadd.f32 %v10762_v59, %v10617_v58  ;;  %v11972_v29 = vld [vmem:[#allocation93_spill] sm:$0xff] }
 0x433   :  { %5648 = vst.msk [vmem:[%s11184_s4 + $0x40] sm:$0xff] %vm996_vm3, %v5584_v14  ;;  %5649 = vst.msk [vmem:[%s11184_s4 + $0x48] sm:$0xff] %vm996_vm3, %v5585_v1  ;;  %v5597_v11 = vadd.f32 %v10762_v59, %v10621_v46  ;;  %v5598_v21 = vadd.f32 %v10762_v59, %v10625_v13  ;;  %v5599_v15 = vadd.f32 %v10762_v59, %v10629_v41  ;;  %v11973_v53 = vld [vmem:[#allocation6_spill] sm:$0xff] }
 0x434   :  { %5650 = vst.msk [vmem:[%s11184_s4 + $0x50] sm:$0xff] %vm996_vm3, %v5586_v10  ;;  %5651 = vst.msk [vmem:[%s11184_s4 + $0x58] sm:$0xff] %vm996_vm3, %v5587_v52  ;;  %v5600_v54 = vadd.f32 %v10762_v59, %v10633_v57  ;;  %v5601_v56 = vadd.f32 %v10762_v59, %v10637_v47  ;;  %v5602_v32 = vadd.f32 %v10762_v59, %v10641_v18  ;;  %v11974_v62 = vld [vmem:[#allocation94_spill] sm:$0xff] }
 0x435   :  { %5652 = vst.msk [vmem:[%s11184_s4 + $0x60] sm:$0xff] %vm996_vm3, %v5588_v37  ;;  %5653 = vst.msk [vmem:[%s11184_s4 + $0x68] sm:$0xff] %vm996_vm3, %v5589_v3  ;;  %v5603_v58 = vadd.f32 %v10762_v59, %v10645_v16  ;;  %v5604_v46 = vadd.f32 %v10762_v59, %v10649_v42  ;;  %v5605_v13 = vadd.f32 %v10762_v59, %v10653_v17  ;;  %v11975_v50 = vld [vmem:[#allocation8_spill] sm:$0xff] }
 0x436   :  { %5654 = vst.msk [vmem:[%s11184_s4 + $0x70] sm:$0xff] %vm996_vm3, %v5590_v20  ;;  %5655 = vst.msk [vmem:[%s11184_s4 + $0x78] sm:$0xff] %vm996_vm3, %v5591_v12  ;;  %v5606_v41 = vadd.f32 %v10762_v59, %v10657_v19  ;;  %v5607_v57 = vadd.f32 %v10762_v59, %v10661_v26  ;;  %v5608_v47 = vadd.f32 %v10762_v59, %v10665_v25  ;;  %v11968_v25 = vld [vmem:[#allocation2_spill] sm:$0xff] }
 0x437   :  { %5656 = vst.msk [vmem:[%s11184_s4 + $0x80] sm:$0xff] %vm996_vm3, %v5592_v27  ;;  %5657 = vst.msk [vmem:[%s11184_s4 + $0x88] sm:$0xff] %vm996_vm3, %v5593_v45  ;;  %v5609_v18 = vadd.f32 %v10762_v59, %v10669_v44  ;;  %v5610_v16 = vadd.f32 %v10762_v59, %v10673_v24  ;;  %v5611_v42 = vadd.f32 %v10762_v59, %v10677_v8  ;;  %v11976_v10 = vld [vmem:[#allocation10_spill] sm:$0xff] }
 0x438   :  { %5658 = vst.msk [vmem:[%s11184_s4 + $0x90] sm:$0xff] %vm996_vm3, %v5594_v49  ;;  %5659 = vst.msk [vmem:[%s11184_s4 + $0x98] sm:$0xff] %vm996_vm3, %v5595_v63  ;;  %v5612_v17 = vadd.f32 %v10762_v59, %v10681_v39  ;;  %v5613_v19 = vadd.f32 %v10762_v59, %v10685_v6  ;;  %v5614_v26 = vadd.f32 %v10762_v59, %v10689_v60 }
 0x439   :  { %5660 = vst.msk [vmem:[%s11184_s4 + $0xa0] sm:$0xff] %vm996_vm3, %v5596_v2  ;;  %5661 = vst.msk [vmem:[%s11184_s4 + $0xa8] sm:$0xff] %vm996_vm3, %v5597_v11  ;;  %v5615_v44 = vadd.f32 %v10762_v59, %v11968_v25  ;;  %v5616_v24 = vadd.f32 %v10762_v59, %v10697_v4  ;;  %v5617_v8 = vadd.f32 %v10762_v59, %v10701_v35 }
 0x43a   :  { %5662 = vst.msk [vmem:[%s11184_s4 + $0xb0] sm:$0xff] %vm996_vm3, %v5598_v21  ;;  %5663 = vst.msk [vmem:[%s11184_s4 + $0xb8] sm:$0xff] %vm996_vm3, %v5599_v15  ;;  %v5618_v39 = vadd.f32 %v10762_v59, %v10705_v38  ;;  %v5619_v6 = vadd.f32 %v10762_v59, %v10709_v55  ;;  %v5620_v60 = vadd.f32 %v10762_v59, %v10713_v43 }
 0x43b   :  { %5664 = vst.msk [vmem:[%s11184_s4 + $0xc0] sm:$0xff] %vm996_vm3, %v5600_v54  ;;  %5665 = vst.msk [vmem:[%s11184_s4 + $0xc8] sm:$0xff] %vm996_vm3, %v5601_v56  ;;  %v5621_v4 = vadd.f32 %v10762_v59, %v10717_v51  ;;  %v5622_v35 = vadd.f32 %v10762_v59, %v10721_v36  ;;  %v5623_v38 = vadd.f32 %v10762_v59, %v10725_v23  ;;  %v11969_v23 = vld [vmem:[#allocation71_spill] sm:$0xff] }
 0x43c   :  { %5666 = vst.msk [vmem:[%s11184_s4 + $0xd0] sm:$0xff] %vm996_vm3, %v5602_v32  ;;  %5667 = vst.msk [vmem:[%s11184_s4 + $0xd8] sm:$0xff] %vm996_vm3, %v5603_v58  ;;  %v5624_v55 = vadd.f32 %v10762_v59, %v10729_v28  ;;  %v5625_v43 = vadd.f32 %v10762_v59, %v10733_v33  ;;  %v5626_v51 = vadd.f32 %v10762_v59, %v10737_v31  ;;  %v11970_v33 = vld [vmem:[#allocation108_spill] sm:$0xff] }
 0x43d   :  { %5668 = vst.msk [vmem:[%s11184_s4 + $0xe0] sm:$0xff] %vm996_vm3, %v5604_v46  ;;  %5669 = vst.msk [vmem:[%s11184_s4 + $0xe8] sm:$0xff] %vm996_vm3, %v5605_v13  ;;  %v5627_v36 = vadd.f32 %v10762_v59, %v10741_v5  ;;  %v5628_v28 = vadd.f32 %v10762_v59, %v11969_v23  ;;  %v5629_v31 = vadd.f32 %v10762_v59, %v11970_v33  ;;  %v11971_v5 = vld [vmem:[#allocation54_spill] sm:$0xff] }
 0x43e   :  { %5670 = vst.msk [vmem:[%s11184_s4 + $0xf0] sm:$0xff] %vm996_vm3, %v5606_v41  ;;  %5671 = vst.msk [vmem:[%s11184_s4 + $0xf8] sm:$0xff] %vm996_vm3, %v5607_v57  ;;  %v5630_v40 = vadd.f32 %v10762_v59, %v11971_v5  ;;  %v5631_v0 = vadd.f32 %v10762_v59, %v11972_v29  ;;  %v5632_v9 = vadd.f32 %v10762_v59, %v11973_v53 }
 0x43f   :  { %5672 = vst.msk [vmem:[%s11184_s4 + $0x100] sm:$0xff] %vm996_vm3, %v5608_v47  ;;  %5673 = vst.msk [vmem:[%s11184_s4 + $0x108] sm:$0xff] %vm996_vm3, %v5609_v18  ;;  %v5633_v48 = vadd.f32 %v10762_v59, %v11974_v62  ;;  %v5634_v61 = vadd.f32 %v10762_v59, %v10774_v7  ;;  %v5635_v14 = vadd.f32 %v10762_v59, %v11975_v50 }
 0x440   :  { %5674 = vst.msk [vmem:[%s11184_s4 + $0x110] sm:$0xff] %vm996_vm3, %v5610_v16  ;;  %5675 = vst.msk [vmem:[%s11184_s4 + $0x118] sm:$0xff] %vm996_vm3, %v5611_v42  ;;  %v5636_v7 = vadd.f32 %v10762_v59, %v10782_v30  ;;  %v5637_v1 = vadd.f32 %v10762_v59, %v10786_v22  ;;  %v5638_v52 = vadd.f32 %v10762_v59, %v11976_v10 }
 0x441   :  { %5676 = vst.msk [vmem:[%s11184_s4 + $0x120] sm:$0xff] %vm996_vm3, %v5612_v17  ;;  %5677 = vst.msk [vmem:[%s11184_s4 + $0x128] sm:$0xff] %vm996_vm3, %v5613_v19  ;;  %v5639_v37 = vadd.f32 %v10762_v59, %v10794_v34 }
 0x442   :  { %5678 = vst.msk [vmem:[%s11184_s4 + $0x130] sm:$0xff] %vm996_vm3, %v5614_v26  ;;  %5679 = vst.msk [vmem:[%s11184_s4 + $0x138] sm:$0xff] %vm996_vm3, %v5615_v44 }
 0x443   :  { %5680 = vst.msk [vmem:[%s11184_s4 + $0x140] sm:$0xff] %vm996_vm3, %v5616_v24  ;;  %5681 = vst.msk [vmem:[%s11184_s4 + $0x148] sm:$0xff] %vm996_vm3, %v5617_v8 }
 0x444   :  { %5682 = vst.msk [vmem:[%s11184_s4 + $0x150] sm:$0xff] %vm996_vm3, %v5618_v39  ;;  %5683 = vst.msk [vmem:[%s11184_s4 + $0x158] sm:$0xff] %vm996_vm3, %v5619_v6 }
 0x445   :  { %5684 = vst.msk [vmem:[%s11184_s4 + $0x160] sm:$0xff] %vm996_vm3, %v5620_v60  ;;  %5685 = vst.msk [vmem:[%s11184_s4 + $0x168] sm:$0xff] %vm996_vm3, %v5621_v4 }
 0x446   :  { %5686 = vst.msk [vmem:[%s11184_s4 + $0x170] sm:$0xff] %vm996_vm3, %v5622_v35  ;;  %5687 = vst.msk [vmem:[%s11184_s4 + $0x178] sm:$0xff] %vm996_vm3, %v5623_v38 }
 0x447   :  { %5688 = vst.msk [vmem:[%s11184_s4 + $0x180] sm:$0xff] %vm996_vm3, %v5624_v55  ;;  %5689 = vst.msk [vmem:[%s11184_s4 + $0x188] sm:$0xff] %vm996_vm3, %v5625_v43 }
 0x448   :  { %5690 = vst.msk [vmem:[%s11184_s4 + $0x190] sm:$0xff] %vm996_vm3, %v5626_v51  ;;  %5691 = vst.msk [vmem:[%s11184_s4 + $0x198] sm:$0xff] %vm996_vm3, %v5627_v36 }
 0x449   :  { %5692 = vst.msk [vmem:[%s11184_s4 + $0x1a0] sm:$0xff] %vm996_vm3, %v5628_v28  ;;  %5693 = vst.msk [vmem:[%s11184_s4 + $0x1a8] sm:$0xff] %vm996_vm3, %v5629_v31 }
 0x44a   :  { %5694 = vst.msk [vmem:[%s11184_s4 + $0x1b0] sm:$0xff] %vm996_vm3, %v5630_v40  ;;  %5695 = vst.msk [vmem:[%s11184_s4 + $0x1b8] sm:$0xff] %vm996_vm3, %v5631_v0 }
 0x44b   :  { %5696 = vst.msk [vmem:[%s11184_s4 + $0x1c0] sm:$0xff] %vm996_vm3, %v5632_v9  ;;  %5697 = vst.msk [vmem:[%s11184_s4 + $0x1c8] sm:$0xff] %vm996_vm3, %v5633_v48 }
 0x44c   :  { %5698 = vst.msk [vmem:[%s11184_s4 + $0x1d0] sm:$0xff] %vm996_vm3, %v5634_v61  ;;  %5699 = vst.msk [vmem:[%s11184_s4 + $0x1d8] sm:$0xff] %vm996_vm3, %v5635_v14 }
 0x44d   :  { %5700 = vst.msk [vmem:[%s11184_s4 + $0x1e0] sm:$0xff] %vm996_vm3, %v5636_v7  ;;  %5701 = vst.msk [vmem:[%s11184_s4 + $0x1e8] sm:$0xff] %vm996_vm3, %v5637_v1 }
 0x44e   :  { %5702 = vst.msk [vmem:[%s11184_s4 + $0x1f0] sm:$0xff] %vm996_vm3, %v5638_v52  ;;  %5703 = vst.msk [vmem:[%s11184_s4 + $0x1f8] sm:$0xff] %vm996_vm3, %v5639_v37 }

</bundles_post_ra>
